<compile_context>
chip_gen: v7x
topology: tpu7x:2x2x1
jax: 0.10.0
libtpu: 0.0.40
codegen_flags: <defaults>
</compile_context>

<pallas_src>
import functools
import math

import jax
import jax.numpy as jnp
from jax.experimental import pallas as pl
from jax.experimental.pallas import tpu as pltpu


# ----------------------------- small config -----------------------------
class Cfg:
    d_model = 32
    d_ff = 64
    d_kv = 8
    n_heads = 4
    n_decoder_layers = 2
    rel_attn_num_buckets = 8
    rel_attn_max_distance = 16
    layer_norm_eps = 1e-6


# ----------------------------- in-kernel helpers -----------------------------
def _rms_norm(x, w, eps):
    var = jnp.mean(x * x, axis=-1, keepdims=True)
    return x * jax.lax.rsqrt(var + eps) * w


def _mha(q_rows, k_rows, v_rows, bias, *, n_heads, d_kv):
    """Multi-head attention on batch-folded rows using only 2D MXU matmuls.

    q_rows: (Rq, H*dkv) rows ordered (batch, query position)
    k_rows / v_rows: (Rk, H*dkv) rows ordered (batch, key position)
    bias: (H, Rq, Rk) or (Rq, Rk) additive score bias; cross-batch entries are
          already -1e9 so softmax zeroes them out exactly.
    returns (Rq, H*dkv) context rows (heads concatenated along lanes).
    """
    kT = k_rows.T                                   # one 2D transpose per block
    ctx_heads = []
    for h in range(n_heads):                        # static unroll over heads
        sl = slice(h * d_kv, (h + 1) * d_kv)
        # NOTE: T5-style attention has no 1/sqrt(d_kv) scaling.
        s = jnp.dot(q_rows[:, sl], kT[sl, :], preferred_element_type=jnp.float32)
        s = s + (bias[h] if bias.ndim == 3 else bias)
        p = jnp.exp(s - jnp.max(s, axis=-1, keepdims=True))
        w = p * pl.reciprocal(jnp.sum(p, axis=-1, keepdims=True), approx=True)
        ctx_heads.append(jnp.dot(w, v_rows[:, sl], preferred_element_type=jnp.float32))
    return jnp.concatenate(ctx_heads, axis=-1)      # (Rq, H*dkv)


# ----------------------------- fused decoder kernel -----------------------------
def _decoder_kernel(x_ref, enc_ref, sbias_ref, cbias_ref,
                    sa_ln_ref, sa_wqkv_ref, sa_wo_ref,
                    ca_ln_ref, ca_wq_ref, ca_wkv_ref, ca_wo_ref,
                    ff_ln_ref, ff_wi_ref, ff_wo_ref,
                    final_ln_ref, out_ref,
                    *, n_layers, n_heads, d_kv, eps):
    inner = n_heads * d_kv

    x = x_ref[...]                                  # (B*Tq, D)
    enc = enc_ref[...]                              # (B*Tk, D)
    sbias = sbias_ref[...]                          # (H, B*Tq, B*Tq) mask+pos-bias
    cbias = cbias_ref[...]                          # (B*Tq, B*Tk) cross-attn mask

    # Layer-invariant cross-attention K/V projection, hoisted out of the layer
    # loop: one lane-dense matmul -> (B*Tk, L*2*inner), sliced per layer below.
    kv_all = jnp.dot(enc, ca_wkv_ref[...], preferred_element_type=jnp.float32)

    for l in range(n_layers):                       # static unroll; weights resident in VMEM
        # --- self-attention: pre-norm, fused QKV, single output projection, residual ---
        xn = _rms_norm(x, sa_ln_ref[l], eps)
        qkv = jnp.dot(xn, sa_wqkv_ref[l], preferred_element_type=jnp.float32)   # (B*Tq, 3*inner)
        ctx = _mha(qkv[:, :inner], qkv[:, inner:2 * inner], qkv[:, 2 * inner:],
                   sbias, n_heads=n_heads, d_kv=d_kv)
        x = x + jnp.dot(ctx, sa_wo_ref[l], preferred_element_type=jnp.float32)

        # --- cross-attention: encoder states are NOT re-normalized, hoisted KV ---
        xn = _rms_norm(x, ca_ln_ref[l], eps)
        q = jnp.dot(xn, ca_wq_ref[l], preferred_element_type=jnp.float32)        # (B*Tq, inner)
        kv = kv_all[:, l * 2 * inner:(l + 1) * 2 * inner]                        # (B*Tk, 2*inner)
        ctx = _mha(q, kv[:, :inner], kv[:, inner:], cbias,
                   n_heads=n_heads, d_kv=d_kv)
        x = x + jnp.dot(ctx, ca_wo_ref[l], preferred_element_type=jnp.float32)

        # --- feed-forward: pre-norm, ReLU, residual ---
        xn = _rms_norm(x, ff_ln_ref[l], eps)
        h = jnp.maximum(jnp.dot(xn, ff_wi_ref[l], preferred_element_type=jnp.float32), 0.0)
        x = x + jnp.dot(h, ff_wo_ref[l], preferred_element_type=jnp.float32)

    # TODO(synk): dropout layers are identity (eval-mode semantics); no RNG dropout.
    out_ref[...] = _rms_norm(x, final_ln_ref[...], eps).astype(out_ref.dtype)


# ----------------------------- relative position bias (plain-JAX glue) -----------------------------
def relative_position_bucket_decoder(relative_position, num_buckets, max_distance):
    # is_decoder=True => unidirectional
    rp = jnp.maximum(-relative_position, 0)             # == -clamp(rp, max=0)
    num_exact = num_buckets // 2
    num_log = num_buckets - num_exact
    rp_safe = jnp.maximum(rp, 1)                         # avoid log(0); masked below
    log_ratio = (jnp.log(rp_safe.astype(jnp.float32) / num_exact)
                 / math.log(max_distance / num_exact))
    log_pos = num_exact + (log_ratio * num_log).astype(jnp.int32)  # trunc like .to(long)
    log_pos = jnp.minimum(log_pos, num_buckets - 1)
    return jnp.where(rp < num_exact, rp, log_pos)


def compute_position_bias(rel_bias_table, q_len, k_len, cfg):
    qpos = jnp.arange(q_len, dtype=jnp.int32)[:, None]
    kpos = jnp.arange(k_len, dtype=jnp.int32)[None, :]
    rel = kpos - qpos
    bucket = relative_position_bucket_decoder(rel, cfg.rel_attn_num_buckets,
                                              cfg.rel_attn_max_distance)
    vals = rel_bias_table[bucket]                        # (Tq, Tk, H)
    return jnp.transpose(vals, (2, 0, 1))                # (H, Tq, Tk)


def _batch_block_diag(m, neg=-1e9):
    """(B, Tq, Tk) per-batch additive masks -> (B*Tq, B*Tk) score bias with
    `neg` on all cross-batch blocks (rows=(b,q), cols=(b',k))."""
    B, Tq, Tk = m.shape
    out = jnp.full((B, Tq, B, Tk), neg, m.dtype)
    out = out.at[jnp.arange(B), :, jnp.arange(B), :].set(m)
    return out.reshape(B * Tq, B * Tk)


# ----------------------------- Decoder forward (single fused pallas_call) -----------------------------
def decoder_forward(params, hidden_states, mask, encoder_states, encoder_mask, cfg):
    B, Tq, D = hidden_states.shape
    Tk = encoder_states.shape[1]
    H, dkv, L = cfg.n_heads, cfg.d_kv, cfg.n_decoder_layers

    # Relative-position bias computed once (layer 0) and reused by later layers.
    pos_bias = compute_position_bias(params["rel_bias"], Tq, Tq, cfg)        # (H, Tq, Tq)

    # Masks as additive float tensors (wrapper-side layout plumbing).
    self_mask = jnp.broadcast_to(mask[:, 0], (B, Tq, Tq)).astype(jnp.float32)
    cross_mask = jnp.broadcast_to(encoder_mask[:, 0], (B, Tq, Tk)).astype(jnp.float32)

    # Combined additive score biases for batch-folded attention:
    #   diagonal (same-batch) blocks = mask (+ pos bias for self-attn),
    #   cross-batch blocks = -1e9 -> exactly zero softmax weight in-kernel.
    sbias = _batch_block_diag(self_mask)[None] + jnp.tile(pos_bias, (1, B, B))  # (H, B*Tq, B*Tq)
    cbias = _batch_block_diag(cross_mask)                                       # (B*Tq, B*Tk)

    # Stack per-layer weights; pre-fuse QKV (self) and all-layer KV (cross).
    layers = params["layers"]
    stack = lambda name: jnp.stack([ly[name] for ly in layers], axis=0)
    sa_ln = stack("sa_ln")[:, None, :]                                           # (L,1,D)
    sa_wqkv = jnp.concatenate([stack("sa_wq"), stack("sa_wk"), stack("sa_wv")], axis=-1)
    sa_wo = stack("sa_wo")
    ca_ln = stack("ca_ln")[:, None, :]
    ca_wq = stack("ca_wq")
    ca_wkv = jnp.concatenate(                                                    # (D, L*2*inner)
        [jnp.concatenate([ly["ca_wk"], ly["ca_wv"]], axis=-1) for ly in layers], axis=-1)
    ca_wo = stack("ca_wo")
    ff_ln = stack("ff_ln")[:, None, :]
    ff_wi = stack("ff_wi")
    ff_wo = stack("ff_wo")
    final_ln = params["final_ln"][None, :]                                       # (1,D)

    operands = (hidden_states.reshape(B * Tq, D),
                encoder_states.reshape(B * Tk, D),
                sbias, cbias,
                sa_ln, sa_wqkv, sa_wo,
                ca_ln, ca_wq, ca_wkv, ca_wo,
                ff_ln, ff_wi, ff_wo, final_ln)

    kernel = functools.partial(_decoder_kernel, n_layers=L, n_heads=H,
                               d_kv=dkv, eps=cfg.layer_norm_eps)
    vmem = lambda: pl.BlockSpec(memory_space=pltpu.MemorySpace.VMEM)

    out = pl.pallas_call(
        kernel,
        out_shape=jax.ShapeDtypeStruct((B * Tq, D), hidden_states.dtype),
        in_specs=[vmem() for _ in operands],
        out_specs=vmem(),
    )(*operands)
    return out.reshape(B, Tq, D)


# ----------------------------- parameters -----------------------------
def init_params(cfg, key):
    inner = cfg.n_heads * cfg.d_kv
    keys = iter(jax.random.split(key, 64))   # generous: avoids key-count bugs

    def w(shape, scale=0.05):
        return jax.random.normal(next(keys), shape, jnp.float32) * scale

    def ln():
        return jnp.ones((cfg.d_model,), jnp.float32) + w((cfg.d_model,), 0.1)

    layers = []
    for _ in range(cfg.n_decoder_layers):
        layers.append(dict(
            sa_ln=ln(),
            sa_wq=w((cfg.d_model, inner)), sa_wk=w((cfg.d_model, inner)),
            sa_wv=w((cfg.d_model, inner)), sa_wo=w((inner, cfg.d_model)),
            ca_ln=ln(),
            ca_wq=w((cfg.d_model, inner)), ca_wk=w((cfg.d_model, inner)),
            ca_wv=w((cfg.d_model, inner)), ca_wo=w((inner, cfg.d_model)),
            ff_ln=ln(),
            ff_wi=w((cfg.d_model, cfg.d_ff)), ff_wo=w((cfg.d_ff, cfg.d_model)),
        ))
    return dict(layers=layers,
                rel_bias=w((cfg.rel_attn_num_buckets, cfg.n_heads)),
                final_ln=ln())


# ----------------------------- pure-JAX reference -----------------------------
def _ref_rms(x, w, eps):
    var = jnp.mean(x * x, axis=-1, keepdims=True)
    return x * jax.lax.rsqrt(var + eps) * w


def _ref_attn(x, ctx, mask, bias, lnw, wq, wk, wv, wo, norm_ctx, cfg):
    xn = _ref_rms(x, lnw, cfg.layer_norm_eps)
    kv = _ref_rms(ctx, lnw, cfg.layer_norm_eps) if norm_ctx else ctx
    q, k, v = xn @ wq, kv @ wk, kv @ wv
    B, Tq, _ = q.shape
    Tk = k.shape[1]
    H, dk = cfg.n_heads, cfg.d_kv
    qh = jnp.transpose(q.reshape(B, Tq, H, dk), (0, 2, 1, 3))
    kh = jnp.transpose(k.reshape(B, Tk, H, dk), (0, 2, 1, 3))
    vh = jnp.transpose(v.reshape(B, Tk, H, dk), (0, 2, 1, 3))
    scores = jnp.einsum("bhqd,bhkd->bhqk", qh, kh) + mask + bias
    w = jax.nn.softmax(scores, axis=-1)
    a = jnp.einsum("bhqk,bhkd->bhqd", w, vh)
    a = jnp.transpose(a, (0, 2, 1, 3)).reshape(B, Tq, H * dk)
    return x + a @ wo


def decoder_reference(params, hidden_states, mask, encoder_states, encoder_mask, cfg):
    B, Tq, _ = hidden_states.shape
    Tk = encoder_states.shape[1]
    pos_bias = compute_position_bias(params["rel_bias"], Tq, Tq, cfg)[None]   # (1,H,Tq,Tq)
    zero_bias = jnp.zeros((1, cfg.n_heads, Tq, Tk), jnp.float32)
    x = hidden_states
    for layer in params["layers"]:
        x = _ref_attn(x, x, mask, pos_bias, layer["sa_ln"],
                      layer["sa_wq"], layer["sa_wk"], layer["sa_wv"], layer["sa_wo"], True, cfg)
        x = _ref_attn(x, encoder_states, encoder_mask, zero_bias, layer["ca_ln"],
                      layer["ca_wq"], layer["ca_wk"], layer["ca_wv"], layer["ca_wo"], False, cfg)
        ffn = _ref_rms(x, layer["ff_ln"], cfg.layer_norm_eps)
        ffn = jnp.maximum(ffn @ layer["ff_wi"], 0.0) @ layer["ff_wo"]
        x = x + ffn
    return _ref_rms(x, params["final_ln"], cfg.layer_norm_eps)


# ----------------------------- main -----------------------------
if __name__ == "__main__":
    cfg = Cfg()
    B, Tq, Tk = 2, 8, 16

    key = jax.random.PRNGKey(0)
    k_par, k_x, k_enc = jax.random.split(key, 3)
    params = init_params(cfg, k_par)

    hidden_states = jax.random.normal(k_x, (B, Tq, cfg.d_model), jnp.float32)
    encoder_states = jax.random.normal(k_enc, (B, Tk, cfg.d_model), jnp.float32)

    # causal additive mask for decoder self-attention: (B, 1, Tq, Tq)
    causal = jnp.where(jnp.arange(Tq)[None, :] <= jnp.arange(Tq)[:, None], 0.0, -1e9)
    mask = jnp.broadcast_to(causal, (B, 1, Tq, Tq)).astype(jnp.float32)

    # encoder padding mask (B, 1, 1, Tk): mask the last 4 encoder positions of batch 1
    enc_valid = jnp.ones((B, Tk), jnp.float32).at[1, Tk - 4:].set(0.0)
    encoder_mask = jnp.where(enc_valid > 0, 0.0, -1e9)[:, None, None, :]

    out = decoder_forward(params, hidden_states, mask, encoder_states, encoder_mask, cfg)
    out = jax.block_until_ready(out)

    ref = decoder_reference(params, hidden_states, mask, encoder_states, encoder_mask, cfg)
    ref = jax.block_until_ready(ref)

    assert out.shape == (B, Tq, cfg.d_model)
    max_diff = float(jnp.max(jnp.abs(out - ref)))
    assert max_diff < 1e-2, f"mismatch vs reference: {max_diff}"

    print("KERNEL_OK")
</pallas_src>

<mosaic_0001>
module attributes {stable_mosaic.version = 11 : i64} {
  func.func @_decoder_kernel(%arg0: memref<16x32xf32, #tpu.memory_space<vmem>>, %arg1: memref<32x32xf32, #tpu.memory_space<vmem>>, %arg2: memref<4x16x16xf32, #tpu.memory_space<vmem>>, %arg3: memref<16x32xf32, #tpu.memory_space<vmem>>, %arg4: memref<2x1x32xf32, #tpu.memory_space<vmem>>, %arg5: memref<2x32x96xf32, #tpu.memory_space<vmem>>, %arg6: memref<2x32x32xf32, #tpu.memory_space<vmem>>, %arg7: memref<2x1x32xf32, #tpu.memory_space<vmem>>, %arg8: memref<2x32x32xf32, #tpu.memory_space<vmem>>, %arg9: memref<32x128xf32, #tpu.memory_space<vmem>>, %arg10: memref<2x32x32xf32, #tpu.memory_space<vmem>>, %arg11: memref<2x1x32xf32, #tpu.memory_space<vmem>>, %arg12: memref<2x32x64xf32, #tpu.memory_space<vmem>>, %arg13: memref<2x64x32xf32, #tpu.memory_space<vmem>>, %arg14: memref<1x32xf32, #tpu.memory_space<vmem>>, %arg15: memref<16x32xf32, #tpu.memory_space<vmem>>) attributes {dimension_semantics = [], scalar_prefetch = 0 : i64, scratch_operands = 0 : i64, tpu.core_type = #tpu.core_type<tc>} {
    %c0 = arith.constant 0 : index
    %c0_0 = arith.constant 0 : index
    %0 = vector.load %arg0[%c0, %c0_0] : memref<16x32xf32, #tpu.memory_space<vmem>>, vector<16x32xf32>
    %c0_1 = arith.constant 0 : index
    %c0_2 = arith.constant 0 : index
    %1 = vector.load %arg1[%c0_1, %c0_2] : memref<32x32xf32, #tpu.memory_space<vmem>>, vector<32x32xf32>
    %c0_3 = arith.constant 0 : index
    %c0_4 = arith.constant 0 : index
    %c0_5 = arith.constant 0 : index
    %2 = vector.load %arg2[%c0_3, %c0_4, %c0_5] : memref<4x16x16xf32, #tpu.memory_space<vmem>>, vector<4x16x16xf32>
    %c0_6 = arith.constant 0 : index
    %c0_7 = arith.constant 0 : index
    %3 = vector.load %arg3[%c0_6, %c0_7] : memref<16x32xf32, #tpu.memory_space<vmem>>, vector<16x32xf32>
    %c0_8 = arith.constant 0 : index
    %c0_9 = arith.constant 0 : index
    %4 = vector.load %arg9[%c0_8, %c0_9] : memref<32x128xf32, #tpu.memory_space<vmem>>, vector<32x128xf32>
    %cst = arith.constant dense<0.000000e+00> : vector<32x128xf32>
    %5 = tpu.matmul %1, %4, %cst {dimension_numbers = #tpu.dot_dimension_numbers<[1], [0], [0], [1], [0, 0, 1, 1], [], []>} : vector<32x32xf32>, vector<32x128xf32>, vector<32x128xf32> -> vector<32x128xf32>
    %c0_10 = arith.constant 0 : index
    %c0_11 = arith.constant 0 : index
    %c0_12 = arith.constant 0 : index
    %6 = vector.load %arg4[%c0_10, %c0_11, %c0_12] : memref<2x1x32xf32, #tpu.memory_space<vmem>>, vector<1x1x32xf32>
    %7 = vector.shape_cast %6 : vector<1x1x32xf32> to vector<1x32xf32>
    %8 = arith.mulf %0, %0 : vector<16x32xf32>
    %cst_13 = arith.constant dense<0.000000e+00> : vector<16xf32>
    %9 = vector.multi_reduction <add>, %8, %cst_13 [1] : vector<16x32xf32> to vector<16xf32>
    %10 = vector.shape_cast %9 : vector<16xf32> to vector<16x1xf32>
    %cst_14 = arith.constant 3.200000e+01 : f32
    %11 = vector.broadcast %cst_14 : f32 to vector<16x1xf32>
    %12 = arith.divf %10, %11 : vector<16x1xf32>
    %cst_15 = arith.constant 9.99999997E-7 : f32
    %13 = vector.broadcast %cst_15 : f32 to vector<16x1xf32>
    %14 = arith.addf %12, %13 : vector<16x1xf32>
    %15 = math.rsqrt %14 : vector<16x1xf32>
    %16 = vector.broadcast %15 : vector<16x1xf32> to vector<16x32xf32>
    %17 = arith.mulf %0, %16 : vector<16x32xf32>
    %18 = vector.broadcast %7 : vector<1x32xf32> to vector<16x32xf32>
    %19 = arith.mulf %17, %18 : vector<16x32xf32>
    %c0_16 = arith.constant 0 : index
    %c0_17 = arith.constant 0 : index
    %c0_18 = arith.constant 0 : index
    %20 = vector.load %arg5[%c0_16, %c0_17, %c0_18] : memref<2x32x96xf32, #tpu.memory_space<vmem>>, vector<1x32x96xf32>
    %21 = vector.shape_cast %20 : vector<1x32x96xf32> to vector<32x96xf32>
    %cst_19 = arith.constant dense<0.000000e+00> : vector<16x96xf32>
    %22 = tpu.matmul %19, %21, %cst_19 {dimension_numbers = #tpu.dot_dimension_numbers<[1], [0], [0], [1], [0, 0, 1, 1], [], []>} : vector<16x32xf32>, vector<32x96xf32>, vector<16x96xf32> -> vector<16x96xf32>
    %23 = vector.extract_strided_slice %22 {offsets = [0, 0], sizes = [16, 32], strides = [1, 1]} : vector<16x96xf32> to vector<16x32xf32>
    %24 = vector.extract_strided_slice %22 {offsets = [0, 32], sizes = [16, 32], strides = [1, 1]} : vector<16x96xf32> to vector<16x32xf32>
    %25 = vector.extract_strided_slice %22 {offsets = [0, 64], sizes = [16, 32], strides = [1, 1]} : vector<16x96xf32> to vector<16x32xf32>
    %26 = tpu.transpose %24, [1, 0] : vector<16x32xf32> -> vector<32x16xf32>
    %27 = vector.extract_strided_slice %23 {offsets = [0, 0], sizes = [16, 8], strides = [1, 1]} : vector<16x32xf32> to vector<16x8xf32>
    %28 = vector.extract_strided_slice %26 {offsets = [0, 0], sizes = [8, 16], strides = [1, 1]} : vector<32x16xf32> to vector<8x16xf32>
    %cst_20 = arith.constant dense<0.000000e+00> : vector<16x16xf32>
    %29 = tpu.matmul %27, %28, %cst_20 {dimension_numbers = #tpu.dot_dimension_numbers<[1], [0], [0], [1], [0, 0, 1, 1], [], []>} : vector<16x8xf32>, vector<8x16xf32>, vector<16x16xf32> -> vector<16x16xf32>
    %30 = vector.extract_strided_slice %2 {offsets = [0, 0, 0], sizes = [1, 16, 16], strides = [1, 1, 1]} : vector<4x16x16xf32> to vector<1x16x16xf32>
    %31 = vector.shape_cast %30 : vector<1x16x16xf32> to vector<16x16xf32>
    %32 = arith.addf %29, %31 : vector<16x16xf32>
    %cst_21 = arith.constant dense<0xFF800000> : vector<16xf32>
    %33 = vector.multi_reduction <maximumf>, %32, %cst_21 [1] : vector<16x16xf32> to vector<16xf32>
    %34 = vector.shape_cast %33 : vector<16xf32> to vector<16x1xf32>
    %35 = vector.broadcast %34 : vector<16x1xf32> to vector<16x16xf32>
    %36 = arith.subf %32, %35 : vector<16x16xf32>
    %37 = math.exp %36 : vector<16x16xf32>
    %cst_22 = arith.constant dense<0.000000e+00> : vector<16xf32>
    %38 = vector.multi_reduction <add>, %37, %cst_22 [1] : vector<16x16xf32> to vector<16xf32>
    %39 = vector.shape_cast %38 : vector<16xf32> to vector<16x1xf32>
    %40 = tpu.reciprocal %39 {approx = true} : vector<16x1xf32> -> vector<16x1xf32>
    %41 = vector.broadcast %40 : vector<16x1xf32> to vector<16x16xf32>
    %42 = arith.mulf %37, %41 : vector<16x16xf32>
    %43 = vector.extract_strided_slice %25 {offsets = [0, 0], sizes = [16, 8], strides = [1, 1]} : vector<16x32xf32> to vector<16x8xf32>
    %cst_23 = arith.constant dense<0.000000e+00> : vector<16x8xf32>
    %44 = tpu.matmul %42, %43, %cst_23 {dimension_numbers = #tpu.dot_dimension_numbers<[1], [0], [0], [1], [0, 0, 1, 1], [], []>} : vector<16x16xf32>, vector<16x8xf32>, vector<16x8xf32> -> vector<16x8xf32>
    %45 = vector.extract_strided_slice %23 {offsets = [0, 8], sizes = [16, 8], strides = [1, 1]} : vector<16x32xf32> to vector<16x8xf32>
    %46 = vector.extract_strided_slice %26 {offsets = [8, 0], sizes = [8, 16], strides = [1, 1]} : vector<32x16xf32> to vector<8x16xf32>
    %cst_24 = arith.constant dense<0.000000e+00> : vector<16x16xf32>
    %47 = tpu.matmul %45, %46, %cst_24 {dimension_numbers = #tpu.dot_dimension_numbers<[1], [0], [0], [1], [0, 0, 1, 1], [], []>} : vector<16x8xf32>, vector<8x16xf32>, vector<16x16xf32> -> vector<16x16xf32>
    %48 = vector.extract_strided_slice %2 {offsets = [1, 0, 0], sizes = [1, 16, 16], strides = [1, 1, 1]} : vector<4x16x16xf32> to vector<1x16x16xf32>
    %49 = vector.shape_cast %48 : vector<1x16x16xf32> to vector<16x16xf32>
    %50 = arith.addf %47, %49 : vector<16x16xf32>
    %cst_25 = arith.constant dense<0xFF800000> : vector<16xf32>
    %51 = vector.multi_reduction <maximumf>, %50, %cst_25 [1] : vector<16x16xf32> to vector<16xf32>
    %52 = vector.shape_cast %51 : vector<16xf32> to vector<16x1xf32>
    %53 = vector.broadcast %52 : vector<16x1xf32> to vector<16x16xf32>
    %54 = arith.subf %50, %53 : vector<16x16xf32>
    %55 = math.exp %54 : vector<16x16xf32>
    %cst_26 = arith.constant dense<0.000000e+00> : vector<16xf32>
    %56 = vector.multi_reduction <add>, %55, %cst_26 [1] : vector<16x16xf32> to vector<16xf32>
    %57 = vector.shape_cast %56 : vector<16xf32> to vector<16x1xf32>
    %58 = tpu.reciprocal %57 {approx = true} : vector<16x1xf32> -> vector<16x1xf32>
    %59 = vector.broadcast %58 : vector<16x1xf32> to vector<16x16xf32>
    %60 = arith.mulf %55, %59 : vector<16x16xf32>
    %61 = vector.extract_strided_slice %25 {offsets = [0, 8], sizes = [16, 8], strides = [1, 1]} : vector<16x32xf32> to vector<16x8xf32>
    %cst_27 = arith.constant dense<0.000000e+00> : vector<16x8xf32>
    %62 = tpu.matmul %60, %61, %cst_27 {dimension_numbers = #tpu.dot_dimension_numbers<[1], [0], [0], [1], [0, 0, 1, 1], [], []>} : vector<16x16xf32>, vector<16x8xf32>, vector<16x8xf32> -> vector<16x8xf32>
    %63 = vector.extract_strided_slice %23 {offsets = [0, 16], sizes = [16, 8], strides = [1, 1]} : vector<16x32xf32> to vector<16x8xf32>
    %64 = vector.extract_strided_slice %26 {offsets = [16, 0], sizes = [8, 16], strides = [1, 1]} : vector<32x16xf32> to vector<8x16xf32>
    %cst_28 = arith.constant dense<0.000000e+00> : vector<16x16xf32>
    %65 = tpu.matmul %63, %64, %cst_28 {dimension_numbers = #tpu.dot_dimension_numbers<[1], [0], [0], [1], [0, 0, 1, 1], [], []>} : vector<16x8xf32>, vector<8x16xf32>, vector<16x16xf32> -> vector<16x16xf32>
    %66 = vector.extract_strided_slice %2 {offsets = [2, 0, 0], sizes = [1, 16, 16], strides = [1, 1, 1]} : vector<4x16x16xf32> to vector<1x16x16xf32>
    %67 = vector.shape_cast %66 : vector<1x16x16xf32> to vector<16x16xf32>
    %68 = arith.addf %65, %67 : vector<16x16xf32>
    %cst_29 = arith.constant dense<0xFF800000> : vector<16xf32>
    %69 = vector.multi_reduction <maximumf>, %68, %cst_29 [1] : vector<16x16xf32> to vector<16xf32>
    %70 = vector.shape_cast %69 : vector<16xf32> to vector<16x1xf32>
    %71 = vector.broadcast %70 : vector<16x1xf32> to vector<16x16xf32>
    %72 = arith.subf %68, %71 : vector<16x16xf32>
    %73 = math.exp %72 : vector<16x16xf32>
    %cst_30 = arith.constant dense<0.000000e+00> : vector<16xf32>
    %74 = vector.multi_reduction <add>, %73, %cst_30 [1] : vector<16x16xf32> to vector<16xf32>
    %75 = vector.shape_cast %74 : vector<16xf32> to vector<16x1xf32>
    %76 = tpu.reciprocal %75 {approx = true} : vector<16x1xf32> -> vector<16x1xf32>
    %77 = vector.broadcast %76 : vector<16x1xf32> to vector<16x16xf32>
    %78 = arith.mulf %73, %77 : vector<16x16xf32>
    %79 = vector.extract_strided_slice %25 {offsets = [0, 16], sizes = [16, 8], strides = [1, 1]} : vector<16x32xf32> to vector<16x8xf32>
    %cst_31 = arith.constant dense<0.000000e+00> : vector<16x8xf32>
    %80 = tpu.matmul %78, %79, %cst_31 {dimension_numbers = #tpu.dot_dimension_numbers<[1], [0], [0], [1], [0, 0, 1, 1], [], []>} : vector<16x16xf32>, vector<16x8xf32>, vector<16x8xf32> -> vector<16x8xf32>
    %81 = vector.extract_strided_slice %23 {offsets = [0, 24], sizes = [16, 8], strides = [1, 1]} : vector<16x32xf32> to vector<16x8xf32>
    %82 = vector.extract_strided_slice %26 {offsets = [24, 0], sizes = [8, 16], strides = [1, 1]} : vector<32x16xf32> to vector<8x16xf32>
    %cst_32 = arith.constant dense<0.000000e+00> : vector<16x16xf32>
    %83 = tpu.matmul %81, %82, %cst_32 {dimension_numbers = #tpu.dot_dimension_numbers<[1], [0], [0], [1], [0, 0, 1, 1], [], []>} : vector<16x8xf32>, vector<8x16xf32>, vector<16x16xf32> -> vector<16x16xf32>
    %84 = vector.extract_strided_slice %2 {offsets = [3, 0, 0], sizes = [1, 16, 16], strides = [1, 1, 1]} : vector<4x16x16xf32> to vector<1x16x16xf32>
    %85 = vector.shape_cast %84 : vector<1x16x16xf32> to vector<16x16xf32>
    %86 = arith.addf %83, %85 : vector<16x16xf32>
    %cst_33 = arith.constant dense<0xFF800000> : vector<16xf32>
    %87 = vector.multi_reduction <maximumf>, %86, %cst_33 [1] : vector<16x16xf32> to vector<16xf32>
    %88 = vector.shape_cast %87 : vector<16xf32> to vector<16x1xf32>
    %89 = vector.broadcast %88 : vector<16x1xf32> to vector<16x16xf32>
    %90 = arith.subf %86, %89 : vector<16x16xf32>
    %91 = math.exp %90 : vector<16x16xf32>
    %cst_34 = arith.constant dense<0.000000e+00> : vector<16xf32>
    %92 = vector.multi_reduction <add>, %91, %cst_34 [1] : vector<16x16xf32> to vector<16xf32>
    %93 = vector.shape_cast %92 : vector<16xf32> to vector<16x1xf32>
    %94 = tpu.reciprocal %93 {approx = true} : vector<16x1xf32> -> vector<16x1xf32>
    %95 = vector.broadcast %94 : vector<16x1xf32> to vector<16x16xf32>
    %96 = arith.mulf %91, %95 : vector<16x16xf32>
    %97 = vector.extract_strided_slice %25 {offsets = [0, 24], sizes = [16, 8], strides = [1, 1]} : vector<16x32xf32> to vector<16x8xf32>
    %cst_35 = arith.constant dense<0.000000e+00> : vector<16x8xf32>
    %98 = tpu.matmul %96, %97, %cst_35 {dimension_numbers = #tpu.dot_dimension_numbers<[1], [0], [0], [1], [0, 0, 1, 1], [], []>} : vector<16x16xf32>, vector<16x8xf32>, vector<16x8xf32> -> vector<16x8xf32>
    %99 = tpu.concatenate %44, %62, %80, %98 in 1 : vector<16x8xf32>, vector<16x8xf32>, vector<16x8xf32>, vector<16x8xf32> -> vector<16x32xf32>
    %c0_36 = arith.constant 0 : index
    %c0_37 = arith.constant 0 : index
    %c0_38 = arith.constant 0 : index
    %100 = vector.load %arg6[%c0_36, %c0_37, %c0_38] : memref<2x32x32xf32, #tpu.memory_space<vmem>>, vector<1x32x32xf32>
    %101 = vector.shape_cast %100 : vector<1x32x32xf32> to vector<32x32xf32>
    %cst_39 = arith.constant dense<0.000000e+00> : vector<16x32xf32>
    %102 = tpu.matmul %99, %101, %cst_39 {dimension_numbers = #tpu.dot_dimension_numbers<[1], [0], [0], [1], [0, 0, 1, 1], [], []>} : vector<16x32xf32>, vector<32x32xf32>, vector<16x32xf32> -> vector<16x32xf32>
    %103 = arith.addf %0, %102 : vector<16x32xf32>
    %c0_40 = arith.constant 0 : index
    %c0_41 = arith.constant 0 : index
    %c0_42 = arith.constant 0 : index
    %104 = vector.load %arg7[%c0_40, %c0_41, %c0_42] : memref<2x1x32xf32, #tpu.memory_space<vmem>>, vector<1x1x32xf32>
    %105 = vector.shape_cast %104 : vector<1x1x32xf32> to vector<1x32xf32>
    %106 = arith.mulf %103, %103 : vector<16x32xf32>
    %cst_43 = arith.constant dense<0.000000e+00> : vector<16xf32>
    %107 = vector.multi_reduction <add>, %106, %cst_43 [1] : vector<16x32xf32> to vector<16xf32>
    %108 = vector.shape_cast %107 : vector<16xf32> to vector<16x1xf32>
    %cst_44 = arith.constant 3.200000e+01 : f32
    %109 = vector.broadcast %cst_44 : f32 to vector<16x1xf32>
    %110 = arith.divf %108, %109 : vector<16x1xf32>
    %cst_45 = arith.constant 9.99999997E-7 : f32
    %111 = vector.broadcast %cst_45 : f32 to vector<16x1xf32>
    %112 = arith.addf %110, %111 : vector<16x1xf32>
    %113 = math.rsqrt %112 : vector<16x1xf32>
    %114 = vector.broadcast %113 : vector<16x1xf32> to vector<16x32xf32>
    %115 = arith.mulf %103, %114 : vector<16x32xf32>
    %116 = vector.broadcast %105 : vector<1x32xf32> to vector<16x32xf32>
    %117 = arith.mulf %115, %116 : vector<16x32xf32>
    %c0_46 = arith.constant 0 : index
    %c0_47 = arith.constant 0 : index
    %c0_48 = arith.constant 0 : index
    %118 = vector.load %arg8[%c0_46, %c0_47, %c0_48] : memref<2x32x32xf32, #tpu.memory_space<vmem>>, vector<1x32x32xf32>
    %119 = vector.shape_cast %118 : vector<1x32x32xf32> to vector<32x32xf32>
    %cst_49 = arith.constant dense<0.000000e+00> : vector<16x32xf32>
    %120 = tpu.matmul %117, %119, %cst_49 {dimension_numbers = #tpu.dot_dimension_numbers<[1], [0], [0], [1], [0, 0, 1, 1], [], []>} : vector<16x32xf32>, vector<32x32xf32>, vector<16x32xf32> -> vector<16x32xf32>
    %121 = vector.extract_strided_slice %5 {offsets = [0, 0], sizes = [32, 64], strides = [1, 1]} : vector<32x128xf32> to vector<32x64xf32>
    %122 = vector.extract_strided_slice %121 {offsets = [0, 0], sizes = [32, 32], strides = [1, 1]} : vector<32x64xf32> to vector<32x32xf32>
    %123 = vector.extract_strided_slice %121 {offsets = [0, 32], sizes = [32, 32], strides = [1, 1]} : vector<32x64xf32> to vector<32x32xf32>
    %124 = tpu.transpose %122, [1, 0] : vector<32x32xf32> -> vector<32x32xf32>
    %125 = vector.extract_strided_slice %120 {offsets = [0, 0], sizes = [16, 8], strides = [1, 1]} : vector<16x32xf32> to vector<16x8xf32>
    %126 = vector.extract_strided_slice %124 {offsets = [0, 0], sizes = [8, 32], strides = [1, 1]} : vector<32x32xf32> to vector<8x32xf32>
    %cst_50 = arith.constant dense<0.000000e+00> : vector<16x32xf32>
    %127 = tpu.matmul %125, %126, %cst_50 {dimension_numbers = #tpu.dot_dimension_numbers<[1], [0], [0], [1], [0, 0, 1, 1], [], []>} : vector<16x8xf32>, vector<8x32xf32>, vector<16x32xf32> -> vector<16x32xf32>
    %128 = arith.addf %127, %3 : vector<16x32xf32>
    %cst_51 = arith.constant dense<0xFF800000> : vector<16xf32>
    %129 = vector.multi_reduction <maximumf>, %128, %cst_51 [1] : vector<16x32xf32> to vector<16xf32>
    %130 = vector.shape_cast %129 : vector<16xf32> to vector<16x1xf32>
    %131 = vector.broadcast %130 : vector<16x1xf32> to vector<16x32xf32>
    %132 = arith.subf %128, %131 : vector<16x32xf32>
    %133 = math.exp %132 : vector<16x32xf32>
    %cst_52 = arith.constant dense<0.000000e+00> : vector<16xf32>
    %134 = vector.multi_reduction <add>, %133, %cst_52 [1] : vector<16x32xf32> to vector<16xf32>
    %135 = vector.shape_cast %134 : vector<16xf32> to vector<16x1xf32>
    %136 = tpu.reciprocal %135 {approx = true} : vector<16x1xf32> -> vector<16x1xf32>
    %137 = vector.broadcast %136 : vector<16x1xf32> to vector<16x32xf32>
    %138 = arith.mulf %133, %137 : vector<16x32xf32>
    %139 = vector.extract_strided_slice %123 {offsets = [0, 0], sizes = [32, 8], strides = [1, 1]} : vector<32x32xf32> to vector<32x8xf32>
    %cst_53 = arith.constant dense<0.000000e+00> : vector<16x8xf32>
    %140 = tpu.matmul %138, %139, %cst_53 {dimension_numbers = #tpu.dot_dimension_numbers<[1], [0], [0], [1], [0, 0, 1, 1], [], []>} : vector<16x32xf32>, vector<32x8xf32>, vector<16x8xf32> -> vector<16x8xf32>
    %141 = vector.extract_strided_slice %120 {offsets = [0, 8], sizes = [16, 8], strides = [1, 1]} : vector<16x32xf32> to vector<16x8xf32>
    %142 = vector.extract_strided_slice %124 {offsets = [8, 0], sizes = [8, 32], strides = [1, 1]} : vector<32x32xf32> to vector<8x32xf32>
    %cst_54 = arith.constant dense<0.000000e+00> : vector<16x32xf32>
    %143 = tpu.matmul %141, %142, %cst_54 {dimension_numbers = #tpu.dot_dimension_numbers<[1], [0], [0], [1], [0, 0, 1, 1], [], []>} : vector<16x8xf32>, vector<8x32xf32>, vector<16x32xf32> -> vector<16x32xf32>
    %144 = arith.addf %143, %3 : vector<16x32xf32>
    %cst_55 = arith.constant dense<0xFF800000> : vector<16xf32>
    %145 = vector.multi_reduction <maximumf>, %144, %cst_55 [1] : vector<16x32xf32> to vector<16xf32>
    %146 = vector.shape_cast %145 : vector<16xf32> to vector<16x1xf32>
    %147 = vector.broadcast %146 : vector<16x1xf32> to vector<16x32xf32>
    %148 = arith.subf %144, %147 : vector<16x32xf32>
    %149 = math.exp %148 : vector<16x32xf32>
    %cst_56 = arith.constant dense<0.000000e+00> : vector<16xf32>
    %150 = vector.multi_reduction <add>, %149, %cst_56 [1] : vector<16x32xf32> to vector<16xf32>
    %151 = vector.shape_cast %150 : vector<16xf32> to vector<16x1xf32>
    %152 = tpu.reciprocal %151 {approx = true} : vector<16x1xf32> -> vector<16x1xf32>
    %153 = vector.broadcast %152 : vector<16x1xf32> to vector<16x32xf32>
    %154 = arith.mulf %149, %153 : vector<16x32xf32>
    %155 = vector.extract_strided_slice %123 {offsets = [0, 8], sizes = [32, 8], strides = [1, 1]} : vector<32x32xf32> to vector<32x8xf32>
    %cst_57 = arith.constant dense<0.000000e+00> : vector<16x8xf32>
    %156 = tpu.matmul %154, %155, %cst_57 {dimension_numbers = #tpu.dot_dimension_numbers<[1], [0], [0], [1], [0, 0, 1, 1], [], []>} : vector<16x32xf32>, vector<32x8xf32>, vector<16x8xf32> -> vector<16x8xf32>
    %157 = vector.extract_strided_slice %120 {offsets = [0, 16], sizes = [16, 8], strides = [1, 1]} : vector<16x32xf32> to vector<16x8xf32>
    %158 = vector.extract_strided_slice %124 {offsets = [16, 0], sizes = [8, 32], strides = [1, 1]} : vector<32x32xf32> to vector<8x32xf32>
    %cst_58 = arith.constant dense<0.000000e+00> : vector<16x32xf32>
    %159 = tpu.matmul %157, %158, %cst_58 {dimension_numbers = #tpu.dot_dimension_numbers<[1], [0], [0], [1], [0, 0, 1, 1], [], []>} : vector<16x8xf32>, vector<8x32xf32>, vector<16x32xf32> -> vector<16x32xf32>
    %160 = arith.addf %159, %3 : vector<16x32xf32>
    %cst_59 = arith.constant dense<0xFF800000> : vector<16xf32>
    %161 = vector.multi_reduction <maximumf>, %160, %cst_59 [1] : vector<16x32xf32> to vector<16xf32>
    %162 = vector.shape_cast %161 : vector<16xf32> to vector<16x1xf32>
    %163 = vector.broadcast %162 : vector<16x1xf32> to vector<16x32xf32>
    %164 = arith.subf %160, %163 : vector<16x32xf32>
    %165 = math.exp %164 : vector<16x32xf32>
    %cst_60 = arith.constant dense<0.000000e+00> : vector<16xf32>
    %166 = vector.multi_reduction <add>, %165, %cst_60 [1] : vector<16x32xf32> to vector<16xf32>
    %167 = vector.shape_cast %166 : vector<16xf32> to vector<16x1xf32>
    %168 = tpu.reciprocal %167 {approx = true} : vector<16x1xf32> -> vector<16x1xf32>
    %169 = vector.broadcast %168 : vector<16x1xf32> to vector<16x32xf32>
    %170 = arith.mulf %165, %169 : vector<16x32xf32>
    %171 = vector.extract_strided_slice %123 {offsets = [0, 16], sizes = [32, 8], strides = [1, 1]} : vector<32x32xf32> to vector<32x8xf32>
    %cst_61 = arith.constant dense<0.000000e+00> : vector<16x8xf32>
    %172 = tpu.matmul %170, %171, %cst_61 {dimension_numbers = #tpu.dot_dimension_numbers<[1], [0], [0], [1], [0, 0, 1, 1], [], []>} : vector<16x32xf32>, vector<32x8xf32>, vector<16x8xf32> -> vector<16x8xf32>
    %173 = vector.extract_strided_slice %120 {offsets = [0, 24], sizes = [16, 8], strides = [1, 1]} : vector<16x32xf32> to vector<16x8xf32>
    %174 = vector.extract_strided_slice %124 {offsets = [24, 0], sizes = [8, 32], strides = [1, 1]} : vector<32x32xf32> to vector<8x32xf32>
    %cst_62 = arith.constant dense<0.000000e+00> : vector<16x32xf32>
    %175 = tpu.matmul %173, %174, %cst_62 {dimension_numbers = #tpu.dot_dimension_numbers<[1], [0], [0], [1], [0, 0, 1, 1], [], []>} : vector<16x8xf32>, vector<8x32xf32>, vector<16x32xf32> -> vector<16x32xf32>
    %176 = arith.addf %175, %3 : vector<16x32xf32>
    %cst_63 = arith.constant dense<0xFF800000> : vector<16xf32>
    %177 = vector.multi_reduction <maximumf>, %176, %cst_63 [1] : vector<16x32xf32> to vector<16xf32>
    %178 = vector.shape_cast %177 : vector<16xf32> to vector<16x1xf32>
    %179 = vector.broadcast %178 : vector<16x1xf32> to vector<16x32xf32>
    %180 = arith.subf %176, %179 : vector<16x32xf32>
    %181 = math.exp %180 : vector<16x32xf32>
    %cst_64 = arith.constant dense<0.000000e+00> : vector<16xf32>
    %182 = vector.multi_reduction <add>, %181, %cst_64 [1] : vector<16x32xf32> to vector<16xf32>
    %183 = vector.shape_cast %182 : vector<16xf32> to vector<16x1xf32>
    %184 = tpu.reciprocal %183 {approx = true} : vector<16x1xf32> -> vector<16x1xf32>
    %185 = vector.broadcast %184 : vector<16x1xf32> to vector<16x32xf32>
    %186 = arith.mulf %181, %185 : vector<16x32xf32>
    %187 = vector.extract_strided_slice %123 {offsets = [0, 24], sizes = [32, 8], strides = [1, 1]} : vector<32x32xf32> to vector<32x8xf32>
    %cst_65 = arith.constant dense<0.000000e+00> : vector<16x8xf32>
    %188 = tpu.matmul %186, %187, %cst_65 {dimension_numbers = #tpu.dot_dimension_numbers<[1], [0], [0], [1], [0, 0, 1, 1], [], []>} : vector<16x32xf32>, vector<32x8xf32>, vector<16x8xf32> -> vector<16x8xf32>
    %189 = tpu.concatenate %140, %156, %172, %188 in 1 : vector<16x8xf32>, vector<16x8xf32>, vector<16x8xf32>, vector<16x8xf32> -> vector<16x32xf32>
    %c0_66 = arith.constant 0 : index
    %c0_67 = arith.constant 0 : index
    %c0_68 = arith.constant 0 : index
    %190 = vector.load %arg10[%c0_66, %c0_67, %c0_68] : memref<2x32x32xf32, #tpu.memory_space<vmem>>, vector<1x32x32xf32>
    %191 = vector.shape_cast %190 : vector<1x32x32xf32> to vector<32x32xf32>
    %cst_69 = arith.constant dense<0.000000e+00> : vector<16x32xf32>
    %192 = tpu.matmul %189, %191, %cst_69 {dimension_numbers = #tpu.dot_dimension_numbers<[1], [0], [0], [1], [0, 0, 1, 1], [], []>} : vector<16x32xf32>, vector<32x32xf32>, vector<16x32xf32> -> vector<16x32xf32>
    %193 = arith.addf %103, %192 : vector<16x32xf32>
    %c0_70 = arith.constant 0 : index
    %c0_71 = arith.constant 0 : index
    %c0_72 = arith.constant 0 : index
    %194 = vector.load %arg11[%c0_70, %c0_71, %c0_72] : memref<2x1x32xf32, #tpu.memory_space<vmem>>, vector<1x1x32xf32>
    %195 = vector.shape_cast %194 : vector<1x1x32xf32> to vector<1x32xf32>
    %196 = arith.mulf %193, %193 : vector<16x32xf32>
    %cst_73 = arith.constant dense<0.000000e+00> : vector<16xf32>
    %197 = vector.multi_reduction <add>, %196, %cst_73 [1] : vector<16x32xf32> to vector<16xf32>
    %198 = vector.shape_cast %197 : vector<16xf32> to vector<16x1xf32>
    %cst_74 = arith.constant 3.200000e+01 : f32
    %199 = vector.broadcast %cst_74 : f32 to vector<16x1xf32>
    %200 = arith.divf %198, %199 : vector<16x1xf32>
    %cst_75 = arith.constant 9.99999997E-7 : f32
    %201 = vector.broadcast %cst_75 : f32 to vector<16x1xf32>
    %202 = arith.addf %200, %201 : vector<16x1xf32>
    %203 = math.rsqrt %202 : vector<16x1xf32>
    %204 = vector.broadcast %203 : vector<16x1xf32> to vector<16x32xf32>
    %205 = arith.mulf %193, %204 : vector<16x32xf32>
    %206 = vector.broadcast %195 : vector<1x32xf32> to vector<16x32xf32>
    %207 = arith.mulf %205, %206 : vector<16x32xf32>
    %c0_76 = arith.constant 0 : index
    %c0_77 = arith.constant 0 : index
    %c0_78 = arith.constant 0 : index
    %208 = vector.load %arg12[%c0_76, %c0_77, %c0_78] : memref<2x32x64xf32, #tpu.memory_space<vmem>>, vector<1x32x64xf32>
    %209 = vector.shape_cast %208 : vector<1x32x64xf32> to vector<32x64xf32>
    %cst_79 = arith.constant dense<0.000000e+00> : vector<16x64xf32>
    %210 = tpu.matmul %207, %209, %cst_79 {dimension_numbers = #tpu.dot_dimension_numbers<[1], [0], [0], [1], [0, 0, 1, 1], [], []>} : vector<16x32xf32>, vector<32x64xf32>, vector<16x64xf32> -> vector<16x64xf32>
    %cst_80 = arith.constant 0.000000e+00 : f32
    %211 = vector.broadcast %cst_80 : f32 to vector<16x64xf32>
    %212 = arith.maximumf %210, %211 : vector<16x64xf32>
    %c0_81 = arith.constant 0 : index
    %c0_82 = arith.constant 0 : index
    %c0_83 = arith.constant 0 : index
    %213 = vector.load %arg13[%c0_81, %c0_82, %c0_83] : memref<2x64x32xf32, #tpu.memory_space<vmem>>, vector<1x64x32xf32>
    %214 = vector.shape_cast %213 : vector<1x64x32xf32> to vector<64x32xf32>
    %cst_84 = arith.constant dense<0.000000e+00> : vector<16x32xf32>
    %215 = tpu.matmul %212, %214, %cst_84 {dimension_numbers = #tpu.dot_dimension_numbers<[1], [0], [0], [1], [0, 0, 1, 1], [], []>} : vector<16x64xf32>, vector<64x32xf32>, vector<16x32xf32> -> vector<16x32xf32>
    %216 = arith.addf %193, %215 : vector<16x32xf32>
    %c1 = arith.constant 1 : index
    %c0_85 = arith.constant 0 : index
    %c0_86 = arith.constant 0 : index
    %217 = vector.load %arg4[%c1, %c0_85, %c0_86] : memref<2x1x32xf32, #tpu.memory_space<vmem>>, vector<1x1x32xf32>
    %218 = vector.shape_cast %217 : vector<1x1x32xf32> to vector<1x32xf32>
    %219 = arith.mulf %216, %216 : vector<16x32xf32>
    %cst_87 = arith.constant dense<0.000000e+00> : vector<16xf32>
    %220 = vector.multi_reduction <add>, %219, %cst_87 [1] : vector<16x32xf32> to vector<16xf32>
    %221 = vector.shape_cast %220 : vector<16xf32> to vector<16x1xf32>
    %cst_88 = arith.constant 3.200000e+01 : f32
    %222 = vector.broadcast %cst_88 : f32 to vector<16x1xf32>
    %223 = arith.divf %221, %222 : vector<16x1xf32>
    %cst_89 = arith.constant 9.99999997E-7 : f32
    %224 = vector.broadcast %cst_89 : f32 to vector<16x1xf32>
    %225 = arith.addf %223, %224 : vector<16x1xf32>
    %226 = math.rsqrt %225 : vector<16x1xf32>
    %227 = vector.broadcast %226 : vector<16x1xf32> to vector<16x32xf32>
    %228 = arith.mulf %216, %227 : vector<16x32xf32>
    %229 = vector.broadcast %218 : vector<1x32xf32> to vector<16x32xf32>
    %230 = arith.mulf %228, %229 : vector<16x32xf32>
    %c1_90 = arith.constant 1 : index
    %c0_91 = arith.constant 0 : index
    %c0_92 = arith.constant 0 : index
    %231 = vector.load %arg5[%c1_90, %c0_91, %c0_92] : memref<2x32x96xf32, #tpu.memory_space<vmem>>, vector<1x32x96xf32>
    %232 = vector.shape_cast %231 : vector<1x32x96xf32> to vector<32x96xf32>
    %cst_93 = arith.constant dense<0.000000e+00> : vector<16x96xf32>
    %233 = tpu.matmul %230, %232, %cst_93 {dimension_numbers = #tpu.dot_dimension_numbers<[1], [0], [0], [1], [0, 0, 1, 1], [], []>} : vector<16x32xf32>, vector<32x96xf32>, vector<16x96xf32> -> vector<16x96xf32>
    %234 = vector.extract_strided_slice %233 {offsets = [0, 0], sizes = [16, 32], strides = [1, 1]} : vector<16x96xf32> to vector<16x32xf32>
    %235 = vector.extract_strided_slice %233 {offsets = [0, 32], sizes = [16, 32], strides = [1, 1]} : vector<16x96xf32> to vector<16x32xf32>
    %236 = vector.extract_strided_slice %233 {offsets = [0, 64], sizes = [16, 32], strides = [1, 1]} : vector<16x96xf32> to vector<16x32xf32>
    %237 = tpu.transpose %235, [1, 0] : vector<16x32xf32> -> vector<32x16xf32>
    %238 = vector.extract_strided_slice %234 {offsets = [0, 0], sizes = [16, 8], strides = [1, 1]} : vector<16x32xf32> to vector<16x8xf32>
    %239 = vector.extract_strided_slice %237 {offsets = [0, 0], sizes = [8, 16], strides = [1, 1]} : vector<32x16xf32> to vector<8x16xf32>
    %cst_94 = arith.constant dense<0.000000e+00> : vector<16x16xf32>
    %240 = tpu.matmul %238, %239, %cst_94 {dimension_numbers = #tpu.dot_dimension_numbers<[1], [0], [0], [1], [0, 0, 1, 1], [], []>} : vector<16x8xf32>, vector<8x16xf32>, vector<16x16xf32> -> vector<16x16xf32>
    %241 = vector.extract_strided_slice %2 {offsets = [0, 0, 0], sizes = [1, 16, 16], strides = [1, 1, 1]} : vector<4x16x16xf32> to vector<1x16x16xf32>
    %242 = vector.shape_cast %241 : vector<1x16x16xf32> to vector<16x16xf32>
    %243 = arith.addf %240, %242 : vector<16x16xf32>
    %cst_95 = arith.constant dense<0xFF800000> : vector<16xf32>
    %244 = vector.multi_reduction <maximumf>, %243, %cst_95 [1] : vector<16x16xf32> to vector<16xf32>
    %245 = vector.shape_cast %244 : vector<16xf32> to vector<16x1xf32>
    %246 = vector.broadcast %245 : vector<16x1xf32> to vector<16x16xf32>
    %247 = arith.subf %243, %246 : vector<16x16xf32>
    %248 = math.exp %247 : vector<16x16xf32>
    %cst_96 = arith.constant dense<0.000000e+00> : vector<16xf32>
    %249 = vector.multi_reduction <add>, %248, %cst_96 [1] : vector<16x16xf32> to vector<16xf32>
    %250 = vector.shape_cast %249 : vector<16xf32> to vector<16x1xf32>
    %251 = tpu.reciprocal %250 {approx = true} : vector<16x1xf32> -> vector<16x1xf32>
    %252 = vector.broadcast %251 : vector<16x1xf32> to vector<16x16xf32>
    %253 = arith.mulf %248, %252 : vector<16x16xf32>
    %254 = vector.extract_strided_slice %236 {offsets = [0, 0], sizes = [16, 8], strides = [1, 1]} : vector<16x32xf32> to vector<16x8xf32>
    %cst_97 = arith.constant dense<0.000000e+00> : vector<16x8xf32>
    %255 = tpu.matmul %253, %254, %cst_97 {dimension_numbers = #tpu.dot_dimension_numbers<[1], [0], [0], [1], [0, 0, 1, 1], [], []>} : vector<16x16xf32>, vector<16x8xf32>, vector<16x8xf32> -> vector<16x8xf32>
    %256 = vector.extract_strided_slice %234 {offsets = [0, 8], sizes = [16, 8], strides = [1, 1]} : vector<16x32xf32> to vector<16x8xf32>
    %257 = vector.extract_strided_slice %237 {offsets = [8, 0], sizes = [8, 16], strides = [1, 1]} : vector<32x16xf32> to vector<8x16xf32>
    %cst_98 = arith.constant dense<0.000000e+00> : vector<16x16xf32>
    %258 = tpu.matmul %256, %257, %cst_98 {dimension_numbers = #tpu.dot_dimension_numbers<[1], [0], [0], [1], [0, 0, 1, 1], [], []>} : vector<16x8xf32>, vector<8x16xf32>, vector<16x16xf32> -> vector<16x16xf32>
    %259 = vector.extract_strided_slice %2 {offsets = [1, 0, 0], sizes = [1, 16, 16], strides = [1, 1, 1]} : vector<4x16x16xf32> to vector<1x16x16xf32>
    %260 = vector.shape_cast %259 : vector<1x16x16xf32> to vector<16x16xf32>
    %261 = arith.addf %258, %260 : vector<16x16xf32>
    %cst_99 = arith.constant dense<0xFF800000> : vector<16xf32>
    %262 = vector.multi_reduction <maximumf>, %261, %cst_99 [1] : vector<16x16xf32> to vector<16xf32>
    %263 = vector.shape_cast %262 : vector<16xf32> to vector<16x1xf32>
    %264 = vector.broadcast %263 : vector<16x1xf32> to vector<16x16xf32>
    %265 = arith.subf %261, %264 : vector<16x16xf32>
    %266 = math.exp %265 : vector<16x16xf32>
    %cst_100 = arith.constant dense<0.000000e+00> : vector<16xf32>
    %267 = vector.multi_reduction <add>, %266, %cst_100 [1] : vector<16x16xf32> to vector<16xf32>
    %268 = vector.shape_cast %267 : vector<16xf32> to vector<16x1xf32>
    %269 = tpu.reciprocal %268 {approx = true} : vector<16x1xf32> -> vector<16x1xf32>
    %270 = vector.broadcast %269 : vector<16x1xf32> to vector<16x16xf32>
    %271 = arith.mulf %266, %270 : vector<16x16xf32>
    %272 = vector.extract_strided_slice %236 {offsets = [0, 8], sizes = [16, 8], strides = [1, 1]} : vector<16x32xf32> to vector<16x8xf32>
    %cst_101 = arith.constant dense<0.000000e+00> : vector<16x8xf32>
    %273 = tpu.matmul %271, %272, %cst_101 {dimension_numbers = #tpu.dot_dimension_numbers<[1], [0], [0], [1], [0, 0, 1, 1], [], []>} : vector<16x16xf32>, vector<16x8xf32>, vector<16x8xf32> -> vector<16x8xf32>
    %274 = vector.extract_strided_slice %234 {offsets = [0, 16], sizes = [16, 8], strides = [1, 1]} : vector<16x32xf32> to vector<16x8xf32>
    %275 = vector.extract_strided_slice %237 {offsets = [16, 0], sizes = [8, 16], strides = [1, 1]} : vector<32x16xf32> to vector<8x16xf32>
    %cst_102 = arith.constant dense<0.000000e+00> : vector<16x16xf32>
    %276 = tpu.matmul %274, %275, %cst_102 {dimension_numbers = #tpu.dot_dimension_numbers<[1], [0], [0], [1], [0, 0, 1, 1], [], []>} : vector<16x8xf32>, vector<8x16xf32>, vector<16x16xf32> -> vector<16x16xf32>
    %277 = vector.extract_strided_slice %2 {offsets = [2, 0, 0], sizes = [1, 16, 16], strides = [1, 1, 1]} : vector<4x16x16xf32> to vector<1x16x16xf32>
    %278 = vector.shape_cast %277 : vector<1x16x16xf32> to vector<16x16xf32>
    %279 = arith.addf %276, %278 : vector<16x16xf32>
    %cst_103 = arith.constant dense<0xFF800000> : vector<16xf32>
    %280 = vector.multi_reduction <maximumf>, %279, %cst_103 [1] : vector<16x16xf32> to vector<16xf32>
    %281 = vector.shape_cast %280 : vector<16xf32> to vector<16x1xf32>
    %282 = vector.broadcast %281 : vector<16x1xf32> to vector<16x16xf32>
    %283 = arith.subf %279, %282 : vector<16x16xf32>
    %284 = math.exp %283 : vector<16x16xf32>
    %cst_104 = arith.constant dense<0.000000e+00> : vector<16xf32>
    %285 = vector.multi_reduction <add>, %284, %cst_104 [1] : vector<16x16xf32> to vector<16xf32>
    %286 = vector.shape_cast %285 : vector<16xf32> to vector<16x1xf32>
    %287 = tpu.reciprocal %286 {approx = true} : vector<16x1xf32> -> vector<16x1xf32>
    %288 = vector.broadcast %287 : vector<16x1xf32> to vector<16x16xf32>
    %289 = arith.mulf %284, %288 : vector<16x16xf32>
    %290 = vector.extract_strided_slice %236 {offsets = [0, 16], sizes = [16, 8], strides = [1, 1]} : vector<16x32xf32> to vector<16x8xf32>
    %cst_105 = arith.constant dense<0.000000e+00> : vector<16x8xf32>
    %291 = tpu.matmul %289, %290, %cst_105 {dimension_numbers = #tpu.dot_dimension_numbers<[1], [0], [0], [1], [0, 0, 1, 1], [], []>} : vector<16x16xf32>, vector<16x8xf32>, vector<16x8xf32> -> vector<16x8xf32>
    %292 = vector.extract_strided_slice %234 {offsets = [0, 24], sizes = [16, 8], strides = [1, 1]} : vector<16x32xf32> to vector<16x8xf32>
    %293 = vector.extract_strided_slice %237 {offsets = [24, 0], sizes = [8, 16], strides = [1, 1]} : vector<32x16xf32> to vector<8x16xf32>
    %cst_106 = arith.constant dense<0.000000e+00> : vector<16x16xf32>
    %294 = tpu.matmul %292, %293, %cst_106 {dimension_numbers = #tpu.dot_dimension_numbers<[1], [0], [0], [1], [0, 0, 1, 1], [], []>} : vector<16x8xf32>, vector<8x16xf32>, vector<16x16xf32> -> vector<16x16xf32>
    %295 = vector.extract_strided_slice %2 {offsets = [3, 0, 0], sizes = [1, 16, 16], strides = [1, 1, 1]} : vector<4x16x16xf32> to vector<1x16x16xf32>
    %296 = vector.shape_cast %295 : vector<1x16x16xf32> to vector<16x16xf32>
    %297 = arith.addf %294, %296 : vector<16x16xf32>
    %cst_107 = arith.constant dense<0xFF800000> : vector<16xf32>
    %298 = vector.multi_reduction <maximumf>, %297, %cst_107 [1] : vector<16x16xf32> to vector<16xf32>
    %299 = vector.shape_cast %298 : vector<16xf32> to vector<16x1xf32>
    %300 = vector.broadcast %299 : vector<16x1xf32> to vector<16x16xf32>
    %301 = arith.subf %297, %300 : vector<16x16xf32>
    %302 = math.exp %301 : vector<16x16xf32>
    %cst_108 = arith.constant dense<0.000000e+00> : vector<16xf32>
    %303 = vector.multi_reduction <add>, %302, %cst_108 [1] : vector<16x16xf32> to vector<16xf32>
    %304 = vector.shape_cast %303 : vector<16xf32> to vector<16x1xf32>
    %305 = tpu.reciprocal %304 {approx = true} : vector<16x1xf32> -> vector<16x1xf32>
    %306 = vector.broadcast %305 : vector<16x1xf32> to vector<16x16xf32>
    %307 = arith.mulf %302, %306 : vector<16x16xf32>
    %308 = vector.extract_strided_slice %236 {offsets = [0, 24], sizes = [16, 8], strides = [1, 1]} : vector<16x32xf32> to vector<16x8xf32>
    %cst_109 = arith.constant dense<0.000000e+00> : vector<16x8xf32>
    %309 = tpu.matmul %307, %308, %cst_109 {dimension_numbers = #tpu.dot_dimension_numbers<[1], [0], [0], [1], [0, 0, 1, 1], [], []>} : vector<16x16xf32>, vector<16x8xf32>, vector<16x8xf32> -> vector<16x8xf32>
    %310 = tpu.concatenate %255, %273, %291, %309 in 1 : vector<16x8xf32>, vector<16x8xf32>, vector<16x8xf32>, vector<16x8xf32> -> vector<16x32xf32>
    %c1_110 = arith.constant 1 : index
    %c0_111 = arith.constant 0 : index
    %c0_112 = arith.constant 0 : index
    %311 = vector.load %arg6[%c1_110, %c0_111, %c0_112] : memref<2x32x32xf32, #tpu.memory_space<vmem>>, vector<1x32x32xf32>
    %312 = vector.shape_cast %311 : vector<1x32x32xf32> to vector<32x32xf32>
    %cst_113 = arith.constant dense<0.000000e+00> : vector<16x32xf32>
    %313 = tpu.matmul %310, %312, %cst_113 {dimension_numbers = #tpu.dot_dimension_numbers<[1], [0], [0], [1], [0, 0, 1, 1], [], []>} : vector<16x32xf32>, vector<32x32xf32>, vector<16x32xf32> -> vector<16x32xf32>
    %314 = arith.addf %216, %313 : vector<16x32xf32>
    %c1_114 = arith.constant 1 : index
    %c0_115 = arith.constant 0 : index
    %c0_116 = arith.constant 0 : index
    %315 = vector.load %arg7[%c1_114, %c0_115, %c0_116] : memref<2x1x32xf32, #tpu.memory_space<vmem>>, vector<1x1x32xf32>
    %316 = vector.shape_cast %315 : vector<1x1x32xf32> to vector<1x32xf32>
    %317 = arith.mulf %314, %314 : vector<16x32xf32>
    %cst_117 = arith.constant dense<0.000000e+00> : vector<16xf32>
    %318 = vector.multi_reduction <add>, %317, %cst_117 [1] : vector<16x32xf32> to vector<16xf32>
    %319 = vector.shape_cast %318 : vector<16xf32> to vector<16x1xf32>
    %cst_118 = arith.constant 3.200000e+01 : f32
    %320 = vector.broadcast %cst_118 : f32 to vector<16x1xf32>
    %321 = arith.divf %319, %320 : vector<16x1xf32>
    %cst_119 = arith.constant 9.99999997E-7 : f32
    %322 = vector.broadcast %cst_119 : f32 to vector<16x1xf32>
    %323 = arith.addf %321, %322 : vector<16x1xf32>
    %324 = math.rsqrt %323 : vector<16x1xf32>
    %325 = vector.broadcast %324 : vector<16x1xf32> to vector<16x32xf32>
    %326 = arith.mulf %314, %325 : vector<16x32xf32>
    %327 = vector.broadcast %316 : vector<1x32xf32> to vector<16x32xf32>
    %328 = arith.mulf %326, %327 : vector<16x32xf32>
    %c1_120 = arith.constant 1 : index
    %c0_121 = arith.constant 0 : index
    %c0_122 = arith.constant 0 : index
    %329 = vector.load %arg8[%c1_120, %c0_121, %c0_122] : memref<2x32x32xf32, #tpu.memory_space<vmem>>, vector<1x32x32xf32>
    %330 = vector.shape_cast %329 : vector<1x32x32xf32> to vector<32x32xf32>
    %cst_123 = arith.constant dense<0.000000e+00> : vector<16x32xf32>
    %331 = tpu.matmul %328, %330, %cst_123 {dimension_numbers = #tpu.dot_dimension_numbers<[1], [0], [0], [1], [0, 0, 1, 1], [], []>} : vector<16x32xf32>, vector<32x32xf32>, vector<16x32xf32> -> vector<16x32xf32>
    %332 = vector.extract_strided_slice %5 {offsets = [0, 64], sizes = [32, 64], strides = [1, 1]} : vector<32x128xf32> to vector<32x64xf32>
    %333 = vector.extract_strided_slice %332 {offsets = [0, 0], sizes = [32, 32], strides = [1, 1]} : vector<32x64xf32> to vector<32x32xf32>
    %334 = vector.extract_strided_slice %332 {offsets = [0, 32], sizes = [32, 32], strides = [1, 1]} : vector<32x64xf32> to vector<32x32xf32>
    %335 = tpu.transpose %333, [1, 0] : vector<32x32xf32> -> vector<32x32xf32>
    %336 = vector.extract_strided_slice %331 {offsets = [0, 0], sizes = [16, 8], strides = [1, 1]} : vector<16x32xf32> to vector<16x8xf32>
    %337 = vector.extract_strided_slice %335 {offsets = [0, 0], sizes = [8, 32], strides = [1, 1]} : vector<32x32xf32> to vector<8x32xf32>
    %cst_124 = arith.constant dense<0.000000e+00> : vector<16x32xf32>
    %338 = tpu.matmul %336, %337, %cst_124 {dimension_numbers = #tpu.dot_dimension_numbers<[1], [0], [0], [1], [0, 0, 1, 1], [], []>} : vector<16x8xf32>, vector<8x32xf32>, vector<16x32xf32> -> vector<16x32xf32>
    %339 = arith.addf %338, %3 : vector<16x32xf32>
    %cst_125 = arith.constant dense<0xFF800000> : vector<16xf32>
    %340 = vector.multi_reduction <maximumf>, %339, %cst_125 [1] : vector<16x32xf32> to vector<16xf32>
    %341 = vector.shape_cast %340 : vector<16xf32> to vector<16x1xf32>
    %342 = vector.broadcast %341 : vector<16x1xf32> to vector<16x32xf32>
    %343 = arith.subf %339, %342 : vector<16x32xf32>
    %344 = math.exp %343 : vector<16x32xf32>
    %cst_126 = arith.constant dense<0.000000e+00> : vector<16xf32>
    %345 = vector.multi_reduction <add>, %344, %cst_126 [1] : vector<16x32xf32> to vector<16xf32>
    %346 = vector.shape_cast %345 : vector<16xf32> to vector<16x1xf32>
    %347 = tpu.reciprocal %346 {approx = true} : vector<16x1xf32> -> vector<16x1xf32>
    %348 = vector.broadcast %347 : vector<16x1xf32> to vector<16x32xf32>
    %349 = arith.mulf %344, %348 : vector<16x32xf32>
    %350 = vector.extract_strided_slice %334 {offsets = [0, 0], sizes = [32, 8], strides = [1, 1]} : vector<32x32xf32> to vector<32x8xf32>
    %cst_127 = arith.constant dense<0.000000e+00> : vector<16x8xf32>
    %351 = tpu.matmul %349, %350, %cst_127 {dimension_numbers = #tpu.dot_dimension_numbers<[1], [0], [0], [1], [0, 0, 1, 1], [], []>} : vector<16x32xf32>, vector<32x8xf32>, vector<16x8xf32> -> vector<16x8xf32>
    %352 = vector.extract_strided_slice %331 {offsets = [0, 8], sizes = [16, 8], strides = [1, 1]} : vector<16x32xf32> to vector<16x8xf32>
    %353 = vector.extract_strided_slice %335 {offsets = [8, 0], sizes = [8, 32], strides = [1, 1]} : vector<32x32xf32> to vector<8x32xf32>
    %cst_128 = arith.constant dense<0.000000e+00> : vector<16x32xf32>
    %354 = tpu.matmul %352, %353, %cst_128 {dimension_numbers = #tpu.dot_dimension_numbers<[1], [0], [0], [1], [0, 0, 1, 1], [], []>} : vector<16x8xf32>, vector<8x32xf32>, vector<16x32xf32> -> vector<16x32xf32>
    %355 = arith.addf %354, %3 : vector<16x32xf32>
    %cst_129 = arith.constant dense<0xFF800000> : vector<16xf32>
    %356 = vector.multi_reduction <maximumf>, %355, %cst_129 [1] : vector<16x32xf32> to vector<16xf32>
    %357 = vector.shape_cast %356 : vector<16xf32> to vector<16x1xf32>
    %358 = vector.broadcast %357 : vector<16x1xf32> to vector<16x32xf32>
    %359 = arith.subf %355, %358 : vector<16x32xf32>
    %360 = math.exp %359 : vector<16x32xf32>
    %cst_130 = arith.constant dense<0.000000e+00> : vector<16xf32>
    %361 = vector.multi_reduction <add>, %360, %cst_130 [1] : vector<16x32xf32> to vector<16xf32>
    %362 = vector.shape_cast %361 : vector<16xf32> to vector<16x1xf32>
    %363 = tpu.reciprocal %362 {approx = true} : vector<16x1xf32> -> vector<16x1xf32>
    %364 = vector.broadcast %363 : vector<16x1xf32> to vector<16x32xf32>
    %365 = arith.mulf %360, %364 : vector<16x32xf32>
    %366 = vector.extract_strided_slice %334 {offsets = [0, 8], sizes = [32, 8], strides = [1, 1]} : vector<32x32xf32> to vector<32x8xf32>
    %cst_131 = arith.constant dense<0.000000e+00> : vector<16x8xf32>
    %367 = tpu.matmul %365, %366, %cst_131 {dimension_numbers = #tpu.dot_dimension_numbers<[1], [0], [0], [1], [0, 0, 1, 1], [], []>} : vector<16x32xf32>, vector<32x8xf32>, vector<16x8xf32> -> vector<16x8xf32>
    %368 = vector.extract_strided_slice %331 {offsets = [0, 16], sizes = [16, 8], strides = [1, 1]} : vector<16x32xf32> to vector<16x8xf32>
    %369 = vector.extract_strided_slice %335 {offsets = [16, 0], sizes = [8, 32], strides = [1, 1]} : vector<32x32xf32> to vector<8x32xf32>
    %cst_132 = arith.constant dense<0.000000e+00> : vector<16x32xf32>
    %370 = tpu.matmul %368, %369, %cst_132 {dimension_numbers = #tpu.dot_dimension_numbers<[1], [0], [0], [1], [0, 0, 1, 1], [], []>} : vector<16x8xf32>, vector<8x32xf32>, vector<16x32xf32> -> vector<16x32xf32>
    %371 = arith.addf %370, %3 : vector<16x32xf32>
    %cst_133 = arith.constant dense<0xFF800000> : vector<16xf32>
    %372 = vector.multi_reduction <maximumf>, %371, %cst_133 [1] : vector<16x32xf32> to vector<16xf32>
    %373 = vector.shape_cast %372 : vector<16xf32> to vector<16x1xf32>
    %374 = vector.broadcast %373 : vector<16x1xf32> to vector<16x32xf32>
    %375 = arith.subf %371, %374 : vector<16x32xf32>
    %376 = math.exp %375 : vector<16x32xf32>
    %cst_134 = arith.constant dense<0.000000e+00> : vector<16xf32>
    %377 = vector.multi_reduction <add>, %376, %cst_134 [1] : vector<16x32xf32> to vector<16xf32>
    %378 = vector.shape_cast %377 : vector<16xf32> to vector<16x1xf32>
    %379 = tpu.reciprocal %378 {approx = true} : vector<16x1xf32> -> vector<16x1xf32>
    %380 = vector.broadcast %379 : vector<16x1xf32> to vector<16x32xf32>
    %381 = arith.mulf %376, %380 : vector<16x32xf32>
    %382 = vector.extract_strided_slice %334 {offsets = [0, 16], sizes = [32, 8], strides = [1, 1]} : vector<32x32xf32> to vector<32x8xf32>
    %cst_135 = arith.constant dense<0.000000e+00> : vector<16x8xf32>
    %383 = tpu.matmul %381, %382, %cst_135 {dimension_numbers = #tpu.dot_dimension_numbers<[1], [0], [0], [1], [0, 0, 1, 1], [], []>} : vector<16x32xf32>, vector<32x8xf32>, vector<16x8xf32> -> vector<16x8xf32>
    %384 = vector.extract_strided_slice %331 {offsets = [0, 24], sizes = [16, 8], strides = [1, 1]} : vector<16x32xf32> to vector<16x8xf32>
    %385 = vector.extract_strided_slice %335 {offsets = [24, 0], sizes = [8, 32], strides = [1, 1]} : vector<32x32xf32> to vector<8x32xf32>
    %cst_136 = arith.constant dense<0.000000e+00> : vector<16x32xf32>
    %386 = tpu.matmul %384, %385, %cst_136 {dimension_numbers = #tpu.dot_dimension_numbers<[1], [0], [0], [1], [0, 0, 1, 1], [], []>} : vector<16x8xf32>, vector<8x32xf32>, vector<16x32xf32> -> vector<16x32xf32>
    %387 = arith.addf %386, %3 : vector<16x32xf32>
    %cst_137 = arith.constant dense<0xFF800000> : vector<16xf32>
    %388 = vector.multi_reduction <maximumf>, %387, %cst_137 [1] : vector<16x32xf32> to vector<16xf32>
    %389 = vector.shape_cast %388 : vector<16xf32> to vector<16x1xf32>
    %390 = vector.broadcast %389 : vector<16x1xf32> to vector<16x32xf32>
    %391 = arith.subf %387, %390 : vector<16x32xf32>
    %392 = math.exp %391 : vector<16x32xf32>
    %cst_138 = arith.constant dense<0.000000e+00> : vector<16xf32>
    %393 = vector.multi_reduction <add>, %392, %cst_138 [1] : vector<16x32xf32> to vector<16xf32>
    %394 = vector.shape_cast %393 : vector<16xf32> to vector<16x1xf32>
    %395 = tpu.reciprocal %394 {approx = true} : vector<16x1xf32> -> vector<16x1xf32>
    %396 = vector.broadcast %395 : vector<16x1xf32> to vector<16x32xf32>
    %397 = arith.mulf %392, %396 : vector<16x32xf32>
    %398 = vector.extract_strided_slice %334 {offsets = [0, 24], sizes = [32, 8], strides = [1, 1]} : vector<32x32xf32> to vector<32x8xf32>
    %cst_139 = arith.constant dense<0.000000e+00> : vector<16x8xf32>
    %399 = tpu.matmul %397, %398, %cst_139 {dimension_numbers = #tpu.dot_dimension_numbers<[1], [0], [0], [1], [0, 0, 1, 1], [], []>} : vector<16x32xf32>, vector<32x8xf32>, vector<16x8xf32> -> vector<16x8xf32>
    %400 = tpu.concatenate %351, %367, %383, %399 in 1 : vector<16x8xf32>, vector<16x8xf32>, vector<16x8xf32>, vector<16x8xf32> -> vector<16x32xf32>
    %c1_140 = arith.constant 1 : index
    %c0_141 = arith.constant 0 : index
    %c0_142 = arith.constant 0 : index
    %401 = vector.load %arg10[%c1_140, %c0_141, %c0_142] : memref<2x32x32xf32, #tpu.memory_space<vmem>>, vector<1x32x32xf32>
    %402 = vector.shape_cast %401 : vector<1x32x32xf32> to vector<32x32xf32>
    %cst_143 = arith.constant dense<0.000000e+00> : vector<16x32xf32>
    %403 = tpu.matmul %400, %402, %cst_143 {dimension_numbers = #tpu.dot_dimension_numbers<[1], [0], [0], [1], [0, 0, 1, 1], [], []>} : vector<16x32xf32>, vector<32x32xf32>, vector<16x32xf32> -> vector<16x32xf32>
    %404 = arith.addf %314, %403 : vector<16x32xf32>
    %c1_144 = arith.constant 1 : index
    %c0_145 = arith.constant 0 : index
    %c0_146 = arith.constant 0 : index
    %405 = vector.load %arg11[%c1_144, %c0_145, %c0_146] : memref<2x1x32xf32, #tpu.memory_space<vmem>>, vector<1x1x32xf32>
    %406 = vector.shape_cast %405 : vector<1x1x32xf32> to vector<1x32xf32>
    %407 = arith.mulf %404, %404 : vector<16x32xf32>
    %cst_147 = arith.constant dense<0.000000e+00> : vector<16xf32>
    %408 = vector.multi_reduction <add>, %407, %cst_147 [1] : vector<16x32xf32> to vector<16xf32>
    %409 = vector.shape_cast %408 : vector<16xf32> to vector<16x1xf32>
    %cst_148 = arith.constant 3.200000e+01 : f32
    %410 = vector.broadcast %cst_148 : f32 to vector<16x1xf32>
    %411 = arith.divf %409, %410 : vector<16x1xf32>
    %cst_149 = arith.constant 9.99999997E-7 : f32
    %412 = vector.broadcast %cst_149 : f32 to vector<16x1xf32>
    %413 = arith.addf %411, %412 : vector<16x1xf32>
    %414 = math.rsqrt %413 : vector<16x1xf32>
    %415 = vector.broadcast %414 : vector<16x1xf32> to vector<16x32xf32>
    %416 = arith.mulf %404, %415 : vector<16x32xf32>
    %417 = vector.broadcast %406 : vector<1x32xf32> to vector<16x32xf32>
    %418 = arith.mulf %416, %417 : vector<16x32xf32>
    %c1_150 = arith.constant 1 : index
    %c0_151 = arith.constant 0 : index
    %c0_152 = arith.constant 0 : index
    %419 = vector.load %arg12[%c1_150, %c0_151, %c0_152] : memref<2x32x64xf32, #tpu.memory_space<vmem>>, vector<1x32x64xf32>
    %420 = vector.shape_cast %419 : vector<1x32x64xf32> to vector<32x64xf32>
    %cst_153 = arith.constant dense<0.000000e+00> : vector<16x64xf32>
    %421 = tpu.matmul %418, %420, %cst_153 {dimension_numbers = #tpu.dot_dimension_numbers<[1], [0], [0], [1], [0, 0, 1, 1], [], []>} : vector<16x32xf32>, vector<32x64xf32>, vector<16x64xf32> -> vector<16x64xf32>
    %cst_154 = arith.constant 0.000000e+00 : f32
    %422 = vector.broadcast %cst_154 : f32 to vector<16x64xf32>
    %423 = arith.maximumf %421, %422 : vector<16x64xf32>
    %c1_155 = arith.constant 1 : index
    %c0_156 = arith.constant 0 : index
    %c0_157 = arith.constant 0 : index
    %424 = vector.load %arg13[%c1_155, %c0_156, %c0_157] : memref<2x64x32xf32, #tpu.memory_space<vmem>>, vector<1x64x32xf32>
    %425 = vector.shape_cast %424 : vector<1x64x32xf32> to vector<64x32xf32>
    %cst_158 = arith.constant dense<0.000000e+00> : vector<16x32xf32>
    %426 = tpu.matmul %423, %425, %cst_158 {dimension_numbers = #tpu.dot_dimension_numbers<[1], [0], [0], [1], [0, 0, 1, 1], [], []>} : vector<16x64xf32>, vector<64x32xf32>, vector<16x32xf32> -> vector<16x32xf32>
    %427 = arith.addf %404, %426 : vector<16x32xf32>
    %c0_159 = arith.constant 0 : index
    %c0_160 = arith.constant 0 : index
    %428 = vector.load %arg14[%c0_159, %c0_160] : memref<1x32xf32, #tpu.memory_space<vmem>>, vector<1x32xf32>
    %429 = arith.mulf %427, %427 : vector<16x32xf32>
    %cst_161 = arith.constant dense<0.000000e+00> : vector<16xf32>
    %430 = vector.multi_reduction <add>, %429, %cst_161 [1] : vector<16x32xf32> to vector<16xf32>
    %431 = vector.shape_cast %430 : vector<16xf32> to vector<16x1xf32>
    %cst_162 = arith.constant 3.200000e+01 : f32
    %432 = vector.broadcast %cst_162 : f32 to vector<16x1xf32>
    %433 = arith.divf %431, %432 : vector<16x1xf32>
    %cst_163 = arith.constant 9.99999997E-7 : f32
    %434 = vector.broadcast %cst_163 : f32 to vector<16x1xf32>
    %435 = arith.addf %433, %434 : vector<16x1xf32>
    %436 = math.rsqrt %435 : vector<16x1xf32>
    %437 = vector.broadcast %436 : vector<16x1xf32> to vector<16x32xf32>
    %438 = arith.mulf %427, %437 : vector<16x32xf32>
    %439 = vector.broadcast %428 : vector<1x32xf32> to vector<16x32xf32>
    %440 = arith.mulf %438, %439 : vector<16x32xf32>
    %c0_164 = arith.constant 0 : index
    %c0_165 = arith.constant 0 : index
    %441 = vector.load %arg15[%c0_164, %c0_165] : memref<16x32xf32, #tpu.memory_space<vmem>>, vector<16x32xf32>
    tpu.vector_store %arg15[%c0_164, %c0_165], %440 {strides = array<i32>} : memref<16x32xf32, #tpu.memory_space<vmem>>, vector<16x32xf32>,
    return
  }
}

</mosaic_0001>

<bundles_post_ra>
// kernel: tpu_custom_call.1
= control target key start
LH: loop header
LB: loop body
LE: loop exit
PB: predicated region body
PF: predicated region fallthrough
CT: control target
= control target key end

     0   :  { %20 = vsyncpa [#allocation3], 0  ;;  %s7833_s0 = inlined_call_operand.hbm [shape: f32[16,32], index: 0, kind: input, shape index: {}]   ;;  %s7834_s1 = inlined_call_operand.hbm [shape: f32[32,32], index: 1, kind: input, shape index: {}]   ;;  %s7835_s2 = inlined_call_operand.vmem [shape: f32[4,16,16], index: 2, kind: input, shape index: {}]   ;;  %s7836_s3 = inlined_call_operand.hbm [shape: f32[16,32], index: 3, kind: input, shape index: {}]   ;;  %s7837_s4 = inlined_call_operand.vmem [shape: f32[2,1,32], index: 4, kind: input, shape index: {}]   ;;  %s7838_s5 = inlined_call_operand.vmem [shape: f32[2,32,96], index: 5, kind: input, shape index: {}]   ;;  %s7839_s6 = inlined_call_operand.vmem [shape: f32[2,32,32], index: 6, kind: input, shape index: {}]   ;;  %s7840_s7 = inlined_call_operand.hbm [shape: f32[2,1,32], index: 7, kind: input, shape index: {}]   ;;  %s7841_s8 = inlined_call_operand.hbm [shape: f32[2,32,32], index: 8, kind: input, shape index: {}]   ;;  %s7842_s9 = inlined_call_operand.vmem [shape: f32[32,128], index: 9, kind: input, shape index: {}]   ;;  %s7843_s10 = inlined_call_operand.hbm [shape: f32[2,32,32], index: 10, kind: input, shape index: {}]   ;;  %s7844_s11 = inlined_call_operand.vmem [shape: f32[2,1,32], index: 11, kind: input, shape index: {}]   ;;  %s7845_s12 = inlined_call_operand.hbm [shape: f32[2,32,64], index: 12, kind: input, shape index: {}]   ;;  %s7846_s13 = inlined_call_operand.vmem [shape: f32[2,64,32], index: 13, kind: input, shape index: {}]   ;;  %s7847_s14 = inlined_call_operand.vmem [shape: f32[1,32], index: 14, kind: input, shape index: {}]   ;;  %s7848_s15 = inlined_call_operand.hbm [shape: f32[16,32], index: 15, kind: output, shape index: {}]  }
   0x1   :  { %21 = vsyncpa [#allocation6], 0 }
   0x2   :  { %22 = vsyncpa [#allocation9], 0 }
   0x3   :  { %23 = vsyncpa [#allocation12], 0 }
   0x4   :  { %24 = vsyncpa [#allocation4], 0  ;;  %s6769_s18 = smov [#allocation5]   ;;  %s6770_s20 = smov [#allocation8]  }
   0x5   :  { %s42_s19 = sshll.u32 %s6769_s18, 4  ;;  %s74_s21 = sshll.u32 %s6770_s20, 4  ;;  %s43_s19 = int_to_ptr.vmem [resolvable:$true] %s42_s19  ;;  %s6874_s21 = int_to_ptr.vmem [resolvable:$true] %s74_s21 }
   0x6   :  { %s6583_s24 = scalar_lea.hbm %s7834_s1, 512 }
   0x7   :  { %p6584_p0 = scmp.ne.s32.totalorder %s7834_s1, %s6583_s24  ;;  %p6587_p1 = scmp.lt.u32.totalorder %s6583_s24, %s7834_s1 }
   0x9   :  { %p6589_p2 = pnand %p6587_p1, %p6584_p0 }
   0xb   :  { %6592 = shalt.err (!%p6589_p2)
}
   0xc   :  { %s6593_s29 = scalar_lea.vmem %s43_s19, 512  ;;  %p6598_p4 = scmp.lt.s32.totalorder %s43_s19, %s43_s19 }
   0xd   :  { %p6594_p3 = scmp.ne.s32.totalorder %s43_s19, %s6593_s29  ;;  %p6599_p5 = scmp.lt.s32.totalorder %s6593_s29, %s6593_s29 }
   0xf   :  { %p6600_p6 = por %p6599_p5, %p6598_p4 }
  0x11   :  { %p6601_p7 = pnand %p6600_p6, %p6594_p3 }
  0x13   :  { %6604 = shalt.err (!%p6601_p7)
}
  0x14   :  { %s7849_s30 = smov 128   ;;  %s7851_s16 = smov 8  }
  0x15   :  { %48 = dma.hbm_to_vmem [thread:$0]  %s7834_s1, 512, %s43_s19, [#allocation6], %s7849_s30, %s7849_s30, %s7851_s16  }
  0x16   :  { %s6605_s23 = scalar_lea.hbm %s7840_s7, 32 }
  0x17   :  { %p6606_p8 = scmp.ne.s32.totalorder %s7840_s7, %s6605_s23  ;;  %p6609_p9 = scmp.lt.u32.totalorder %s6605_s23, %s7840_s7 }
  0x19   :  { %p6611_p10 = pnand %p6609_p9, %p6606_p8 }
  0x1b   :  { %6614 = shalt.err (!%p6611_p10)
}
  0x1c   :  { %s6615_s28 = scalar_lea.vmem %s6874_s21, 32  ;;  %p6620_p12 = scmp.lt.s32.totalorder %s6874_s21, %s6874_s21 }
  0x1d   :  { %p6616_p11 = scmp.ne.s32.totalorder %s6874_s21, %s6615_s28  ;;  %p6621_p13 = scmp.lt.s32.totalorder %s6615_s28, %s6615_s28 }
  0x1f   :  { %p6622_p0 = por %p6621_p13, %p6620_p12 }
  0x21   :  { %p6623_p1 = pnand %p6622_p0, %p6616_p11 }
  0x23   :  { %6626 = shalt.err (!%p6623_p1)
}
  0x24   :  { %s7855_s1 = smov 16   ;;  %s6774_s19 = smov 1  }
  0x25   :  { %80 = dma.hbm_to_vmem [thread:$0]  %s7840_s7, 32, %s6874_s21, [#allocation9], %s7855_s1, %s7855_s1, %s6774_s19  }
  0x26   :  { %s6775_s18 = smov [#allocation11]   ;;  %s6776_s22 = smov [#allocation2]  }
  0x27   :  { %s100_s20 = sshll.u32 %s6775_s18, 4  ;;  %s30_s23 = sshll.u32 %s6776_s22, 4  ;;  %s101_s20 = int_to_ptr.vmem [resolvable:$true] %s100_s20  ;;  %s6910_s23 = int_to_ptr.vmem [resolvable:$true] %s30_s23 }
  0x28   :  { %s6627_s26 = scalar_lea.hbm %s7843_s10, 1024 }
  0x29   :  { %p6628_p2 = scmp.ne.s32.totalorder %s7843_s10, %s6627_s26  ;;  %p6631_p3 = scmp.lt.u32.totalorder %s6627_s26, %s7843_s10 }
  0x2b   :  { %p6633_p4 = pnand %p6631_p3, %p6628_p2 }
  0x2d   :  { %6636 = shalt.err (!%p6633_p4)
}
  0x2e   :  { %s6637_s7 = scalar_lea.vmem %s101_s20, 1024  ;;  %p6642_p6 = scmp.lt.s32.totalorder %s101_s20, %s101_s20 }
  0x2f   :  { %p6638_p5 = scmp.ne.s32.totalorder %s101_s20, %s6637_s7  ;;  %p6643_p7 = scmp.lt.s32.totalorder %s6637_s7, %s6637_s7 }
  0x31   :  { %p6644_p8 = por %p6643_p7, %p6642_p6 }
  0x33   :  { %p6645_p9 = pnand %p6644_p8, %p6638_p5 }
  0x35   :  { %6648 = shalt.err (!%p6645_p9)
}
  0x36   :  { %s7857_s21 = smov 8   ;;  %s7858_s19 = smov 128  }
  0x37   :  { %106 = dma.hbm_to_vmem [thread:$0]  %s7843_s10, 1024, %s101_s20, [#allocation12], %s7858_s19, %s7858_s19, %s7857_s21  }
  0x38   :  { %s6649_s30 = scalar_lea.hbm %s7833_s0, 256 }
  0x39   :  { %p6650_p10 = scmp.ne.s32.totalorder %s7833_s0, %s6649_s30  ;;  %p6653_p11 = scmp.lt.u32.totalorder %s6649_s30, %s7833_s0 }
  0x3b   :  { %p6655_p12 = pnand %p6653_p11, %p6650_p10 }
  0x3d   :  { %6658 = shalt.err (!%p6655_p12)
}
  0x3e   :  { %s6659_s27 = scalar_lea.vmem %s6910_s23, 256  ;;  %p6664_p0 = scmp.lt.s32.totalorder %s6910_s23, %s6910_s23 }
  0x3f   :  { %p6660_p13 = scmp.ne.s32.totalorder %s6910_s23, %s6659_s27  ;;  %p6665_p1 = scmp.lt.s32.totalorder %s6659_s27, %s6659_s27 }
  0x41   :  { %p6666_p2 = por %p6665_p1, %p6664_p0 }
  0x43   :  { %p6667_p3 = pnand %p6666_p2, %p6660_p13 }
  0x45   :  { %6670 = shalt.err (!%p6667_p3)
}
  0x46   :  { %36 = dma.hbm_to_vmem [thread:$0]  %s7833_s0, 256, %s6910_s23, [#allocation3], %s7858_s19, %s7858_s19, %s7857_s21  }
  0x47   :  { %s6777_s28 = smov [#allocation7]   ;;  %s6778_s29 = smov [#allocation10]  }
  0x48   :  { %s56_s7 = sshll.u32 %s6777_s28, 4  ;;  %s86_s17 = sshll.u32 %s6778_s29, 4  ;;  %s57_s7 = int_to_ptr.vmem [resolvable:$true] %s56_s7  ;;  %s6947_s17 = int_to_ptr.vmem [resolvable:$true] %s86_s17 }
  0x49   :  { %s6671_s30 = scalar_lea.hbm %s7836_s3, 256 }
  0x4a   :  { %p6672_p4 = scmp.ne.s32.totalorder %s7836_s3, %s6671_s30  ;;  %p6675_p5 = scmp.lt.u32.totalorder %s6671_s30, %s7836_s3 }
  0x4c   :  { %p6677_p6 = pnand %p6675_p5, %p6672_p4 }
  0x4e   :  { %6680 = shalt.err (!%p6677_p6)
}
  0x4f   :  { %s6681_s0 = scalar_lea.vmem %s57_s7, 256  ;;  %p6686_p8 = scmp.lt.s32.totalorder %s57_s7, %s57_s7 }
  0x50   :  { %p6682_p7 = scmp.ne.s32.totalorder %s57_s7, %s6681_s0  ;;  %p6687_p9 = scmp.lt.s32.totalorder %s6681_s0, %s6681_s0 }
  0x52   :  { %p6688_p10 = por %p6687_p9, %p6686_p8 }
  0x54   :  { %p6689_p11 = pnand %p6688_p10, %p6682_p7 }
  0x56   :  { %6692 = shalt.err (!%p6689_p11)
}
  0x57   :  { %62 = dma.hbm_to_vmem [thread:$0]  %s7836_s3, 256, %s57_s7, [#allocation6], %s7858_s19, %s7858_s19, %s7857_s21  }
  0x58   :  { %s6693_s28 = scalar_lea.hbm %s7841_s8, 1024 }
  0x59   :  { %p6694_p12 = scmp.ne.s32.totalorder %s7841_s8, %s6693_s28  ;;  %p6697_p13 = scmp.lt.u32.totalorder %s6693_s28, %s7841_s8 }
  0x5b   :  { %p6699_p0 = pnand %p6697_p13, %p6694_p12 }
  0x5d   :  { %6702 = shalt.err (!%p6699_p0)
}
  0x5e   :  { %s6703_s16 = scalar_lea.vmem %s6947_s17, 1024  ;;  %p6708_p2 = scmp.lt.s32.totalorder %s6947_s17, %s6947_s17 }
  0x5f   :  { %p6704_p1 = scmp.ne.s32.totalorder %s6947_s17, %s6703_s16  ;;  %p6709_p3 = scmp.lt.s32.totalorder %s6703_s16, %s6703_s16 }
  0x61   :  { %p6710_p4 = por %p6709_p3, %p6708_p2 }
  0x63   :  { %p6711_p5 = pnand %p6710_p4, %p6704_p1 }
  0x65   :  { %6714 = shalt.err (!%p6711_p5)
}
  0x66   :  { %92 = dma.hbm_to_vmem [thread:$0]  %s7841_s8, 1024, %s6947_s17, [#allocation9], %s7858_s19, %s7858_s19, %s7857_s21  }
  0x67   :  { %s6779_s24 = smov [#allocation13]   ;;  %s6715_s23 = scalar_lea.hbm %s7845_s12, 1024 }
  0x68   :  { %s114_s25 = sshll.u32 %s6779_s24, 4  ;;  %p6716_p6 = scmp.ne.s32.totalorder %s7845_s12, %s6715_s23  ;;  %s115_s25 = int_to_ptr.vmem [resolvable:$true] %s114_s25 }
  0x69   :  { %p6719_p7 = scmp.lt.u32.totalorder %s6715_s23, %s7845_s12 }
  0x6b   :  { %p6721_p8 = pnand %p6719_p7, %p6716_p6 }
  0x6d   :  { %6724 = shalt.err (!%p6721_p8)
}
  0x6e   :  { %s6725_s29 = scalar_lea.vmem %s115_s25, 1024  ;;  %p6730_p10 = scmp.lt.s32.totalorder %s115_s25, %s115_s25 }
  0x6f   :  { %p6726_p9 = scmp.ne.s32.totalorder %s115_s25, %s6725_s29  ;;  %p6731_p11 = scmp.lt.s32.totalorder %s6725_s29, %s6725_s29 }
  0x71   :  { %p6732_p12 = por %p6731_p11, %p6730_p10 }
  0x73   :  { %p6733_p13 = pnand %p6732_p12, %p6726_p9 }
  0x75   :  { %6736 = shalt.err (!%p6733_p13)
}
  0x76   :  { %120 = dma.hbm_to_vmem [thread:$0]  %s7845_s12, 1024, %s115_s25, [#allocation12], %s7858_s19, %s7858_s19, %s7857_s21  }
  0x77   :  { %6759 = dma.done.wait [#allocation3], 256  }
  0x78   :  { %6760 = vsyncadd [#allocation3], 4294967040 }
  0x79   :  { %6761 = dma.done.wait [#allocation6], 768  }
  0x7a   :  { %6762 = vsyncadd [#allocation6], 4294966528 }
  0x7b   :  { %6763 = dma.done.wait [#allocation9], 1056  }
  0x7c   :  { %6764 = vsyncadd [#allocation9], 4294966240 }
  0x7d   :  { %6765 = dma.done.wait [#allocation12], 2048  }
  0x7e   :  { %6766 = vsyncadd [#allocation12], 4294965248  ;;  %v6999_v0 = vld [vmem:[#allocation2] sm:$0xff]  ;;  %vm166_vm0 = vcmask 261120   ;;  %v7001_v1 = vld [vmem:[#allocation2 + $0x8] sm:$0xff]  ;;  %vm381_vm1 = vcmask 64512  }
  0x7f   :  { %v265_v2 = vmul.f32 %v6999_v0, %v6999_v0  ;;  %v266_v3 = vmul.f32 %v7001_v1, %v7001_v1  ;;  %v162_v6 = vld [vmem:[%s7842_s9] sm:$0xff]  ;;  %v163_v7 = vld [vmem:[%s7842_s9 + $0x8] sm:$0xff]  ;;  %v164_v9 = vld [vmem:[%s7842_s9 + $0x10] sm:$0xff]  ;;  %s6780_s8 = smov 96   ;;  %vm465_vm3 = vcmask 130048   ;;  %s6781_s30 = smov 88  }
  0x80   :  { %v5802_v8 = vpack.c.bf16 %v163_v7, %v162_v6  ;;  %v165_v10 = vld [vmem:[%s7842_s9 + $0x18] sm:$0xff]  ;;  %v148_v12 = vld [vmem:[#allocation5] sm:$0xff]  ;;  %v290_v13 = vld [vmem:[%s7838_s5] sm:$0xff]  ;;  %s6782_s16 = smov 64   ;;  %s6783_s3 = smov 120   ;;  %vm1203_vm4 = vcmask 195584  }
  0x81   :  { %v267_v4 = vsel %vm166_vm0, %v265_v2, 0.0  ;;  %v270_v5 = vsel %vm166_vm0, %v266_v3, 0.0  ;;  %v5806_v11 = vpack.c.bf16 %v165_v10, %v164_v9  ;;  %5360 = vmatprep.mubr.msk.f32.mxu1 %vm166_vm0, %v148_v12  ;;  %v291_v14 = vld [vmem:[%s7838_s5 + $0x8] sm:$0xff]  ;;  %v292_v16 = vld [vmem:[%s7838_s5 + $0x10] sm:$0xff]  ;;  %v293_v17 = vld [vmem:[%s7838_s5 + $0x18] sm:$0xff]  ;;  %s6784_s0 = smov 80  }
  0x82   :  { %268 = vadd.xlane.f32.xlu0 %v267_v4  ;;  %5803 = vmatprep.subr.bf16.mxu1 %v5802_v8  ;;  %v5810_v15 = vpack.c.bf16 %v291_v14, %v290_v13  ;;  %v149_v18 = vld [vmem:[#allocation5 + $0x8] sm:$0xff]  ;;  %v150_v19 = vld [vmem:[#allocation5 + $0x10] sm:$0xff]  ;;  %v5814_v20 = vpack.c.bf16 %v293_v17, %v292_v16  ;;  %v151_v21 = vld [vmem:[#allocation5 + $0x18] sm:$0xff]  ;;  %s6785_s23 = smov 112   ;;  %s6786_s27 = smov 56   ;;  %vm2490_vm5 = vcmask 523264  }
  0x83   :  { %5805 = vmatpush3.bf16.msra.mxu1 %v5802_v8  ;;  %v4943_v29 = vld [vmem:[%s7837_s4] ss:$0 sm:$0xff]  ;;  %vm7066_vm2 = vmpackc.low %vm381_vm1, %vm381_vm1  ;;  %v153_v51 = vld [vmem:[%s7835_s2 + $0x8] sm:$0xff]  ;;  %s6787_s29 = smov 48   ;;  %s6788_s17 = smov 104  }
  0x84   :  { %5807 = vmatprep.subr.bf16.mxu1 %v5806_v11  ;;  %v152_v52 = vld [vmem:[%s7835_s2] sm:$0xff]  ;;  %s6789_s12 = smov 72   ;;  %s6790_s25 = smov 40  }
  0x85   :  { %s7853_s24 = smov 24  }
  0x86   :  { %271 = vadd.xlane.f32.xlu0 %v270_v5 }
  0x87   :  { %5809 = vmatpush3.bf16.msra.mxu1 %v5806_v11 }
  0x88   :  { %5811 = vmatprep.subr.bf16.mxu1 %v5810_v15 }
  0x8a   :  { %5361 = vmatmul.mubr.msk.f32.vlgmr.msra.gmra.mrb[0].mxu1 %vm166_vm0, %v149_v18 }
  0x8b   :  { %5813 = vmatpush3.bf16.msra.mxu1 %v5810_v15  ;;  %5363 = vmatprep.mubr.msk.f32.mxu1 %vm166_vm0, %v150_v19 }
  0x8c   :  { %5815 = vmatprep.subr.bf16.mxu1 %v5814_v20 }
  0x8e   :  { %5364 = vmatmul.mubr.msk.f32.gmra.mrb[2].mxu1 %vm166_vm0, %v151_v21 }
  0x8f   :  { %5817 = vmatpush3.bf16.msra.mxu1 %v5814_v20 }
 0x10f   :  { %v269_v22 = vpop.xlane.xlu0 %268 }
 0x110   :  { %v274_v23 = vmul.f32 0.03125, %v269_v22 }
 0x112   :  { %v276_v24 = vadd.f32 1e-06, %v274_v23 }
 0x113   :  { %v272_v25 = vpop.xlane.xlu0 %271 }
 0x114   :  { %6417 = vrsqrt.f32 %v276_v24  ;;  %v275_v26 = vmul.f32 0.03125, %v272_v25  ;;  %v155_v25 = vld [vmem:[%s7835_s2 + $0x18] sm:$0xff] }
 0x116   :  { %v277_v27 = vadd.f32 1e-06, %v275_v26  ;;  %v154_v26 = vld [vmem:[%s7835_s2 + $0x10] sm:$0xff] }
 0x118   :  { %6419 = vrsqrt.f32 %v277_v27 }
 0x11e   :  { %v6418_v28 = vpop.eup %6417 }
 0x11f   :  { %v280_v30 = vmul.f32 %v6418_v28, %v6999_v0 }
 0x121   :  { %v288_v31 = vmul.f32 %v4943_v29, %v280_v30 }
 0x122   :  { %v6420_v32 = vpop.eup %6419 }
 0x123   :  { %v281_v33 = vmul.f32 %v6420_v32, %v7001_v1  ;;  %5374 = vmatprep.mubr.msk.f32.mxu1 %vm166_vm0, %v288_v31 }
 0x125   :  { %v289_v34 = vmul.f32 %v4943_v29, %v281_v33 }
 0x127   :  { %5375 = vmatmul.mubr.msk.f32.vlgmr.msra.gmra.mrb[4].mxu1 %vm166_vm0, %v289_v34 }
 0x15d   :  { %v5362_v35 = vpop.f32.mrb[0].mxu1 }
 0x15e   :  { %v245_v36 = vpop.f32.mrb[1].mxu1 }
 0x15f   :  { %v7044_v39 = vpack.c.bf16 %v5362_v35, %v245_v36  ;;  %v7046_v40 = vpack.i.bf16 %v5362_v35, %v245_v36 }
 0x161   :  { %v5365_v37 = vpop.f32.mrb[2].mxu1 }
 0x162   :  { %v255_v38 = vpop.f32.mrb[3].mxu1 }
 0x163   :  { %v7048_v41 = vpack.c.bf16 %v5365_v37, %v255_v38  ;;  %v7050_v42 = vpack.i.bf16 %v5365_v37, %v255_v38 }
 0x1fa   :  { %v7052_v43 = vpop.f32.mrb[4].mxu1 }
 0x1fb   :  { %v7054_v44 = vpop.f32.mrb[5].mxu1 }
 0x1fc   :  { %5381 = vmatprep.mubr.msk.f32.mxu0 %vm381_vm1, %v7054_v44  ;;  %v7060_v45 = vpack.i.bf16 %v7052_v43, %v7054_v44 }
 0x1fe   :  { %6188 = vrot.lane.b32.xlu1 %v7060_v45, %s6780_s8 }
 0x270   :  { %v6189_v46 = vpop.permute.xlu1 %6188 }
 0x271   :  { %v6191_v47 = vunpack.i.h.bf16 %v6189_v46  ;;  %v6190_v48 = vunpack.i.l.bf16 %v6189_v46 }
 0x273   :  { %v5818_v50 = vpack.c.bf16 %v6191_v47, %v6190_v48 }
 0x275   :  { %5820 = vmatprep.subr.msk.bf16.mxu0 %vm7066_vm2, %v5818_v50 }
 0x276   :  { %5823 = vmatpush3.bf16.xpose.msk.msra.mxu0 %vm7066_vm2, %v5818_v50 }
 0x27d   :  { %5382 = vmatmul.mubr.msk.f32.vlgmr.msra.gmra.mrb[0].mxu0 %vm381_vm1, %v7052_v43 }
 0x350   :  { %v5383_v53 = vpop.f32.mrb[0].mxu0 }
 0x351   :  { %v462_v54 = vadd.f32 %v5383_v53, %v153_v51  ;;  %v456_v55 = vpop.f32.mrb[1].mxu0 }
 0x352   :  { %v457_v56 = vadd.f32 %v456_v55, %v152_v52 }
 0x353   :  { %v469_v57 = vsel %vm465_vm3, %v462_v54, -inf }
 0x354   :  { %470 = vmax.xlane.f32.xlu0 %v469_v57  ;;  %v466_v58 = vsel %vm465_vm3, %v457_v56, -inf }
 0x355   :  { %467 = vmax.xlane.f32.xlu1 %v466_v58 }
 0x366   :  { %6198 = vrot.lane.b32.xlu1 %v7060_v45, %s6781_s30 }
 0x36a   :  { %6193 = vrot.lane.b32.xlu0 %v7060_v45, %s6782_s16 }
 0x3e1   :  { %v471_v59 = vpop.xlane.xlu0 %470 }
 0x3e2   :  { %v473_v60 = vsub.f32 %v462_v54, %v471_v59  ;;  %v468_v61 = vpop.xlane.xlu1 %467 }
 0x3e3   :  { %v472_v62 = vsub.f32 %v457_v56, %v468_v61 }
 0x3e4   :  { %v476_v63 = vmul.f32 1.442695, %v473_v60 }
 0x3e5   :  { %v474_v2 = vmul.f32 1.442695, %v472_v62  ;;  %v6194_v3 = vpop.permute.xlu0 %6193 }
 0x3e6   :  { %6421 = vpow2.f32 %v476_v63  ;;  %v6196_v4 = vunpack.i.h.bf16 %v6194_v3  ;;  %v6195_v5 = vunpack.i.l.bf16 %v6194_v3  ;;  %v6199_v6 = vpop.permute.xlu1 %6198 }
 0x3e7   :  { %v6201_v7 = vunpack.i.h.bf16 %v6199_v6  ;;  %v6200_v8 = vunpack.i.l.bf16 %v6199_v6  ;;  %6423 = vpow2.f32 %v474_v2 }
 0x3e8   :  { %v5824_v9 = vpack.c.bf16 %v6196_v4, %v6195_v5 }
 0x3e9   :  { %v5828_v10 = vpack.c.bf16 %v6201_v7, %v6200_v8  ;;  %v157_v7 = vld [vmem:[%s7835_s2 + $0x28] sm:$0xff]  ;;  %v156_v8 = vld [vmem:[%s7835_s2 + $0x20] sm:$0xff] }
 0x3ea   :  { %5825 = vmatprep.subr.bf16.mxu1 %v5824_v9 }
 0x3eb   :  { %5827 = vmatpush3.bf16.msra.mxu1 %v5824_v9 }
 0x3ec   :  { %5830 = vmatprep.subr.msk.bf16.mxu1 %vm7066_vm2, %v5828_v10 }
 0x3f0   :  { %v6422_v11 = vpop.eup %6421 }
 0x3f1   :  { %v481_v12 = vsel %vm465_vm3, %v6422_v11, 0.0  ;;  %v6424_v13 = vpop.eup %6423 }
 0x3f2   :  { %482 = vadd.xlane.f32.xlu0 %v481_v12  ;;  %v478_v14 = vsel %vm465_vm3, %v6424_v13, 0.0 }
 0x3f6   :  { %479 = vadd.xlane.f32.xlu0 %v478_v14 }
 0x40c   :  { %575 = vrot.lane.b32.xlu0 %v7054_v44, %s6783_s3 }
 0x410   :  { %577 = vrot.lane.b32.xlu0 %v7052_v43, %s6783_s3 }
 0x47f   :  { %v483_v15 = vpop.xlane.xlu0 %482 }
 0x480   :  { %6425 = vrcp.f32 %v483_v15 }
 0x483   :  { %v480_v16 = vpop.xlane.xlu0 %479 }
 0x484   :  { %6427 = vrcp.f32 %v480_v16 }
 0x487   :  { %v576_v21 = vpop.permute.xlu0 %575 }
 0x48a   :  { %v6426_v17 = vpop.eup %6425 }
 0x48b   :  { %v487_v20 = vmul.f32 %v6426_v17, %v6422_v11  ;;  %v578_v22 = vpop.permute.xlu0 %577 }
 0x48e   :  { %v6428_v18 = vpop.eup %6427 }
 0x48f   :  { %v486_v19 = vmul.f32 %v6428_v18, %v6424_v13 }
 0x491   :  { %5388 = vmatprep.mubr.msk.f32.mxu1 %vm465_vm3, %v486_v19 }
 0x492   :  { %5389 = vmatmul.mubr.msk.f32.vlgmr.msra.gmra.mrb[6].mxu1 %vm465_vm3, %v487_v20 }
 0x493   :  { %5833 = vmatpush3.bf16.xpose.msk.msra.mxu1 %vm7066_vm2, %v5828_v10  ;;  %5395 = vmatprep.mubr.msk.f32.mxu1 %vm381_vm1, %v576_v21 }
 0x49a   :  { %5396 = vmatmul.mubr.msk.f32.vlgmr.msra.gmra.mrb[8].mxu1 %vm381_vm1, %v578_v22 }
 0x565   :  { %v7102_v23 = vpop.f32.mrb[6].mxu1 }
 0x566   :  { %v7104_v24 = vpop.f32.mrb[7].mxu1 }
 0x56d   :  { %v5397_v27 = vpop.f32.mrb[8].mxu1 }
 0x56e   :  { %v663_v28 = vadd.f32 %v5397_v27, %v155_v25  ;;  %v657_v29 = vpop.f32.mrb[9].mxu1 }
 0x56f   :  { %v658_v30 = vadd.f32 %v657_v29, %v154_v26 }
 0x570   :  { %v669_v31 = vsel %vm465_vm3, %v663_v28, -inf }
 0x571   :  { %670 = vmax.xlane.f32.xlu1 %v669_v31  ;;  %v666_v32 = vsel %vm465_vm3, %v658_v30, -inf }
 0x572   :  { %667 = vmax.xlane.f32.xlu0 %v666_v32 }
 0x582   :  { %6208 = vrot.lane.b32.xlu1 %v7060_v45, %s6784_s0 }
 0x586   :  { %775 = vrot.lane.b32.xlu1 %v7054_v44, %s6785_s23 }
 0x5fe   :  { %v671_v33 = vpop.xlane.xlu1 %670 }
 0x5ff   :  { %v673_v34 = vsub.f32 %v663_v28, %v671_v33  ;;  %v668_v35 = vpop.xlane.xlu0 %667 }
 0x600   :  { %v672_v36 = vsub.f32 %v658_v30, %v668_v35 }
 0x601   :  { %v676_v37 = vmul.f32 1.442695, %v673_v34 }
 0x602   :  { %v674_v38 = vmul.f32 1.442695, %v672_v36  ;;  %v6209_v53 = vpop.permute.xlu1 %6208 }
 0x603   :  { %6429 = vpow2.f32 %v676_v37  ;;  %v6211_v55 = vunpack.i.h.bf16 %v6209_v53  ;;  %v6210_v56 = vunpack.i.l.bf16 %v6209_v53 }
 0x604   :  { %6431 = vpow2.f32 %v674_v38 }
 0x605   :  { %v5838_v60 = vpack.c.bf16 %v6211_v55, %v6210_v56 }
 0x606   :  { %v776_v3 = vpop.permute.xlu1 %775 }
 0x60d   :  { %v6430_v46 = vpop.eup %6429 }
 0x60e   :  { %v681_v47 = vsel %vm465_vm3, %v6430_v46, 0.0  ;;  %v6432_v48 = vpop.eup %6431 }
 0x60f   :  { %682 = vadd.xlane.f32.xlu0 %v681_v47  ;;  %v678_v50 = vsel %vm465_vm3, %v6432_v48, 0.0 }
 0x613   :  { %679 = vadd.xlane.f32.xlu0 %v678_v50 }
 0x629   :  { %6203 = vrot.lane.b32.xlu0 %v7060_v45, %s6786_s27 }
 0x62d   :  { %777 = vrot.lane.b32.xlu0 %v7052_v43, %s6785_s23 }
 0x69c   :  { %v683_v51 = vpop.xlane.xlu0 %682 }
 0x69d   :  { %6433 = vrcp.f32 %v683_v51  ;;  %v159_v51 = vld [vmem:[%s7835_s2 + $0x38] sm:$0xff] }
 0x6a0   :  { %v680_v52 = vpop.xlane.xlu0 %679 }
 0x6a1   :  { %6435 = vrcp.f32 %v680_v52  ;;  %v158_v52 = vld [vmem:[%s7835_s2 + $0x30] sm:$0xff] }
 0x6a4   :  { %v6204_v54 = vpop.permute.xlu0 %6203 }
 0x6a5   :  { %v6206_v57 = vunpack.i.h.bf16 %v6204_v54  ;;  %v6205_v58 = vunpack.i.l.bf16 %v6204_v54 }
 0x6a7   :  { %v5834_v59 = vpack.c.bf16 %v6206_v57, %v6205_v58  ;;  %v6434_v61 = vpop.eup %6433 }
 0x6a8   :  { %v687_v2 = vmul.f32 %v6434_v61, %v6430_v46  ;;  %v778_v4 = vpop.permute.xlu0 %777 }
 0x6a9   :  { %5835 = vmatprep.subr.bf16.mxu0 %v5834_v59 }
 0x6aa   :  { %5837 = vmatpush3.bf16.msra.mxu0 %v5834_v59 }
 0x6ab   :  { %v6436_v62 = vpop.eup %6435  ;;  %5840 = vmatprep.subr.msk.bf16.mxu0 %vm7066_vm2, %v5838_v60 }
 0x6ac   :  { %v686_v63 = vmul.f32 %v6436_v62, %v6432_v48 }
 0x6ae   :  { %5402 = vmatprep.mubr.msk.f32.mxu0 %vm465_vm3, %v686_v63 }
 0x6af   :  { %5403 = vmatmul.mubr.msk.f32.vlgmr.msra.gmra.mrb[2].mxu0 %vm465_vm3, %v687_v2 }
 0x6b0   :  { %5409 = vmatprep.mubr.msk.f32.mxu0 %vm381_vm1, %v776_v3 }
 0x6b3   :  { %5843 = vmatpush3.bf16.xpose.msk.msra.mxu0 %vm7066_vm2, %v5838_v60 }
 0x6ba   :  { %5410 = vmatmul.mubr.msk.f32.vlgmr.msra.gmra.mrb[4].mxu0 %vm381_vm1, %v778_v4 }
 0x782   :  { %v7132_v5 = vpop.f32.mrb[2].mxu0 }
 0x783   :  { %v7134_v6 = vpop.f32.mrb[3].mxu0 }
 0x78d   :  { %v5411_v9 = vpop.f32.mrb[4].mxu0 }
 0x78e   :  { %v863_v10 = vadd.f32 %v5411_v9, %v157_v7  ;;  %v857_v11 = vpop.f32.mrb[5].mxu0 }
 0x78f   :  { %v858_v12 = vadd.f32 %v857_v11, %v156_v8  ;;  %v1206_v11 = vld [vmem:[%s7839_s6] sm:$0xff] }
 0x790   :  { %v869_v13 = vsel %vm465_vm3, %v863_v10, -inf }
 0x791   :  { %870 = vmax.xlane.f32.xlu0 %v869_v13  ;;  %v866_v14 = vsel %vm465_vm3, %v858_v12, -inf }
 0x792   :  { %867 = vmax.xlane.f32.xlu1 %v866_v14 }
 0x7a3   :  { %6213 = vrot.lane.b32.xlu1 %v7060_v45, %s6787_s29 }
 0x7a7   :  { %975 = vrot.lane.b32.xlu1 %v7054_v44, %s6788_s17 }
 0x7ab   :  { %977 = vrot.lane.b32.xlu1 %v7052_v43, %s6788_s17 }
 0x81e   :  { %v871_v15 = vpop.xlane.xlu0 %870 }
 0x81f   :  { %v873_v16 = vsub.f32 %v863_v10, %v871_v15  ;;  %v868_v17 = vpop.xlane.xlu1 %867 }
 0x820   :  { %v872_v18 = vsub.f32 %v858_v12, %v868_v17  ;;  %v1207_v12 = vld [vmem:[%s7839_s6 + $0x8] sm:$0xff] }
 0x821   :  { %v876_v19 = vmul.f32 1.442695, %v873_v16  ;;  %v5858_v13 = vpack.c.bf16 %v1207_v12, %v1206_v11 }
 0x822   :  { %v874_v20 = vmul.f32 1.442695, %v872_v18  ;;  %v1209_v18 = vld [vmem:[%s7839_s6 + $0x18] sm:$0xff] }
 0x823   :  { %6437 = vpow2.f32 %v876_v19  ;;  %v6214_v21 = vpop.permute.xlu1 %6213 }
 0x824   :  { %v6216_v22 = vunpack.i.h.bf16 %v6214_v21  ;;  %v6215_v25 = vunpack.i.l.bf16 %v6214_v21  ;;  %6439 = vpow2.f32 %v874_v20 }
 0x826   :  { %v5844_v26 = vpack.c.bf16 %v6216_v22, %v6215_v25 }
 0x827   :  { %v976_v46 = vpop.permute.xlu1 %975 }
 0x828   :  { %5845 = vmatprep.subr.bf16.mxu1 %v5844_v26 }
 0x829   :  { %5847 = vmatpush3.bf16.msra.mxu1 %v5844_v26 }
 0x82b   :  { %v978_v47 = vpop.permute.xlu1 %977 }
 0x82d   :  { %v6438_v27 = vpop.eup %6437 }
 0x82e   :  { %v881_v44 = vsel %vm465_vm3, %v6438_v27, 0.0  ;;  %v6440_v28 = vpop.eup %6439 }
 0x82f   :  { %882 = vadd.xlane.f32.xlu0 %v881_v44  ;;  %v878_v43 = vsel %vm465_vm3, %v6440_v28, 0.0 }
 0x833   :  { %879 = vadd.xlane.f32.xlu0 %v878_v43 }
 0x849   :  { %6218 = vrot.lane.b32.xlu0 %v7060_v45, %s6789_s12 }
 0x8bc   :  { %v883_v29 = vpop.xlane.xlu0 %882 }
 0x8bd   :  { %6441 = vrcp.f32 %v883_v29 }
 0x8c0   :  { %v880_v30 = vpop.xlane.xlu0 %879 }
 0x8c1   :  { %6443 = vrcp.f32 %v880_v30 }
 0x8c4   :  { %v6219_v31 = vpop.permute.xlu0 %6218 }
 0x8c5   :  { %v6221_v32 = vunpack.i.h.bf16 %v6219_v31  ;;  %v6220_v33 = vunpack.i.l.bf16 %v6219_v31 }
 0x8c7   :  { %v5848_v34 = vpack.c.bf16 %v6221_v32, %v6220_v33  ;;  %v6442_v35 = vpop.eup %6441 }
 0x8c8   :  { %v887_v38 = vmul.f32 %v6442_v35, %v6438_v27 }
 0x8c9   :  { %5850 = vmatprep.subr.msk.bf16.mxu1 %vm7066_vm2, %v5848_v34 }
 0x8cb   :  { %v6444_v36 = vpop.eup %6443 }
 0x8cc   :  { %v886_v37 = vmul.f32 %v6444_v36, %v6440_v28 }
 0x8ce   :  { %5416 = vmatprep.mubr.msk.f32.mxu1 %vm465_vm3, %v886_v37 }
 0x8cf   :  { %5417 = vmatmul.mubr.msk.f32.vlgmr.msra.gmra.mrb[10].mxu1 %vm465_vm3, %v887_v38 }
 0x8d0   :  { %5853 = vmatpush3.bf16.xpose.msk.msra.mxu1 %vm7066_vm2, %v5848_v34  ;;  %5423 = vmatprep.mubr.msk.f32.mxu1 %vm381_vm1, %v976_v46 }
 0x8d7   :  { %5424 = vmatmul.mubr.msk.f32.vlgmr.msra.gmra.mrb[12].mxu1 %vm381_vm1, %v978_v47 }
 0x9a2   :  { %v5418_v48 = vpop.f32.mrb[10].mxu1 }
 0x9a3   :  { %v966_v50 = vpop.f32.mrb[11].mxu1 }
 0x9aa   :  { %v5425_v53 = vpop.f32.mrb[12].mxu1 }
 0x9ab   :  { %v1063_v54 = vadd.f32 %v5425_v53, %v159_v51  ;;  %v1057_v55 = vpop.f32.mrb[13].mxu1  ;;  %v1321_v51 = vld [vmem:[#allocation10 + $0x18] sm:$0xff] }
 0x9ac   :  { %v1058_v56 = vadd.f32 %v1057_v55, %v158_v52 }
 0x9ad   :  { %v1069_v57 = vsel %vm465_vm3, %v1063_v54, -inf }
 0x9ae   :  { %1070 = vmax.xlane.f32.xlu0 %v1069_v57  ;;  %v1066_v58 = vsel %vm465_vm3, %v1058_v56, -inf }
 0x9af   :  { %1067 = vmax.xlane.f32.xlu1 %v1066_v58 }
 0x9c0   :  { %6223 = vrot.lane.b32.xlu1 %v7060_v45, %s6790_s25 }
 0x9c4   :  { %1179 = vrot.lane.b32.xlu1 %v7132_v5, %s7857_s21 }
 0x9c8   :  { %1185 = vrot.lane.b32.xlu1 %v966_v50, %s7855_s1 }
 0x9cc   :  { %1187 = vrot.lane.b32.xlu1 %v5418_v48, %s7855_s1  ;;  %v1319_v48 = vld [vmem:[#allocation10 + $0x8] sm:$0xff] }
 0xa3b   :  { %v1071_v59 = vpop.xlane.xlu0 %1070 }
 0xa3c   :  { %v1073_v60 = vsub.f32 %v1063_v54, %v1071_v59  ;;  %v1068_v61 = vpop.xlane.xlu1 %1067 }
 0xa3d   :  { %v1072_v62 = vsub.f32 %v1058_v56, %v1068_v61 }
 0xa3e   :  { %v1076_v63 = vmul.f32 1.442695, %v1073_v60  ;;  %v4972_v60 = vld [vmem:[#allocation8] ss:$0 sm:$0xff] }
 0xa3f   :  { %v1074_v2 = vmul.f32 1.442695, %v1072_v62 }
 0xa40   :  { %v6224_v3 = vpop.permute.xlu1 %6223 }
 0xa41   :  { %6445 = vpow2.f32 %v1074_v2  ;;  %v6226_v4 = vunpack.i.h.bf16 %v6224_v3  ;;  %v6225_v7 = vunpack.i.l.bf16 %v6224_v3 }
 0xa42   :  { %6447 = vpow2.f32 %v1076_v63 }
 0xa43   :  { %v5854_v8 = vpack.c.bf16 %v6226_v4, %v6225_v7  ;;  %v7242_v7 = vld [vmem:[#allocation7] sm:$0xff] }
 0xa44   :  { %v1180_v26 = vpop.permute.xlu1 %1179 }
 0xa45   :  { %5855 = vmatprep.subr.bf16.mxu0 %v5854_v8  ;;  %v1200_v30 = vsel %vm381_vm1, %v7102_v23, %v1180_v26 }
 0xa46   :  { %5857 = vmatpush3.bf16.msra.mxu0 %v5854_v8 }
 0xa47   :  { %5859 = vmatprep.subr.bf16.mxu0 %v5858_v13 }
 0xa48   :  { %v1186_v27 = vpop.permute.xlu1 %1185 }
 0xa4b   :  { %v6446_v45 = vpop.eup %6445 }
 0xa4c   :  { %v1078_v5 = vsel %vm465_vm3, %v6446_v45, 0.0  ;;  %v6448_v9 = vpop.eup %6447  ;;  %v1188_v28 = vpop.permute.xlu1 %1187 }
 0xa4d   :  { %1079 = vadd.xlane.f32.xlu0 %v1078_v5  ;;  %v1081_v10 = vsel %vm465_vm3, %v6448_v9, 0.0  ;;  %v1202_v33 = vsel %vm465_vm3, %v1200_v30, %v1188_v28 }
 0xa51   :  { %1082 = vadd.xlane.f32.xlu0 %v1081_v10 }
 0xa67   :  { %1177 = vrot.lane.b32.xlu0 %v7134_v6, %s7857_s21  ;;  %v1208_v6 = vld [vmem:[%s7839_s6 + $0x10] sm:$0xff] }
 0xa68   :  { %v5862_v21 = vpack.c.bf16 %v1209_v18, %v1208_v6 }
 0xada   :  { %v1080_v14 = vpop.xlane.xlu0 %1079 }
 0xadb   :  { %6449 = vrcp.f32 %v1080_v14 }
 0xade   :  { %v1083_v15 = vpop.xlane.xlu0 %1082 }
 0xadf   :  { %6451 = vrcp.f32 %v1083_v15 }
 0xae2   :  { %v1178_v44 = vpop.permute.xlu0 %1177 }
 0xae3   :  { %v1199_v43 = vsel %vm381_vm1, %v7104_v24, %v1178_v44 }
 0xae4   :  { %v1201_v31 = vsel %vm465_vm3, %v1199_v43, %v1186_v27 }
 0xae5   :  { %v6450_v16 = vpop.eup %6449 }
 0xae6   :  { %v1086_v17 = vmul.f32 %v6450_v16, %v6446_v45  ;;  %v7244_v45 = vld [vmem:[#allocation7 + $0x8] sm:$0xff] }
 0xae8   :  { %5430 = vmatprep.mubr.msk.f32.mxu0 %vm465_vm3, %v1086_v17 }
 0xae9   :  { %v6452_v19 = vpop.eup %6451 }
 0xaea   :  { %v1087_v20 = vmul.f32 %v6452_v19, %v6448_v9 }
 0xaec   :  { %5431 = vmatmul.mubr.msk.f32.vlgmr.msra.gmra.mrb[6].mxu0 %vm465_vm3, %v1087_v20 }
 0xaed   :  { %5861 = vmatpush3.bf16.msra.mxu0 %v5858_v13 }
 0xaee   :  { %5863 = vmatprep.subr.bf16.mxu0 %v5862_v21 }
 0xaf1   :  { %5865 = vmatpush3.bf16.msra.mxu0 %v5862_v21 }
 0xaf2   :  { %5876 = vmatprep.subr.msk.bf16.mxu0 %vm7066_vm2, %v7044_v39 }
 0xbbf   :  { %v5432_v22 = vpop.f32.mrb[6].mxu0 }
 0xbc0   :  { %1195 = vrot.lane.b32.xlu1 %v5432_v22, %s7853_s24  ;;  %v1166_v25 = vpop.f32.mrb[7].mxu0 }
 0xbc1   :  { %1193 = vrot.lane.b32.xlu0 %v1166_v25, %s7853_s24 }
 0xc32   :  { %v1196_v29 = vpop.permute.xlu1 %1195 }
 0xc33   :  { %v1194_v32 = vpop.permute.xlu0 %1193  ;;  %v1205_v35 = vsel %vm1203_vm4, %v1202_v33, %v1196_v29 }
 0xc34   :  { %v1204_v34 = vsel %vm1203_vm4, %v1201_v31, %v1194_v32 }
 0xc35   :  { %5441 = vmatprep.mubr.msk.f32.mxu0 %vm166_vm0, %v1204_v34 }
 0xc36   :  { %5442 = vmatmul.mubr.msk.f32.vlgmr.msra.gmra.mrb[8].mxu0 %vm166_vm0, %v1205_v35 }
 0xc37   :  { %5879 = vmatpush3.bf16.xpose.msk.msra.mxu0 %vm7066_vm2, %v7044_v39 }
 0xc38   :  { %5882 = vmatprep.subr.msk.bf16.mxu0 %vm7066_vm2, %v7048_v41 }
 0xc3f   :  { %5885 = vmatpush3.bf16.xpose.msk.msra.mxu0 %vm7066_vm2, %v7048_v41  ;;  %v1318_v41 = vld [vmem:[#allocation10] sm:$0xff] }
 0xc40   :  { %v5866_v50 = vpack.c.bf16 %v1319_v48, %v1318_v41 }
 0xc42   :  { %5867 = vmatprep.subr.bf16.mxu1 %v5866_v50 }
 0xc43   :  { %5869 = vmatpush3.bf16.msra.mxu1 %v5866_v50 }
 0xd09   :  { %v5443_v23 = vpop.f32.mrb[8].mxu0 }
 0xd0a   :  { %v7219_v24 = vadd.f32 %v5443_v23, %v7001_v1  ;;  %v1282_v36 = vpop.f32.mrb[9].mxu0  ;;  %v1320_v1 = vld [vmem:[#allocation10 + $0x10] sm:$0xff] }
 0xd0b   :  { %v7222_v37 = vadd.f32 %v1282_v36, %v6999_v0  ;;  %v5870_v52 = vpack.c.bf16 %v1321_v51, %v1320_v1 }
 0xd0c   :  { %v1295_v38 = vmul.f32 %v7219_v24, %v7219_v24 }
 0xd0d   :  { %v1294_v39 = vmul.f32 %v7222_v37, %v7222_v37  ;;  %5871 = vmatprep.subr.bf16.mxu1 %v5870_v52 }
 0xd0e   :  { %v1299_v46 = vsel %vm166_vm0, %v1295_v38, 0.0  ;;  %5873 = vmatpush3.bf16.msra.mxu1 %v5870_v52 }
 0xd0f   :  { %1300 = vadd.xlane.f32.xlu1 %v1299_v46  ;;  %v1296_v47 = vsel %vm166_vm0, %v1294_v39, 0.0 }
 0xd10   :  { %1297 = vadd.xlane.f32.xlu0 %v1296_v47 }
 0xd9c   :  { %v1301_v0 = vpop.xlane.xlu1 %1300 }
 0xd9d   :  { %v1303_v53 = vmul.f32 0.03125, %v1301_v0  ;;  %v1298_v54 = vpop.xlane.xlu0 %1297 }
 0xd9e   :  { %v1302_v55 = vmul.f32 0.03125, %v1298_v54 }
 0xd9f   :  { %v1305_v56 = vadd.f32 1e-06, %v1303_v53 }
 0xda0   :  { %v1304_v57 = vadd.f32 1e-06, %v1302_v55 }
 0xda1   :  { %6453 = vrsqrt.f32 %v1305_v56 }
 0xda2   :  { %6455 = vrsqrt.f32 %v1304_v57 }
 0xdab   :  { %v6454_v58 = vpop.eup %6453 }
 0xdac   :  { %v6456_v59 = vpop.eup %6455  ;;  %v1309_v61 = vmul.f32 %v6454_v58, %v7219_v24 }
 0xdad   :  { %v1308_v62 = vmul.f32 %v6456_v59, %v7222_v37 }
 0xdae   :  { %v1317_v2 = vmul.f32 %v4972_v60, %v1309_v61 }
 0xdaf   :  { %v1316_v63 = vmul.f32 %v4972_v60, %v1308_v62 }
 0xdb1   :  { %5452 = vmatprep.mubr.msk.f32.mxu1 %vm166_vm0, %v1316_v63 }
 0xdb2   :  { %5453 = vmatmul.mubr.msk.f32.vlgmr.msra.gmra.mrb[14].mxu1 %vm166_vm0, %v1317_v2 }
 0xe85   :  { %v7234_v3 = vpop.f32.mrb[14].mxu1 }
 0xe86   :  { %v7236_v4 = vpop.f32.mrb[15].mxu1 }
 0xe87   :  { %5463 = vmatprep.mubr.msk.f32.mxu0 %vm381_vm1, %v7236_v4 }
 0xe88   :  { %5464 = vmatmul.mubr.msk.f32.vlgmr.msra.gmra.mrb[10].mxu0 %vm381_vm1, %v7234_v3 }
 0xf5b   :  { %v5465_v8 = vpop.f32.mrb[10].mxu0 }
 0xf5c   :  { %v1487_v5 = vpop.f32.mrb[11].mxu0  ;;  %v1493_v10 = vadd.f32 %v5465_v8, %v7244_v45 }
 0xf5d   :  { %v1488_v9 = vadd.f32 %v1487_v5, %v7242_v7 }
 0xf5e   :  { %v1499_v12 = vsel %vm166_vm0, %v1493_v10, -inf }
 0xf5f   :  { %v1496_v11 = vsel %vm166_vm0, %v1488_v9, -inf }
 0xf60   :  { %1497 = vmax.xlane.f32.xlu0 %v1496_v11 }
 0xf64   :  { %1500 = vmax.xlane.f32.xlu0 %v1499_v12 }
 0xfed   :  { %v1498_v13 = vpop.xlane.xlu0 %1497 }
 0xfee   :  { %v1502_v14 = vsub.f32 %v1488_v9, %v1498_v13 }
 0xff0   :  { %v1504_v15 = vmul.f32 1.442695, %v1502_v14 }
 0xff1   :  { %v1501_v16 = vpop.xlane.xlu0 %1500 }
 0xff2   :  { %6457 = vpow2.f32 %v1504_v15  ;;  %v1503_v17 = vsub.f32 %v1493_v10, %v1501_v16 }
 0xff4   :  { %v1506_v6 = vmul.f32 1.442695, %v1503_v17 }
 0xff6   :  { %6459 = vpow2.f32 %v1506_v6 }
 0xffc   :  { %v6458_v18 = vpop.eup %6457 }
 0xffd   :  { %v1508_v19 = vsel %vm166_vm0, %v6458_v18, 0.0 }
 0xffe   :  { %1509 = vadd.xlane.f32.xlu0 %v1508_v19 }
0x1000   :  { %v6460_v20 = vpop.eup %6459 }
0x1001   :  { %v1511_v21 = vsel %vm166_vm0, %v6460_v20, 0.0 }
0x1002   :  { %1512 = vadd.xlane.f32.xlu1 %v1511_v21 }
0x1013   :  { %6233 = vrot.lane.b32.xlu1 %v7050_v42, %s6780_s8 }
0x1014   :  { %6228 = vrot.lane.b32.xlu0 %v7046_v40, %s6780_s8 }
0x1017   :  { %6238 = vrot.lane.b32.xlu1 %v7046_v40, %s6783_s3 }
0x1018   :  { %1611 = vrot.lane.b32.xlu0 %v7236_v4, %s6783_s3 }
0x101b   :  { %6243 = vrot.lane.b32.xlu1 %v7050_v42, %s6783_s3 }
0x101f   :  { %1613 = vrot.lane.b32.xlu1 %v7234_v3, %s6783_s3 }
0x108b   :  { %v1510_v22 = vpop.xlane.xlu0 %1509 }
0x108c   :  { %6461 = vrcp.f32 %v1510_v22 }
0x108f   :  { %v1513_v25 = vpop.xlane.xlu1 %1512  ;;  %v6229_v26 = vpop.permute.xlu0 %6228 }
0x1090   :  { %6463 = vrcp.f32 %v1513_v25  ;;  %v6231_v27 = vunpack.i.h.bf16 %v6229_v26  ;;  %v6230_v44 = vunpack.i.l.bf16 %v6229_v26 }
0x1092   :  { %v5886_v28 = vpack.c.bf16 %v6231_v27, %v6230_v44 }
0x1093   :  { %v6234_v43 = vpop.permute.xlu1 %6233  ;;  %v1612_v47 = vpop.permute.xlu0 %1611 }
0x1094   :  { %v6236_v29 = vunpack.i.h.bf16 %v6234_v43  ;;  %v6235_v30 = vunpack.i.l.bf16 %v6234_v43  ;;  %5887 = vmatprep.subr.bf16.mxu1 %v5886_v28 }
0x1095   :  { %5889 = vmatpush3.bf16.msra.mxu1 %v5886_v28 }
0x1096   :  { %v6462_v31 = vpop.eup %6461  ;;  %v5890_v32 = vpack.c.bf16 %v6236_v29, %v6235_v30 }
0x1097   :  { %v6239_v33 = vpop.permute.xlu1 %6238  ;;  %v1516_v34 = vmul.f32 %v6462_v31, %v6458_v18 }
0x1098   :  { %v6241_v35 = vunpack.i.h.bf16 %v6239_v33  ;;  %v6240_v23 = vunpack.i.l.bf16 %v6239_v33  ;;  %5891 = vmatprep.subr.bf16.mxu1 %v5890_v32 }
0x1099   :  { %5893 = vmatpush3.bf16.msra.mxu1 %v5890_v32  ;;  %5474 = vmatprep.mubr.msk.f32.mxu1 %vm166_vm0, %v1516_v34 }
0x109a   :  { %v6464_v36 = vpop.eup %6463  ;;  %v5894_v38 = vpack.c.bf16 %v6241_v35, %v6240_v23 }
0x109b   :  { %v6244_v39 = vpop.permute.xlu1 %6243  ;;  %v1517_v46 = vmul.f32 %v6464_v36, %v6460_v20 }
0x109c   :  { %5896 = vmatprep.subr.msk.bf16.mxu1 %vm7066_vm2, %v5894_v38  ;;  %v6246_v41 = vunpack.i.h.bf16 %v6244_v39  ;;  %v6245_v48 = vunpack.i.l.bf16 %v6244_v39 }
0x109d   :  { %5475 = vmatmul.mubr.msk.f32.vlgmr.msra.gmra.mrb[16].mxu1 %vm166_vm0, %v1517_v46 }
0x109e   :  { %5485 = vmatprep.mubr.msk.f32.mxu1 %vm381_vm1, %v1612_v47  ;;  %v5900_v1 = vpack.c.bf16 %v6246_v41, %v6245_v48 }
0x109f   :  { %v1614_v50 = vpop.permute.xlu1 %1613 }
0x10a2   :  { %5899 = vmatpush3.bf16.xpose.msk.msra.mxu1 %vm7066_vm2, %v5894_v38 }
0x10a3   :  { %5902 = vmatprep.subr.msk.bf16.mxu1 %vm7066_vm2, %v5900_v1 }
0x10aa   :  { %5905 = vmatpush3.bf16.xpose.msk.msra.mxu1 %vm7066_vm2, %v5900_v1 }
0x10b1   :  { %5486 = vmatmul.mubr.msk.f32.vlgmr.msra.gmra.mrb[18].mxu1 %vm381_vm1, %v1614_v50 }
0x1170   :  { %v7276_v51 = vpop.f32.mrb[16].mxu1 }
0x1171   :  { %v7278_v52 = vpop.f32.mrb[17].mxu1 }
0x1184   :  { %v5487_v0 = vpop.f32.mrb[18].mxu1 }
0x1185   :  { %v1707_v53 = vadd.f32 %v5487_v0, %v7244_v45  ;;  %v1701_v54 = vpop.f32.mrb[19].mxu1 }
0x1186   :  { %v1702_v55 = vadd.f32 %v1701_v54, %v7242_v7 }
0x1187   :  { %v1713_v56 = vsel %vm166_vm0, %v1707_v53, -inf }
0x1188   :  { %1714 = vmax.xlane.f32.xlu1 %v1713_v56  ;;  %v1710_v57 = vsel %vm166_vm0, %v1702_v55, -inf }
0x1189   :  { %1711 = vmax.xlane.f32.xlu0 %v1710_v57 }
0x1199   :  { %6253 = vrot.lane.b32.xlu1 %v7050_v42, %s6781_s30 }
0x119d   :  { %6258 = vrot.lane.b32.xlu1 %v7046_v40, %s6785_s23 }
0x11a1   :  { %6263 = vrot.lane.b32.xlu1 %v7050_v42, %s6785_s23 }
0x11a5   :  { %1827 = vrot.lane.b32.xlu1 %v7234_v3, %s6785_s23 }
0x1215   :  { %v1715_v58 = vpop.xlane.xlu1 %1714 }
0x1216   :  { %v1717_v59 = vsub.f32 %v1707_v53, %v1715_v58  ;;  %v1712_v60 = vpop.xlane.xlu0 %1711 }
0x1217   :  { %v1716_v61 = vsub.f32 %v1702_v55, %v1712_v60 }
0x1218   :  { %v1720_v62 = vmul.f32 1.442695, %v1717_v59 }
0x1219   :  { %v1718_v63 = vmul.f32 1.442695, %v1716_v61  ;;  %v6254_v11 = vpop.permute.xlu1 %6253 }
0x121a   :  { %6465 = vpow2.f32 %v1720_v62  ;;  %v6256_v14 = vunpack.i.h.bf16 %v6254_v11  ;;  %v6255_v15 = vunpack.i.l.bf16 %v6254_v11 }
0x121b   :  { %6467 = vpow2.f32 %v1718_v63 }
0x121c   :  { %v5910_v21 = vpack.c.bf16 %v6256_v14, %v6255_v15 }
0x121d   :  { %v6259_v6 = vpop.permute.xlu1 %6258 }
0x121e   :  { %v6261_v19 = vunpack.i.h.bf16 %v6259_v6  ;;  %v6260_v20 = vunpack.i.l.bf16 %v6259_v6 }
0x1220   :  { %v5914_v27 = vpack.c.bf16 %v6261_v19, %v6260_v20 }
0x1221   :  { %v6264_v44 = vpop.permute.xlu1 %6263 }
0x1222   :  { %v6266_v29 = vunpack.i.h.bf16 %v6264_v44  ;;  %v6265_v30 = vunpack.i.l.bf16 %v6264_v44 }
0x1224   :  { %v6466_v2 = vpop.eup %6465  ;;  %v5920_v31 = vpack.c.bf16 %v6266_v29, %v6265_v30 }
0x1225   :  { %v1725_v8 = vsel %vm166_vm0, %v6466_v2, 0.0  ;;  %v6468_v5 = vpop.eup %6467  ;;  %v1828_v32 = vpop.permute.xlu1 %1827 }
0x1226   :  { %1726 = vadd.xlane.f32.xlu0 %v1725_v8  ;;  %v1722_v9 = vsel %vm166_vm0, %v6468_v5, 0.0 }
0x122a   :  { %1723 = vadd.xlane.f32.xlu0 %v1722_v9 }
0x1240   :  { %6248 = vrot.lane.b32.xlu0 %v7046_v40, %s6781_s30 }
0x1244   :  { %1825 = vrot.lane.b32.xlu0 %v7236_v4, %s6785_s23 }
0x12b3   :  { %v1727_v10 = vpop.xlane.xlu0 %1726 }
0x12b7   :  { %v1724_v12 = vpop.xlane.xlu0 %1723 }
0x12b8   :  { %6469 = vrcp.f32 %v1724_v12 }
0x12b9   :  { %6471 = vrcp.f32 %v1727_v10 }
0x12bb   :  { %v6249_v13 = vpop.permute.xlu0 %6248 }
0x12bc   :  { %v6251_v16 = vunpack.i.h.bf16 %v6249_v13  ;;  %v6250_v17 = vunpack.i.l.bf16 %v6249_v13 }
0x12be   :  { %v5906_v18 = vpack.c.bf16 %v6251_v16, %v6250_v17 }
0x12bf   :  { %v1826_v43 = vpop.permute.xlu0 %1825 }
0x12c0   :  { %5907 = vmatprep.subr.bf16.mxu0 %v5906_v18 }
0x12c1   :  { %5909 = vmatpush3.bf16.msra.mxu0 %v5906_v18 }
0x12c2   :  { %v6470_v22 = vpop.eup %6469  ;;  %5911 = vmatprep.subr.bf16.mxu0 %v5910_v21 }
0x12c3   :  { %v6472_v25 = vpop.eup %6471  ;;  %v1730_v26 = vmul.f32 %v6470_v22, %v6468_v5 }
0x12c4   :  { %v1731_v28 = vmul.f32 %v6472_v25, %v6466_v2 }
0x12c5   :  { %5913 = vmatpush3.bf16.msra.mxu0 %v5910_v21  ;;  %5496 = vmatprep.mubr.msk.f32.mxu0 %vm166_vm0, %v1730_v26 }
0x12c6   :  { %5916 = vmatprep.subr.msk.bf16.mxu0 %vm7066_vm2, %v5914_v27 }
0x12c8   :  { %5497 = vmatmul.mubr.msk.f32.vlgmr.msra.gmra.mrb[12].mxu0 %vm166_vm0, %v1731_v28 }
0x12c9   :  { %5507 = vmatprep.mubr.msk.f32.mxu0 %vm381_vm1, %v1826_v43 }
0x12ce   :  { %5919 = vmatpush3.bf16.xpose.msk.msra.mxu0 %vm7066_vm2, %v5914_v27 }
0x12cf   :  { %5922 = vmatprep.subr.msk.bf16.mxu0 %vm7066_vm2, %v5920_v31 }
0x12d6   :  { %5925 = vmatpush3.bf16.xpose.msk.msra.mxu0 %vm7066_vm2, %v5920_v31 }
0x12dd   :  { %5508 = vmatmul.mubr.msk.f32.vlgmr.msra.gmra.mrb[14].mxu0 %vm381_vm1, %v1828_v32 }
0x139b   :  { %v7310_v33 = vpop.f32.mrb[12].mxu0 }
0x139c   :  { %v7312_v34 = vpop.f32.mrb[13].mxu0 }
0x13b0   :  { %v5509_v35 = vpop.f32.mrb[14].mxu0 }
0x13b1   :  { %v1921_v23 = vadd.f32 %v5509_v35, %v7244_v45  ;;  %v1915_v36 = vpop.f32.mrb[15].mxu0 }
0x13b2   :  { %v1916_v38 = vadd.f32 %v1915_v36, %v7242_v7 }
0x13b3   :  { %v1927_v39 = vsel %vm166_vm0, %v1921_v23, -inf }
0x13b4   :  { %1928 = vmax.xlane.f32.xlu1 %v1927_v39  ;;  %v1924_v46 = vsel %vm166_vm0, %v1916_v38, -inf }
0x13b5   :  { %1925 = vmax.xlane.f32.xlu0 %v1924_v46 }
0x13c5   :  { %6273 = vrot.lane.b32.xlu1 %v7050_v42, %s6784_s0 }
0x13c9   :  { %6278 = vrot.lane.b32.xlu1 %v7046_v40, %s6788_s17 }
0x13cd   :  { %6283 = vrot.lane.b32.xlu1 %v7050_v42, %s6788_s17 }
0x13d1   :  { %2041 = vrot.lane.b32.xlu1 %v7234_v3, %s6788_s17 }
0x1441   :  { %v1929_v47 = vpop.xlane.xlu1 %1928 }
0x1442   :  { %v1931_v41 = vsub.f32 %v1921_v23, %v1929_v47  ;;  %v1926_v48 = vpop.xlane.xlu0 %1925 }
0x1443   :  { %v1930_v1 = vsub.f32 %v1916_v38, %v1926_v48 }
0x1444   :  { %v1934_v50 = vmul.f32 1.442695, %v1931_v41 }
0x1445   :  { %v1932_v0 = vmul.f32 1.442695, %v1930_v1  ;;  %v6274_v57 = vpop.permute.xlu1 %6273 }
0x1446   :  { %6473 = vpow2.f32 %v1934_v50  ;;  %v6276_v60 = vunpack.i.h.bf16 %v6274_v57  ;;  %v6275_v61 = vunpack.i.l.bf16 %v6274_v57  ;;  %v2285_v57 = vld [vmem:[#allocation11 + $0x10] sm:$0xff] }
0x1447   :  { %6475 = vpow2.f32 %v1932_v0 }
0x1448   :  { %v5930_v10 = vpack.c.bf16 %v6276_v60, %v6275_v61 }
0x1449   :  { %v6279_v2 = vpop.permute.xlu1 %6278 }
0x144a   :  { %v6281_v5 = vunpack.i.h.bf16 %v6279_v2  ;;  %v6280_v9 = vunpack.i.l.bf16 %v6279_v2 }
0x144c   :  { %v5934_v13 = vpack.c.bf16 %v6281_v5, %v6280_v9 }
0x144d   :  { %v6284_v14 = vpop.permute.xlu1 %6283 }
0x144e   :  { %v6286_v17 = vunpack.i.h.bf16 %v6284_v14  ;;  %v6285_v6 = vunpack.i.l.bf16 %v6284_v14 }
0x1450   :  { %v6474_v53 = vpop.eup %6473  ;;  %v5940_v18 = vpack.c.bf16 %v6286_v17, %v6285_v6 }
0x1451   :  { %v1939_v54 = vsel %vm166_vm0, %v6474_v53, 0.0  ;;  %v6476_v55 = vpop.eup %6475  ;;  %v2042_v19 = vpop.permute.xlu1 %2041 }
0x1452   :  { %1940 = vadd.xlane.f32.xlu0 %v1939_v54  ;;  %v1936_v56 = vsel %vm166_vm0, %v6476_v55, 0.0 }
0x1456   :  { %1937 = vadd.xlane.f32.xlu0 %v1936_v56  ;;  %v2283_v56 = vld [vmem:[#allocation11] sm:$0xff] }
0x146c   :  { %6268 = vrot.lane.b32.xlu0 %v7046_v40, %s6784_s0 }
0x1470   :  { %2039 = vrot.lane.b32.xlu0 %v7236_v4, %s6788_s17 }
0x14df   :  { %v1941_v3 = vpop.xlane.xlu0 %1940 }
0x14e3   :  { %v1938_v58 = vpop.xlane.xlu0 %1937 }
0x14e4   :  { %6477 = vrcp.f32 %v1938_v58 }
0x14e5   :  { %6479 = vrcp.f32 %v1941_v3  ;;  %v2284_v3 = vld [vmem:[#allocation11 + $0x8] sm:$0xff] }
0x14e6   :  { %v5954_v58 = vpack.c.bf16 %v2284_v3, %v2283_v56 }
0x14e7   :  { %v6269_v59 = vpop.permute.xlu0 %6268 }
0x14e8   :  { %v6271_v62 = vunpack.i.h.bf16 %v6269_v59  ;;  %v6270_v63 = vunpack.i.l.bf16 %v6269_v59  ;;  %v2286_v59 = vld [vmem:[#allocation11 + $0x18] sm:$0xff] }
0x14e9   :  { %v5958_v60 = vpack.c.bf16 %v2286_v59, %v2285_v57 }
0x14ea   :  { %v5926_v8 = vpack.c.bf16 %v6271_v62, %v6270_v63 }
0x14eb   :  { %v2040_v16 = vpop.permute.xlu0 %2039 }
0x14ec   :  { %5927 = vmatprep.subr.bf16.mxu1 %v5926_v8 }
0x14ed   :  { %5929 = vmatpush3.bf16.msra.mxu1 %v5926_v8 }
0x14ee   :  { %v6478_v11 = vpop.eup %6477  ;;  %5931 = vmatprep.subr.bf16.mxu1 %v5930_v10 }
0x14ef   :  { %v6480_v4 = vpop.eup %6479  ;;  %v1944_v12 = vmul.f32 %v6478_v11, %v6476_v55 }
0x14f0   :  { %v1945_v15 = vmul.f32 %v6480_v4, %v6474_v53 }
0x14f1   :  { %5933 = vmatpush3.bf16.msra.mxu1 %v5930_v10  ;;  %5518 = vmatprep.mubr.msk.f32.mxu1 %vm166_vm0, %v1944_v12 }
0x14f2   :  { %5936 = vmatprep.subr.msk.bf16.mxu1 %vm7066_vm2, %v5934_v13 }
0x14f4   :  { %5519 = vmatmul.mubr.msk.f32.vlgmr.msra.gmra.mrb[20].mxu1 %vm166_vm0, %v1945_v15 }
0x14f5   :  { %5529 = vmatprep.mubr.msk.f32.mxu1 %vm381_vm1, %v2040_v16 }
0x14fa   :  { %5939 = vmatpush3.bf16.xpose.msk.msra.mxu1 %vm7066_vm2, %v5934_v13 }
0x14fb   :  { %5942 = vmatprep.subr.msk.bf16.mxu1 %vm7066_vm2, %v5940_v18 }
0x1502   :  { %5945 = vmatpush3.bf16.xpose.msk.msra.mxu1 %vm7066_vm2, %v5940_v18 }
0x1509   :  { %5530 = vmatmul.mubr.msk.f32.vlgmr.msra.gmra.mrb[22].mxu1 %vm381_vm1, %v2042_v19 }
0x15c7   :  { %v5520_v20 = vpop.f32.mrb[20].mxu1 }
0x15c8   :  { %v2030_v21 = vpop.f32.mrb[21].mxu1 }
0x15dc   :  { %v5531_v22 = vpop.f32.mrb[22].mxu1 }
0x15dd   :  { %v2135_v25 = vadd.f32 %v5531_v22, %v7244_v45  ;;  %v2129_v26 = vpop.f32.mrb[23].mxu1  ;;  %v2396_v22 = vld [vmem:[#allocation13 + $0x8] sm:$0xff] }
0x15de   :  { %v2130_v27 = vadd.f32 %v2129_v26, %v7242_v7  ;;  %v2398_v26 = vld [vmem:[#allocation13 + $0x18] sm:$0xff] }
0x15df   :  { %v2141_v44 = vsel %vm166_vm0, %v2135_v25, -inf }
0x15e0   :  { %2142 = vmax.xlane.f32.xlu1 %v2141_v44  ;;  %v2138_v28 = vsel %vm166_vm0, %v2130_v27, -inf  ;;  %v2483_v44 = vld [vmem:[%s7846_s13 + $0x8] sm:$0xff] }
0x15e1   :  { %2139 = vmax.xlane.f32.xlu0 %v2138_v28  ;;  %v2484_v28 = vld [vmem:[%s7846_s13 + $0x10] sm:$0xff] }
0x15f1   :  { %6293 = vrot.lane.b32.xlu1 %v7050_v42, %s6789_s12 }
0x15f5   :  { %2255 = vrot.lane.b32.xlu1 %v7312_v34, %s7857_s21 }
0x15f9   :  { %2257 = vrot.lane.b32.xlu1 %v7310_v33, %s7857_s21 }
0x15fd   :  { %2265 = vrot.lane.b32.xlu1 %v5520_v20, %s7855_s1 }
0x166d   :  { %v2143_v45 = vpop.xlane.xlu1 %2142 }
0x166e   :  { %v2145_v43 = vsub.f32 %v2135_v25, %v2143_v45  ;;  %v2140_v7 = vpop.xlane.xlu0 %2139 }
0x166f   :  { %v2144_v29 = vsub.f32 %v2130_v27, %v2140_v7 }
0x1670   :  { %v2148_v30 = vmul.f32 1.442695, %v2145_v43  ;;  %v2485_v43 = vld [vmem:[%s7846_s13 + $0x18] sm:$0xff] }
0x1671   :  { %v2146_v31 = vmul.f32 1.442695, %v2144_v29  ;;  %v6294_v38 = vpop.permute.xlu1 %6293  ;;  %v5974_v7 = vpack.c.bf16 %v2485_v43, %v2484_v28  ;;  %v2486_v29 = vld [vmem:[%s7846_s13 + $0x20] sm:$0xff] }
0x1672   :  { %6481 = vpow2.f32 %v2148_v30  ;;  %v6296_v46 = vunpack.i.h.bf16 %v6294_v38  ;;  %v6295_v47 = vunpack.i.l.bf16 %v6294_v38  ;;  %v2487_v30 = vld [vmem:[%s7846_s13 + $0x28] sm:$0xff] }
0x1673   :  { %6483 = vpow2.f32 %v2146_v31  ;;  %v5978_v31 = vpack.c.bf16 %v2487_v30, %v2486_v29 }
0x1674   :  { %v5950_v50 = vpack.c.bf16 %v6296_v46, %v6295_v47  ;;  %v5009_v46 = vld [vmem:[%s7844_s11] ss:$0 sm:$0xff] }
0x1675   :  { %v2256_v63 = vpop.permute.xlu1 %2255 }
0x1676   :  { %v2277_v9 = vsel %vm381_vm1, %v7278_v52, %v2256_v63 }
0x1679   :  { %v2258_v2 = vpop.permute.xlu1 %2257 }
0x167a   :  { %v2278_v11 = vsel %vm381_vm1, %v7276_v51, %v2258_v2 }
0x167c   :  { %v6482_v32 = vpop.eup %6481 }
0x167d   :  { %v2153_v35 = vsel %vm166_vm0, %v6482_v32, 0.0  ;;  %v6484_v23 = vpop.eup %6483  ;;  %v2266_v8 = vpop.permute.xlu1 %2265 }
0x167e   :  { %2154 = vadd.xlane.f32.xlu0 %v2153_v35  ;;  %v2150_v34 = vsel %vm166_vm0, %v6484_v23, 0.0  ;;  %v2280_v13 = vsel %vm465_vm3, %v2278_v11, %v2266_v8  ;;  %v5016_v8 = vld [vmem:[%s7838_s5 + $0x20] sm:$0xff]  ;;  %v5019_v11 = vld [vmem:[%s7838_s5 + $0x38] sm:$0xff] }
0x1682   :  { %2151 = vadd.xlane.f32.xlu0 %v2150_v34 }
0x1698   :  { %6288 = vrot.lane.b32.xlu0 %v7046_v40, %s6789_s12 }
0x169c   :  { %2263 = vrot.lane.b32.xlu0 %v2030_v21, %s7855_s1  ;;  %v2395_v21 = vld [vmem:[#allocation13] sm:$0xff] }
0x169d   :  { %v5962_v25 = vpack.c.bf16 %v2396_v22, %v2395_v21 }
0x169f   :  { %5963 = vmatprep.subr.bf16.mxu1 %v5962_v25 }
0x16a0   :  { %5965 = vmatpush3.bf16.msra.mxu1 %v5962_v25 }
0x170b   :  { %v2155_v33 = vpop.xlane.xlu0 %2154 }
0x170f   :  { %v2152_v36 = vpop.xlane.xlu0 %2151 }
0x1710   :  { %6485 = vrcp.f32 %v2152_v36 }
0x1711   :  { %6487 = vrcp.f32 %v2155_v33 }
0x1713   :  { %v6289_v39 = vpop.permute.xlu0 %6288 }
0x1714   :  { %v6291_v41 = vunpack.i.h.bf16 %v6289_v39  ;;  %v6290_v48 = vunpack.i.l.bf16 %v6289_v39 }
0x1716   :  { %v5946_v1 = vpack.c.bf16 %v6291_v41, %v6290_v48 }
0x1717   :  { %v2264_v5 = vpop.permute.xlu0 %2263 }
0x1718   :  { %5947 = vmatprep.subr.bf16.mxu0 %v5946_v1  ;;  %v2279_v4 = vsel %vm465_vm3, %v2277_v9, %v2264_v5  ;;  %v5017_v5 = vld [vmem:[%s7838_s5 + $0x28] sm:$0xff]  ;;  %v5018_v9 = vld [vmem:[%s7838_s5 + $0x30] sm:$0xff] }
0x1719   :  { %5949 = vmatpush3.bf16.msra.mxu0 %v5946_v1 }
0x171a   :  { %v6486_v0 = vpop.eup %6485  ;;  %5951 = vmatprep.subr.bf16.mxu0 %v5950_v50 }
0x171b   :  { %v6488_v53 = vpop.eup %6487  ;;  %v2158_v54 = vmul.f32 %v6486_v0, %v6484_v23  ;;  %v2489_v0 = vld [vmem:[%s7846_s13 + $0x38] sm:$0xff] }
0x171c   :  { %v2159_v55 = vmul.f32 %v6488_v53, %v6482_v32 }
0x171d   :  { %5953 = vmatpush3.bf16.msra.mxu0 %v5950_v50  ;;  %5540 = vmatprep.mubr.msk.f32.mxu0 %vm166_vm0, %v2158_v54  ;;  %v2488_v50 = vld [vmem:[%s7846_s13 + $0x30] sm:$0xff] }
0x171e   :  { %5955 = vmatprep.subr.bf16.mxu0 %v5954_v58  ;;  %v5982_v53 = vpack.c.bf16 %v2489_v0, %v2488_v50 }
0x1720   :  { %5541 = vmatmul.mubr.msk.f32.vlgmr.msra.gmra.mrb[16].mxu0 %vm166_vm0, %v2159_v55 }
0x1721   :  { %5957 = vmatpush3.bf16.msra.mxu0 %v5954_v58 }
0x1722   :  { %5959 = vmatprep.subr.bf16.mxu0 %v5958_v60 }
0x1725   :  { %5961 = vmatpush3.bf16.msra.mxu0 %v5958_v60 }
0x17f3   :  { %v5542_v61 = vpop.f32.mrb[16].mxu0 }
0x17f4   :  { %2273 = vrot.lane.b32.xlu1 %v5542_v61, %s7853_s24  ;;  %v2244_v62 = vpop.f32.mrb[17].mxu0 }
0x17f5   :  { %2271 = vrot.lane.b32.xlu0 %v2244_v62, %s7853_s24 }
0x1866   :  { %v2274_v10 = vpop.permute.xlu1 %2273 }
0x1867   :  { %v2272_v12 = vpop.permute.xlu0 %2271  ;;  %v2282_v15 = vsel %vm1203_vm4, %v2280_v13, %v2274_v10  ;;  %v5986_v10 = vpack.c.bf16 %v5017_v5, %v5016_v8 }
0x1868   :  { %v2281_v14 = vsel %vm1203_vm4, %v2279_v4, %v2272_v12  ;;  %v5990_v4 = vpack.c.bf16 %v5019_v11, %v5018_v9 }
0x1869   :  { %5551 = vmatprep.mubr.msk.f32.mxu0 %vm166_vm0, %v2281_v14 }
0x186a   :  { %5552 = vmatmul.mubr.msk.f32.vlgmr.msra.gmra.mrb[18].mxu0 %vm166_vm0, %v2282_v15 }
0x193d   :  { %v5553_v16 = vpop.f32.mrb[18].mxu0 }
0x193e   :  { %v7375_v52 = vadd.f32 %v5553_v16, %v7219_v24  ;;  %v2359_v17 = vpop.f32.mrb[19].mxu0  ;;  %v2397_v24 = vld [vmem:[#allocation13 + $0x10] sm:$0xff] }
0x193f   :  { %v7378_v51 = vadd.f32 %v2359_v17, %v7222_v37  ;;  %v5966_v27 = vpack.c.bf16 %v2398_v26, %v2397_v24  ;;  %v2482_v37 = vld [vmem:[%s7846_s13] sm:$0xff] }
0x1940   :  { %v2372_v6 = vmul.f32 %v7375_v52, %v7375_v52  ;;  %v5970_v45 = vpack.c.bf16 %v2483_v44, %v2482_v37 }
0x1941   :  { %v2371_v18 = vmul.f32 %v7378_v51, %v7378_v51  ;;  %5967 = vmatprep.subr.bf16.mxu1 %v5966_v27 }
0x1942   :  { %v2376_v19 = vsel %vm166_vm0, %v2372_v6, 0.0  ;;  %5969 = vmatpush3.bf16.msra.mxu1 %v5966_v27  ;;  %5971 = vmatprep.subr.bf16.mxu0 %v5970_v45 }
0x1943   :  { %2377 = vadd.xlane.f32.xlu1 %v2376_v19  ;;  %v2373_v20 = vsel %vm166_vm0, %v2371_v18, 0.0  ;;  %5973 = vmatpush3.bf16.msra.mxu0 %v5970_v45 }
0x1944   :  { %2374 = vadd.xlane.f32.xlu0 %v2373_v20  ;;  %5975 = vmatprep.subr.bf16.mxu0 %v5974_v7 }
0x1945   :  { %5987 = vmatprep.subr.bf16.mxu1 %v5986_v10 }
0x1947   :  { %5977 = vmatpush3.bf16.msra.mxu0 %v5974_v7 }
0x1948   :  { %5979 = vmatprep.subr.bf16.mxu0 %v5978_v31 }
0x194b   :  { %5981 = vmatpush3.bf16.msra.mxu0 %v5978_v31 }
0x194c   :  { %5983 = vmatprep.subr.bf16.mxu0 %v5982_v53 }
0x194f   :  { %5985 = vmatpush3.bf16.msra.mxu0 %v5982_v53 }
0x19d0   :  { %v2378_v32 = vpop.xlane.xlu1 %2377 }
0x19d1   :  { %v2380_v35 = vmul.f32 0.03125, %v2378_v32  ;;  %v2375_v23 = vpop.xlane.xlu0 %2374  ;;  %v6573_v32 = vld [vmem:[%s7835_s2 + $0x8] sm:$0xff] }
0x19d2   :  { %v2379_v34 = vmul.f32 0.03125, %v2375_v23 }
0x19d3   :  { %v2382_v33 = vadd.f32 1e-06, %v2380_v35 }
0x19d4   :  { %v2381_v36 = vadd.f32 1e-06, %v2379_v34  ;;  %v6574_v34 = vld [vmem:[%s7835_s2] sm:$0xff] }
0x19d5   :  { %6489 = vrsqrt.f32 %v2382_v33 }
0x19d6   :  { %6491 = vrsqrt.f32 %v2381_v36 }
0x19df   :  { %v6490_v38 = vpop.eup %6489 }
0x19e0   :  { %v6492_v39 = vpop.eup %6491  ;;  %v2386_v47 = vmul.f32 %v6490_v38, %v7375_v52 }
0x19e1   :  { %v2385_v41 = vmul.f32 %v6492_v39, %v7378_v51 }
0x19e2   :  { %v2394_v1 = vmul.f32 %v5009_v46, %v2386_v47  ;;  %v6575_v47 = vld [vmem:[%s7835_s2 + $0x10] sm:$0xff] }
0x19e3   :  { %v2393_v48 = vmul.f32 %v5009_v46, %v2385_v41 }
0x19e5   :  { %5562 = vmatprep.mubr.msk.f32.mxu1 %vm166_vm0, %v2393_v48  ;;  %v6576_v48 = vld [vmem:[%s7835_s2 + $0x18] sm:$0xff] }
0x19e6   :  { %5563 = vmatmul.mubr.msk.f32.vlgmr.msra.gmra.mrb[24].mxu1 %vm166_vm0, %v2394_v1 }
0x19e7   :  { %5989 = vmatpush3.bf16.msra.mxu1 %v5986_v10 }
0x19e8   :  { %5991 = vmatprep.subr.bf16.mxu1 %v5990_v4 }
0x19eb   :  { %5993 = vmatpush3.bf16.msra.mxu1 %v5990_v4 }
0x1ab9   :  { %v5564_v54 = vpop.f32.mrb[24].mxu1 }
0x1aba   :  { %v2471_v55 = vpop.f32.mrb[25].mxu1  ;;  %v2481_v3 = vmax.f32 %v5564_v54, 0.0 }
0x1abb   :  { %v2480_v56 = vmax.f32 %v2471_v55, 0.0 }
0x1abd   :  { %5581 = vmatprep.mubr.msk.f32.mxu0 %vm2490_vm5, %v2480_v56 }
0x1abe   :  { %5582 = vmatmul.mubr.msk.f32.vlgmr.msra.gmra.mrb[20].mxu0 %vm2490_vm5, %v2481_v3 }
0x1b91   :  { %v5583_v57 = vpop.f32.mrb[20].mxu0 }
0x1b92   :  { %v2563_v58 = vpop.f32.mrb[21].mxu0  ;;  %v7420_v59 = vadd.f32 %v5583_v57, %v7375_v52 }
0x1b93   :  { %v7423_v60 = vadd.f32 %v2563_v58, %v7378_v51  ;;  %v5015_v51 = vld [vmem:[%s7837_s4 + $0x1] ss:$0 sm:$0xff]  ;;  %s7861_s4 = smov 16  }
0x1b94   :  { %v2577_v63 = vmul.f32 %v7420_v59, %v7420_v59 }
0x1b95   :  { %v2576_v61 = vmul.f32 %v7423_v60, %v7423_v60 }
0x1b96   :  { %v2581_v2 = vsel %vm166_vm0, %v2577_v63, 0.0 }
0x1b97   :  { %v2578_v62 = vsel %vm166_vm0, %v2576_v61, 0.0 }
0x1b98   :  { %2579 = vadd.xlane.f32.xlu0 %v2578_v62 }
0x1b9c   :  { %2582 = vadd.xlane.f32.xlu0 %v2581_v2 }
0x1c25   :  { %v2580_v12 = vpop.xlane.xlu0 %2579 }
0x1c26   :  { %v2584_v13 = vmul.f32 0.03125, %v2580_v12 }
0x1c28   :  { %v2586_v14 = vadd.f32 1e-06, %v2584_v13 }
0x1c29   :  { %v2583_v15 = vpop.xlane.xlu0 %2582 }
0x1c2a   :  { %6493 = vrsqrt.f32 %v2586_v14  ;;  %v2585_v16 = vmul.f32 0.03125, %v2583_v15 }
0x1c2c   :  { %v2587_v52 = vadd.f32 1e-06, %v2585_v16 }
0x1c2e   :  { %6495 = vrsqrt.f32 %v2587_v52 }
0x1c34   :  { %v6494_v17 = vpop.eup %6493 }
0x1c35   :  { %v2590_v6 = vmul.f32 %v6494_v17, %v7423_v60 }
0x1c37   :  { %v2598_v18 = vmul.f32 %v5015_v51, %v2590_v6 }
0x1c38   :  { %v6496_v19 = vpop.eup %6495 }
0x1c39   :  { %v2591_v20 = vmul.f32 %v6496_v19, %v7420_v59  ;;  %5592 = vmatprep.mubr.msk.f32.mxu1 %vm166_vm0, %v2598_v18 }
0x1c3b   :  { %v2599_v21 = vmul.f32 %v5015_v51, %v2591_v20 }
0x1c3d   :  { %5593 = vmatmul.mubr.msk.f32.vlgmr.msra.gmra.mrb[26].mxu1 %vm166_vm0, %v2599_v21 }
0x1d10   :  { %v7450_v22 = vpop.f32.mrb[26].mxu1 }
0x1d11   :  { %v7452_v24 = vpop.f32.mrb[27].mxu1 }
0x1d12   :  { %5599 = vmatprep.mubr.msk.f32.mxu1 %vm381_vm1, %v7452_v24  ;;  %v7458_v25 = vpack.i.bf16 %v7450_v22, %v7452_v24 }
0x1d14   :  { %6303 = vrot.lane.b32.xlu1 %v7458_v25, %s6781_s30  ;;  %6298 = vrot.lane.b32.xlu0 %v7458_v25, %s6780_s8  ;;  %s6793_s30 = smov [#allocation14]  }
0x1d15   :  { %s4924_s22 = sshll.u32 %s6793_s30, 4  ;;  %s4925_s22 = int_to_ptr.vmem [resolvable:$true] %s4924_s22 }
0x1d16   :  { %s6737_s7 = scalar_lea.vmem %s4925_s22, 256  ;;  %p6742_p1 = scmp.lt.s32.totalorder %s4925_s22, %s4925_s22 }
0x1d17   :  { %p6738_p0 = scmp.ne.s32.totalorder %s4925_s22, %s6737_s7  ;;  %p6743_p2 = scmp.lt.s32.totalorder %s6737_s7, %s6737_s7 }
0x1d18   :  { %2884 = vrot.lane.b32.xlu1 %v7452_v24, %s6783_s3 }
0x1d19   :  { %p6744_p3 = por %p6743_p2, %p6742_p1 }
0x1d1b   :  { %p6745_p4 = pnand %p6744_p3, %p6738_p0 }
0x1d1c   :  { %2886 = vrot.lane.b32.xlu1 %v7450_v22, %s6783_s3 }
0x1d86   :  { %v6304_v26 = vpop.permute.xlu1 %6303  ;;  %v6299_v27 = vpop.permute.xlu0 %6298 }
0x1d87   :  { %v6306_v37 = vunpack.i.h.bf16 %v6304_v26  ;;  %v6305_v44 = vunpack.i.l.bf16 %v6304_v26  ;;  %v6301_v28 = vunpack.i.h.bf16 %v6299_v27  ;;  %v6300_v45 = vunpack.i.l.bf16 %v6299_v27 }
0x1d89   :  { %v5994_v43 = vpack.c.bf16 %v6301_v28, %v6300_v45  ;;  %v6004_v7 = vpack.c.bf16 %v6306_v37, %v6305_v44 }
0x1d8a   :  { %v2885_v29 = vpop.permute.xlu1 %2884 }
0x1d8b   :  { %5996 = vmatprep.subr.msk.bf16.mxu1 %vm7066_vm2, %v5994_v43 }
0x1d8c   :  { %5999 = vmatpush3.bf16.xpose.msk.msra.mxu1 %vm7066_vm2, %v5994_v43 }
0x1d8d   :  { %6006 = vmatprep.subr.msk.bf16.mxu1 %vm7066_vm2, %v6004_v7 }
0x1d8e   :  { %v2887_v30 = vpop.permute.xlu1 %2886 }
0x1d93   :  { %5600 = vmatmul.mubr.msk.f32.vlgmr.msra.gmra.mrb[28].mxu1 %vm381_vm1, %v7450_v22 }
0x1d94   :  { %6009 = vmatpush3.bf16.xpose.msk.msra.mxu1 %vm7066_vm2, %v6004_v7  ;;  %5613 = vmatprep.mubr.msk.f32.mxu1 %vm381_vm1, %v2885_v29 }
0x1d9b   :  { %5614 = vmatmul.mubr.msk.f32.vlgmr.msra.gmra.mrb[30].mxu1 %vm381_vm1, %v2887_v30 }
0x1e66   :  { %v5601_v31 = vpop.f32.mrb[28].mxu1 }
0x1e67   :  { %v2772_v35 = vadd.f32 %v6573_v32, %v5601_v31  ;;  %v2766_v23 = vpop.f32.mrb[29].mxu1 }
0x1e68   :  { %v2767_v33 = vadd.f32 %v6574_v34, %v2766_v23 }
0x1e69   :  { %v2778_v36 = vsel %vm465_vm3, %v2772_v35, -inf }
0x1e6a   :  { %2779 = vmax.xlane.f32.xlu1 %v2778_v36  ;;  %v2775_v38 = vsel %vm465_vm3, %v2767_v33, -inf }
0x1e6b   :  { %2776 = vmax.xlane.f32.xlu0 %v2775_v38 }
0x1e6e   :  { %v5615_v39 = vpop.f32.mrb[30].mxu1 }
0x1e6f   :  { %v2966_v46 = vpop.f32.mrb[31].mxu1  ;;  %v2972_v1 = vadd.f32 %v6576_v48, %v5615_v39 }
0x1e70   :  { %v2967_v41 = vadd.f32 %v6575_v47, %v2966_v46 }
0x1e71   :  { %v2978_v0 = vsel %vm465_vm3, %v2972_v1, -inf }
0x1e72   :  { %v2975_v50 = vsel %vm465_vm3, %v2967_v41, -inf }
0x1e73   :  { %2976 = vmax.xlane.f32.xlu0 %v2975_v50  ;;  %v6578_v50 = vld [vmem:[%s7835_s2 + $0x20] sm:$0xff] }
0x1e77   :  { %2979 = vmax.xlane.f32.xlu0 %v2978_v0 }
0x1ef7   :  { %v2780_v53 = vpop.xlane.xlu1 %2779 }
0x1ef8   :  { %v2782_v54 = vsub.f32 %v2772_v35, %v2780_v53  ;;  %v2777_v55 = vpop.xlane.xlu0 %2776 }
0x1ef9   :  { %v2781_v56 = vsub.f32 %v2767_v33, %v2777_v55 }
0x1efa   :  { %v2785_v3 = vmul.f32 1.442695, %v2782_v54 }
0x1efb   :  { %v2783_v57 = vmul.f32 1.442695, %v2781_v56 }
0x1efc   :  { %6497 = vpow2.f32 %v2785_v3 }
0x1efd   :  { %6499 = vpow2.f32 %v2783_v57 }
0x1f00   :  { %v2977_v58 = vpop.xlane.xlu0 %2976 }
0x1f01   :  { %v2981_v61 = vsub.f32 %v2967_v41, %v2977_v58  ;;  %v6577_v41 = vld [vmem:[%s7835_s2 + $0x28] sm:$0xff] }
0x1f03   :  { %v2983_v62 = vmul.f32 1.442695, %v2981_v61 }
0x1f04   :  { %v2980_v63 = vpop.xlane.xlu0 %2979 }
0x1f05   :  { %6501 = vpow2.f32 %v2983_v62  ;;  %v2982_v2 = vsub.f32 %v2972_v1, %v2980_v63 }
0x1f06   :  { %v6498_v8 = vpop.eup %6497 }
0x1f07   :  { %v6500_v5 = vpop.eup %6499  ;;  %v2985_v9 = vmul.f32 1.442695, %v2982_v2  ;;  %v2790_v10 = vsel %vm465_vm3, %v6498_v8, 0.0 }
0x1f08   :  { %2791 = vadd.xlane.f32.xlu1 %v2790_v10  ;;  %v2787_v11 = vsel %vm465_vm3, %v6500_v5, 0.0 }
0x1f09   :  { %6503 = vpow2.f32 %v2985_v9  ;;  %2788 = vadd.xlane.f32.xlu0 %v2787_v11 }
0x1f0f   :  { %v6502_v4 = vpop.eup %6501 }
0x1f10   :  { %v2987_v12 = vsel %vm465_vm3, %v6502_v4, 0.0 }
0x1f11   :  { %2988 = vadd.xlane.f32.xlu0 %v2987_v12 }
0x1f13   :  { %v6504_v13 = vpop.eup %6503 }
0x1f14   :  { %v2990_v14 = vsel %vm465_vm3, %v6504_v13, 0.0 }
0x1f15   :  { %2991 = vadd.xlane.f32.xlu1 %v2990_v14 }
0x1f26   :  { %6313 = vrot.lane.b32.xlu1 %v7458_v25, %s6786_s27 }
0x1f27   :  { %6308 = vrot.lane.b32.xlu0 %v7458_v25, %s6782_s16 }
0x1f2a   :  { %6318 = vrot.lane.b32.xlu1 %v7458_v25, %s6784_s0  ;;  %s7862_s0 = smov 24  }
0x1f2b   :  { %3086 = vrot.lane.b32.xlu0 %v7450_v22, %s6785_s23 }
0x1f2e   :  { %3084 = vrot.lane.b32.xlu1 %v7452_v24, %s6785_s23 }
0x1f95   :  { %v2792_v16 = vpop.xlane.xlu1 %2791 }
0x1f96   :  { %v2789_v15 = vpop.xlane.xlu0 %2788 }
0x1f97   :  { %6505 = vrcp.f32 %v2789_v15 }
0x1f98   :  { %6507 = vrcp.f32 %v2792_v16 }
0x1f9e   :  { %v2989_v52 = vpop.xlane.xlu0 %2988 }
0x1f9f   :  { %6509 = vrcp.f32 %v2989_v52 }
0x1fa1   :  { %v6506_v17 = vpop.eup %6505 }
0x1fa2   :  { %v2992_v51 = vpop.xlane.xlu1 %2991  ;;  %v6309_v6 = vpop.permute.xlu0 %6308  ;;  %v2795_v18 = vmul.f32 %v6506_v17, %v6500_v5 }
0x1fa3   :  { %6511 = vrcp.f32 %v2992_v51  ;;  %v6311_v19 = vunpack.i.h.bf16 %v6309_v6  ;;  %v6310_v20 = vunpack.i.l.bf16 %v6309_v6  ;;  %v6508_v26 = vpop.eup %6507 }
0x1fa4   :  { %5606 = vmatprep.mubr.msk.f32.mxu0 %vm465_vm3, %v2795_v18  ;;  %v2796_v45 = vmul.f32 %v6508_v26, %v6498_v8 }
0x1fa5   :  { %v6000_v21 = vpack.c.bf16 %v6311_v19, %v6310_v20 }
0x1fa6   :  { %v6314_v27 = vpop.permute.xlu1 %6313  ;;  %v3087_v33 = vpop.permute.xlu0 %3086 }
0x1fa7   :  { %v6316_v37 = vunpack.i.h.bf16 %v6314_v27  ;;  %v6315_v44 = vunpack.i.l.bf16 %v6314_v27  ;;  %6001 = vmatprep.subr.bf16.mxu0 %v6000_v21 }
0x1fa8   :  { %6003 = vmatpush3.bf16.msra.mxu0 %v6000_v21  ;;  %v6579_v21 = vld [vmem:[%s7835_s2 + $0x38] sm:$0xff] }
0x1fa9   :  { %v6510_v28 = vpop.eup %6509  ;;  %v6010_v43 = vpack.c.bf16 %v6316_v37, %v6315_v44  ;;  %v6580_v37 = vld [vmem:[%s7835_s2 + $0x30] sm:$0xff] }
0x1faa   :  { %v6319_v7 = vpop.permute.xlu1 %6318  ;;  %v2995_v29 = vmul.f32 %v6510_v28, %v6502_v4 }
0x1fab   :  { %v6321_v30 = vunpack.i.h.bf16 %v6319_v7  ;;  %v6320_v31 = vunpack.i.l.bf16 %v6319_v7  ;;  %5607 = vmatmul.mubr.msk.f32.vlgmr.msra.gmra.mrb[22].mxu0 %vm465_vm3, %v2796_v45  ;;  %6011 = vmatprep.subr.bf16.mxu0 %v6010_v43 }
0x1fac   :  { %6013 = vmatpush3.bf16.msra.mxu0 %v6010_v43  ;;  %5620 = vmatprep.mubr.msk.f32.mxu0 %vm465_vm3, %v2995_v29 }
0x1fad   :  { %v6512_v32 = vpop.eup %6511  ;;  %v6014_v35 = vpack.c.bf16 %v6321_v30, %v6320_v31 }
0x1fae   :  { %v2996_v23 = vmul.f32 %v6512_v32, %v6504_v13  ;;  %v3085_v34 = vpop.permute.xlu1 %3084 }
0x1faf   :  { %6016 = vmatprep.subr.msk.bf16.mxu0 %vm7066_vm2, %v6014_v35 }
0x1fb0   :  { %5621 = vmatmul.mubr.msk.f32.vlgmr.msra.gmra.mrb[24].mxu0 %vm465_vm3, %v2996_v23 }
0x1fb1   :  { %5627 = vmatprep.mubr.msk.f32.mxu0 %vm381_vm1, %v3085_v34 }
0x1fb5   :  { %6019 = vmatpush3.bf16.xpose.msk.msra.mxu0 %vm7066_vm2, %v6014_v35 }
0x1fbc   :  { %5628 = vmatmul.mubr.msk.f32.vlgmr.msra.gmra.mrb[26].mxu0 %vm381_vm1, %v3087_v33 }
0x207e   :  { %v7520_v36 = vpop.f32.mrb[22].mxu0 }
0x207f   :  { %v7522_v38 = vpop.f32.mrb[23].mxu0 }
0x2083   :  { %v7524_v39 = vpop.f32.mrb[24].mxu0 }
0x2084   :  { %v7526_v46 = vpop.f32.mrb[25].mxu0 }
0x208f   :  { %v5629_v47 = vpop.f32.mrb[26].mxu0 }
0x2090   :  { %v3172_v48 = vadd.f32 %v6577_v41, %v5629_v47  ;;  %v3166_v1 = vpop.f32.mrb[27].mxu0 }
0x2091   :  { %v3167_v0 = vadd.f32 %v6578_v50, %v3166_v1 }
0x2092   :  { %v3178_v53 = vsel %vm465_vm3, %v3172_v48, -inf }
0x2093   :  { %3179 = vmax.xlane.f32.xlu0 %v3178_v53  ;;  %v3175_v54 = vsel %vm465_vm3, %v3167_v0, -inf }
0x2094   :  { %3176 = vmax.xlane.f32.xlu1 %v3175_v54 }
0x20a5   :  { %6323 = vrot.lane.b32.xlu1 %v7458_v25, %s6787_s29 }
0x20a9   :  { %3284 = vrot.lane.b32.xlu1 %v7452_v24, %s6788_s17 }
0x20ad   :  { %3286 = vrot.lane.b32.xlu1 %v7450_v22, %s6788_s17 }
0x2120   :  { %v3180_v55 = vpop.xlane.xlu0 %3179 }
0x2121   :  { %v3182_v56 = vsub.f32 %v3172_v48, %v3180_v55  ;;  %v3177_v3 = vpop.xlane.xlu1 %3176  ;;  %v5046_v55 = vld [vmem:[%s7839_s6 + $0x20] sm:$0xff] }
0x2122   :  { %v3181_v57 = vsub.f32 %v3167_v0, %v3177_v3 }
0x2123   :  { %v3185_v58 = vmul.f32 1.442695, %v3182_v56  ;;  %v5048_v56 = vld [vmem:[%s7839_s6 + $0x30] sm:$0xff] }
0x2124   :  { %v3183_v61 = vmul.f32 1.442695, %v3181_v57  ;;  %v5049_v57 = vld [vmem:[%s7839_s6 + $0x38] sm:$0xff] }
0x2125   :  { %6513 = vpow2.f32 %v3185_v58  ;;  %v6324_v62 = vpop.permute.xlu1 %6323  ;;  %v6038_v58 = vpack.c.bf16 %v5049_v57, %v5048_v56 }
0x2126   :  { %v6326_v63 = vunpack.i.h.bf16 %v6324_v62  ;;  %v6325_v2 = vunpack.i.l.bf16 %v6324_v62  ;;  %6515 = vpow2.f32 %v3183_v61 }
0x2128   :  { %v6020_v8 = vpack.c.bf16 %v6326_v63, %v6325_v2 }
0x2129   :  { %v3285_v51 = vpop.permute.xlu1 %3284 }
0x212a   :  { %6021 = vmatprep.subr.bf16.mxu1 %v6020_v8 }
0x212b   :  { %6023 = vmatpush3.bf16.msra.mxu1 %v6020_v8 }
0x212d   :  { %v3287_v6 = vpop.permute.xlu1 %3286 }
0x212f   :  { %v6514_v5 = vpop.eup %6513 }
0x2130   :  { %v3190_v24 = vsel %vm465_vm3, %v6514_v5, 0.0  ;;  %v6516_v9 = vpop.eup %6515 }
0x2131   :  { %3191 = vadd.xlane.f32.xlu0 %v3190_v24  ;;  %v3187_v22 = vsel %vm465_vm3, %v6516_v9, 0.0 }
0x2135   :  { %3188 = vadd.xlane.f32.xlu0 %v3187_v22 }
0x214b   :  { %6328 = vrot.lane.b32.xlu0 %v7458_v25, %s6789_s12 }
0x21be   :  { %v3192_v10 = vpop.xlane.xlu0 %3191 }
0x21bf   :  { %6517 = vrcp.f32 %v3192_v10 }
0x21c2   :  { %v3189_v11 = vpop.xlane.xlu0 %3188 }
0x21c3   :  { %6519 = vrcp.f32 %v3189_v11 }
0x21c6   :  { %v6329_v4 = vpop.permute.xlu0 %6328 }
0x21c7   :  { %v6331_v12 = vunpack.i.h.bf16 %v6329_v4  ;;  %v6330_v13 = vunpack.i.l.bf16 %v6329_v4 }
0x21c9   :  { %v6024_v14 = vpack.c.bf16 %v6331_v12, %v6330_v13  ;;  %v6518_v15 = vpop.eup %6517 }
0x21ca   :  { %v3196_v17 = vmul.f32 %v6518_v15, %v6514_v5 }
0x21cb   :  { %6026 = vmatprep.subr.msk.bf16.mxu1 %vm7066_vm2, %v6024_v14 }
0x21cd   :  { %v6520_v16 = vpop.eup %6519 }
0x21ce   :  { %v3195_v52 = vmul.f32 %v6520_v16, %v6516_v9 }
0x21d0   :  { %5634 = vmatprep.mubr.msk.f32.mxu1 %vm465_vm3, %v3195_v52 }
0x21d1   :  { %5635 = vmatmul.mubr.msk.f32.vlgmr.msra.gmra.mrb[32].mxu1 %vm465_vm3, %v3196_v17 }
0x21d2   :  { %6029 = vmatpush3.bf16.xpose.msk.msra.mxu1 %vm7066_vm2, %v6024_v14  ;;  %5641 = vmatprep.mubr.msk.f32.mxu1 %vm381_vm1, %v3285_v51 }
0x21d9   :  { %5642 = vmatmul.mubr.msk.f32.vlgmr.msra.gmra.mrb[34].mxu1 %vm381_vm1, %v3287_v6 }
0x22a4   :  { %v5636_v18 = vpop.f32.mrb[32].mxu1 }
0x22a5   :  { %v3275_v19 = vpop.f32.mrb[33].mxu1 }
0x22ac   :  { %v5643_v20 = vpop.f32.mrb[34].mxu1 }
0x22ad   :  { %v3372_v26 = vadd.f32 %v6579_v21, %v5643_v20  ;;  %v3366_v27 = vpop.f32.mrb[35].mxu1 }
0x22ae   :  { %v3367_v44 = vadd.f32 %v6580_v37, %v3366_v27 }
0x22af   :  { %v3378_v28 = vsel %vm465_vm3, %v3372_v26, -inf }
0x22b0   :  { %3379 = vmax.xlane.f32.xlu0 %v3378_v28  ;;  %v3375_v45 = vsel %vm465_vm3, %v3367_v44, -inf }
0x22b1   :  { %3376 = vmax.xlane.f32.xlu1 %v3375_v45 }
0x22c2   :  { %6333 = vrot.lane.b32.xlu1 %v7458_v25, %s6790_s25 }
0x22c6   :  { %3488 = vrot.lane.b32.xlu1 %v7524_v39, %s7857_s21 }
0x22ca   :  { %3494 = vrot.lane.b32.xlu1 %v3275_v19, %s7861_s4  ;;  %v3632_v19 = vld [vmem:[#allocation10 + $0x38] sm:$0xff] }
0x22ce   :  { %3496 = vrot.lane.b32.xlu1 %v5636_v18, %s7861_s4  ;;  %v3631_v18 = vld [vmem:[#allocation10 + $0x30] sm:$0xff] }
0x22cf   :  { %v6046_v20 = vpack.c.bf16 %v3632_v19, %v3631_v18 }
0x233d   :  { %v3380_v43 = vpop.xlane.xlu0 %3379 }
0x233e   :  { %v3382_v7 = vsub.f32 %v3372_v26, %v3380_v43  ;;  %v3377_v29 = vpop.xlane.xlu1 %3376 }
0x233f   :  { %v3381_v30 = vsub.f32 %v3367_v44, %v3377_v29 }
0x2340   :  { %v3385_v31 = vmul.f32 1.442695, %v3382_v7 }
0x2341   :  { %v3383_v32 = vmul.f32 1.442695, %v3381_v30 }
0x2342   :  { %v6334_v35 = vpop.permute.xlu1 %6333 }
0x2343   :  { %6521 = vpow2.f32 %v3383_v32  ;;  %v6336_v23 = vunpack.i.h.bf16 %v6334_v35  ;;  %v6335_v34 = vunpack.i.l.bf16 %v6334_v35 }
0x2344   :  { %6523 = vpow2.f32 %v3385_v31 }
0x2345   :  { %v6030_v33 = vpack.c.bf16 %v6336_v23, %v6335_v34 }
0x2346   :  { %v3489_v63 = vpop.permute.xlu1 %3488 }
0x2347   :  { %6031 = vmatprep.subr.bf16.mxu0 %v6030_v33  ;;  %v3509_v22 = vsel %vm381_vm1, %v7520_v36, %v3489_v63 }
0x2348   :  { %6033 = vmatpush3.bf16.msra.mxu0 %v6030_v33  ;;  %v5052_v33 = vld [vmem:[#allocation8 + $0x1] ss:$0 sm:$0xff] }
0x234a   :  { %v3495_v2 = vpop.permute.xlu1 %3494 }
0x234d   :  { %v6522_v25 = vpop.eup %6521 }
0x234e   :  { %v3387_v39 = vsel %vm465_vm3, %v6522_v25, 0.0  ;;  %v6524_v47 = vpop.eup %6523  ;;  %v3497_v5 = vpop.permute.xlu1 %3496 }
0x234f   :  { %3388 = vadd.xlane.f32.xlu0 %v3387_v39  ;;  %v3390_v41 = vsel %vm465_vm3, %v6524_v47, 0.0  ;;  %v3511_v4 = vsel %vm465_vm3, %v3509_v22, %v3497_v5 }
0x2353   :  { %3391 = vadd.xlane.f32.xlu0 %v3390_v41 }
0x2369   :  { %3486 = vrot.lane.b32.xlu0 %v7526_v46, %s7857_s21  ;;  %v5047_v46 = vld [vmem:[%s7839_s6 + $0x28] sm:$0xff]  ;;  %s6792_s6 = smov 32  }
0x236a   :  { %v6034_v3 = vpack.c.bf16 %v5047_v46, %v5046_v55  ;;  %v7637_v55 = vld [vmem:[#allocation7] sm:$0xff] }
0x236c   :  { %6035 = vmatprep.subr.bf16.mxu0 %v6034_v3 }
0x23dc   :  { %v3389_v48 = vpop.xlane.xlu0 %3388 }
0x23dd   :  { %6525 = vrcp.f32 %v3389_v48 }
0x23e0   :  { %v3392_v1 = vpop.xlane.xlu0 %3391 }
0x23e1   :  { %6527 = vrcp.f32 %v3392_v1 }
0x23e4   :  { %v3487_v8 = vpop.permute.xlu0 %3486 }
0x23e5   :  { %v3508_v24 = vsel %vm381_vm1, %v7522_v38, %v3487_v8 }
0x23e6   :  { %v3510_v10 = vsel %vm465_vm3, %v3508_v24, %v3495_v2 }
0x23e7   :  { %v6526_v50 = vpop.eup %6525 }
0x23e8   :  { %v3395_v0 = vmul.f32 %v6526_v50, %v6522_v25 }
0x23ea   :  { %5648 = vmatprep.mubr.msk.f32.mxu0 %vm465_vm3, %v3395_v0  ;;  %v7634_v0 = vld [vmem:[#allocation7 + $0x8] sm:$0xff] }
0x23eb   :  { %v6528_v53 = vpop.eup %6527 }
0x23ec   :  { %v3396_v54 = vmul.f32 %v6528_v53, %v6524_v47 }
0x23ee   :  { %5649 = vmatmul.mubr.msk.f32.vlgmr.msra.gmra.mrb[28].mxu0 %vm465_vm3, %v3396_v54 }
0x23ef   :  { %6037 = vmatpush3.bf16.msra.mxu0 %v6034_v3 }
0x23f0   :  { %6039 = vmatprep.subr.bf16.mxu0 %v6038_v58 }
0x23f3   :  { %6041 = vmatpush3.bf16.msra.mxu0 %v6038_v58 }
0x24c1   :  { %v5650_v61 = vpop.f32.mrb[28].mxu0 }
0x24c2   :  { %3504 = vrot.lane.b32.xlu1 %v5650_v61, %s7862_s0  ;;  %v3475_v62 = vpop.f32.mrb[29].mxu0 }
0x24c3   :  { %3502 = vrot.lane.b32.xlu0 %v3475_v62, %s7862_s0 }
0x2534   :  { %v3505_v9 = vpop.permute.xlu1 %3504 }
0x2535   :  { %v3503_v11 = vpop.permute.xlu0 %3502  ;;  %v3513_v13 = vsel %vm1203_vm4, %v3511_v4, %v3505_v9 }
0x2536   :  { %v3512_v12 = vsel %vm1203_vm4, %v3510_v10, %v3503_v11 }
0x2537   :  { %5659 = vmatprep.mubr.msk.f32.mxu0 %vm166_vm0, %v3512_v12 }
0x2538   :  { %5660 = vmatmul.mubr.msk.f32.vlgmr.msra.gmra.mrb[30].mxu0 %vm166_vm0, %v3513_v13 }
0x260b   :  { %v5661_v14 = vpop.f32.mrb[30].mxu0 }
0x260c   :  { %v7599_v38 = vadd.f32 %v5661_v14, %v7420_v59  ;;  %v3591_v15 = vpop.f32.mrb[31].mxu0  ;;  %v3629_v59 = vld [vmem:[#allocation10 + $0x20] sm:$0xff] }
0x260d   :  { %v7602_v36 = vadd.f32 %v3591_v15, %v7423_v60  ;;  %v3630_v60 = vld [vmem:[#allocation10 + $0x28] sm:$0xff] }
0x260e   :  { %v3605_v16 = vmul.f32 %v7599_v38, %v7599_v38  ;;  %v6042_v6 = vpack.c.bf16 %v3630_v60, %v3629_v59 }
0x260f   :  { %v3604_v52 = vmul.f32 %v7602_v36, %v7602_v36 }
0x2610   :  { %v3609_v17 = vsel %vm166_vm0, %v3605_v16, 0.0  ;;  %6043 = vmatprep.subr.bf16.mxu1 %v6042_v6 }
0x2611   :  { %3610 = vadd.xlane.f32.xlu1 %v3609_v17  ;;  %v3606_v51 = vsel %vm166_vm0, %v3604_v52, 0.0  ;;  %6045 = vmatpush3.bf16.msra.mxu1 %v6042_v6 }
0x2612   :  { %3607 = vadd.xlane.f32.xlu0 %v3606_v51  ;;  %6047 = vmatprep.subr.bf16.mxu1 %v6046_v20 }
0x2615   :  { %6049 = vmatpush3.bf16.msra.mxu1 %v6046_v20 }
0x2622   :  { %6343 = vrot.lane.b32.xlu1 %v7050_v42, %s6782_s16 }
0x2628   :  { %6338 = vrot.lane.b32.xlu0 %v7046_v40, %s6782_s16 }
0x269e   :  { %v3611_v21 = vpop.xlane.xlu1 %3610 }
0x269f   :  { %v3613_v26 = vmul.f32 0.03125, %v3611_v21  ;;  %v3608_v27 = vpop.xlane.xlu0 %3607 }
0x26a0   :  { %v3612_v37 = vmul.f32 0.03125, %v3608_v27 }
0x26a1   :  { %v3615_v44 = vadd.f32 1e-06, %v3613_v26 }
0x26a2   :  { %v3614_v28 = vadd.f32 1e-06, %v3612_v37  ;;  %v6344_v45 = vpop.permute.xlu1 %6343 }
0x26a3   :  { %6529 = vrsqrt.f32 %v3615_v44  ;;  %v6346_v43 = vunpack.i.h.bf16 %v6344_v45  ;;  %v6339_v7 = vpop.permute.xlu0 %6338  ;;  %v6345_v29 = vunpack.i.l.bf16 %v6344_v45 }
0x26a4   :  { %6531 = vrsqrt.f32 %v3614_v28  ;;  %v6341_v30 = vunpack.i.h.bf16 %v6339_v7  ;;  %v6340_v31 = vunpack.i.l.bf16 %v6339_v7 }
0x26a5   :  { %v6056_v35 = vpack.c.bf16 %v6346_v43, %v6345_v29 }
0x26a6   :  { %v6050_v32 = vpack.c.bf16 %v6341_v30, %v6340_v31 }
0x26a8   :  { %6052 = vmatprep.subr.msk.bf16.mxu0 %vm7066_vm2, %v6050_v32 }
0x26a9   :  { %6055 = vmatpush3.bf16.xpose.msk.msra.mxu0 %vm7066_vm2, %v6050_v32 }
0x26aa   :  { %6058 = vmatprep.subr.msk.bf16.mxu0 %vm7066_vm2, %v6056_v35 }
0x26ad   :  { %v6530_v23 = vpop.eup %6529 }
0x26ae   :  { %v6532_v34 = vpop.eup %6531  ;;  %v3619_v25 = vmul.f32 %v6530_v23, %v7599_v38 }
0x26af   :  { %v3618_v39 = vmul.f32 %v6532_v34, %v7602_v36 }
0x26b0   :  { %v3627_v41 = vmul.f32 %v5052_v33, %v3619_v25 }
0x26b1   :  { %6061 = vmatpush3.bf16.xpose.msk.msra.mxu0 %vm7066_vm2, %v6056_v35  ;;  %v3626_v47 = vmul.f32 %v5052_v33, %v3618_v39 }
0x26b3   :  { %5670 = vmatprep.mubr.msk.f32.mxu1 %vm166_vm0, %v3626_v47 }
0x26b4   :  { %5671 = vmatmul.mubr.msk.f32.vlgmr.msra.gmra.mrb[36].mxu1 %vm166_vm0, %v3627_v41 }
0x2787   :  { %v7626_v48 = vpop.f32.mrb[36].mxu1 }
0x2788   :  { %v7628_v1 = vpop.f32.mrb[37].mxu1 }
0x2789   :  { %5681 = vmatprep.mubr.msk.f32.mxu0 %vm381_vm1, %v7628_v1 }
0x278a   :  { %5682 = vmatmul.mubr.msk.f32.vlgmr.msra.gmra.mrb[32].mxu0 %vm381_vm1, %v7626_v48 }
0x285d   :  { %v5683_v50 = vpop.f32.mrb[32].mxu0 }
0x285e   :  { %v3808_v53 = vadd.f32 %v7634_v0, %v5683_v50  ;;  %v3802_v54 = vpop.f32.mrb[33].mxu0 }
0x285f   :  { %v3803_v46 = vadd.f32 %v7637_v55, %v3802_v54 }
0x2860   :  { %v3814_v56 = vsel %vm166_vm0, %v3808_v53, -inf }
0x2861   :  { %3815 = vmax.xlane.f32.xlu1 %v3814_v56  ;;  %v3811_v3 = vsel %vm166_vm0, %v3803_v46, -inf }
0x2862   :  { %3812 = vmax.xlane.f32.xlu0 %v3811_v3 }
0x2872   :  { %6353 = vrot.lane.b32.xlu1 %v7050_v42, %s6792_s6 }
0x2876   :  { %6358 = vrot.lane.b32.xlu1 %v7046_v40, %s6786_s27 }
0x287a   :  { %6363 = vrot.lane.b32.xlu1 %v7050_v42, %s6786_s27 }
0x287e   :  { %3928 = vrot.lane.b32.xlu1 %v7626_v48, %s6783_s3 }
0x28ee   :  { %v3816_v57 = vpop.xlane.xlu1 %3815 }
0x28ef   :  { %v3818_v58 = vsub.f32 %v3808_v53, %v3816_v57  ;;  %v3813_v61 = vpop.xlane.xlu0 %3812 }
0x28f0   :  { %v3817_v62 = vsub.f32 %v3803_v46, %v3813_v61 }
0x28f1   :  { %v3821_v63 = vmul.f32 1.442695, %v3818_v58 }
0x28f2   :  { %v3819_v2 = vmul.f32 1.442695, %v3817_v62  ;;  %v6354_v10 = vpop.permute.xlu1 %6353 }
0x28f3   :  { %6533 = vpow2.f32 %v3821_v63  ;;  %v6356_v12 = vunpack.i.h.bf16 %v6354_v10  ;;  %v6355_v13 = vunpack.i.l.bf16 %v6354_v10 }
0x28f4   :  { %6535 = vpow2.f32 %v3819_v2 }
0x28f5   :  { %v6066_v17 = vpack.c.bf16 %v6356_v12, %v6355_v13 }
0x28f6   :  { %v6359_v16 = vpop.permute.xlu1 %6358 }
0x28f7   :  { %v6361_v51 = vunpack.i.h.bf16 %v6359_v16  ;;  %v6360_v59 = vunpack.i.l.bf16 %v6359_v16 }
0x28f9   :  { %v6070_v19 = vpack.c.bf16 %v6361_v51, %v6360_v59 }
0x28fa   :  { %v6364_v20 = vpop.permute.xlu1 %6363 }
0x28fb   :  { %v6366_v27 = vunpack.i.h.bf16 %v6364_v20  ;;  %v6365_v37 = vunpack.i.l.bf16 %v6364_v20 }
0x28fd   :  { %v6534_v8 = vpop.eup %6533  ;;  %v6076_v44 = vpack.c.bf16 %v6366_v27, %v6365_v37 }
0x28fe   :  { %v3826_v5 = vsel %vm166_vm0, %v6534_v8, 0.0  ;;  %v6536_v24 = vpop.eup %6535  ;;  %v3929_v28 = vpop.permute.xlu1 %3928 }
0x28ff   :  { %3827 = vadd.xlane.f32.xlu0 %v3826_v5  ;;  %v3823_v9 = vsel %vm166_vm0, %v6536_v24, 0.0 }
0x2903   :  { %3824 = vadd.xlane.f32.xlu0 %v3823_v9 }
0x2919   :  { %6348 = vrot.lane.b32.xlu0 %v7046_v40, %s6792_s6 }
0x291d   :  { %3926 = vrot.lane.b32.xlu0 %v7628_v1, %s6783_s3 }
0x298c   :  { %v3828_v22 = vpop.xlane.xlu0 %3827 }
0x2990   :  { %v3825_v11 = vpop.xlane.xlu0 %3824 }
0x2991   :  { %6537 = vrcp.f32 %v3825_v11 }
0x2992   :  { %6539 = vrcp.f32 %v3828_v22 }
0x2994   :  { %v6349_v4 = vpop.permute.xlu0 %6348 }
0x2995   :  { %v6351_v14 = vunpack.i.h.bf16 %v6349_v4  ;;  %v6350_v15 = vunpack.i.l.bf16 %v6349_v4 }
0x2997   :  { %v6062_v52 = vpack.c.bf16 %v6351_v14, %v6350_v15 }
0x2998   :  { %v3927_v26 = vpop.permute.xlu0 %3926 }
0x2999   :  { %6063 = vmatprep.subr.bf16.mxu1 %v6062_v52 }
0x299a   :  { %6065 = vmatpush3.bf16.msra.mxu1 %v6062_v52 }
0x299b   :  { %v6538_v60 = vpop.eup %6537  ;;  %6067 = vmatprep.subr.bf16.mxu1 %v6066_v17 }
0x299c   :  { %v6540_v6 = vpop.eup %6539  ;;  %v3831_v18 = vmul.f32 %v6538_v60, %v6536_v24 }
0x299d   :  { %v3832_v21 = vmul.f32 %v6540_v6, %v6534_v8 }
0x299e   :  { %6069 = vmatpush3.bf16.msra.mxu1 %v6066_v17  ;;  %5692 = vmatprep.mubr.msk.f32.mxu1 %vm166_vm0, %v3831_v18 }
0x299f   :  { %6072 = vmatprep.subr.msk.bf16.mxu1 %vm7066_vm2, %v6070_v19 }
0x29a1   :  { %5693 = vmatmul.mubr.msk.f32.vlgmr.msra.gmra.mrb[38].mxu1 %vm166_vm0, %v3832_v21 }
0x29a2   :  { %5703 = vmatprep.mubr.msk.f32.mxu1 %vm381_vm1, %v3927_v26 }
0x29a7   :  { %6075 = vmatpush3.bf16.xpose.msk.msra.mxu1 %vm7066_vm2, %v6070_v19 }
0x29a8   :  { %6078 = vmatprep.subr.msk.bf16.mxu1 %vm7066_vm2, %v6076_v44 }
0x29af   :  { %6081 = vmatpush3.bf16.xpose.msk.msra.mxu1 %vm7066_vm2, %v6076_v44 }
0x29b6   :  { %5704 = vmatmul.mubr.msk.f32.vlgmr.msra.gmra.mrb[40].mxu1 %vm381_vm1, %v3929_v28 }
0x2a74   :  { %v7666_v45 = vpop.f32.mrb[38].mxu1 }
0x2a75   :  { %v7668_v43 = vpop.f32.mrb[39].mxu1 }
0x2a89   :  { %v5705_v7 = vpop.f32.mrb[40].mxu1 }
0x2a8a   :  { %v4022_v29 = vadd.f32 %v7634_v0, %v5705_v7  ;;  %v4016_v30 = vpop.f32.mrb[41].mxu1 }
0x2a8b   :  { %v4017_v31 = vadd.f32 %v7637_v55, %v4016_v30 }
0x2a8c   :  { %v4028_v32 = vsel %vm166_vm0, %v4022_v29, -inf }
0x2a8d   :  { %4029 = vmax.xlane.f32.xlu1 %v4028_v32  ;;  %v4025_v35 = vsel %vm166_vm0, %v4017_v31, -inf }
0x2a8e   :  { %4026 = vmax.xlane.f32.xlu0 %v4025_v35 }
0x2a9e   :  { %6373 = vrot.lane.b32.xlu1 %v7050_v42, %s7862_s0 }
0x2aa2   :  { %6378 = vrot.lane.b32.xlu1 %v7046_v40, %s6787_s29 }
0x2aa6   :  { %6383 = vrot.lane.b32.xlu1 %v7050_v42, %s6787_s29 }
0x2aaa   :  { %4142 = vrot.lane.b32.xlu1 %v7626_v48, %s6785_s23 }
0x2b1a   :  { %v4030_v23 = vpop.xlane.xlu1 %4029 }
0x2b1b   :  { %v4032_v34 = vsub.f32 %v4022_v29, %v4030_v23  ;;  %v4027_v33 = vpop.xlane.xlu0 %4026 }
0x2b1c   :  { %v4031_v25 = vsub.f32 %v4017_v31, %v4027_v33 }
0x2b1d   :  { %v4035_v39 = vmul.f32 1.442695, %v4032_v34 }
0x2b1e   :  { %v4033_v47 = vmul.f32 1.442695, %v4031_v25  ;;  %v6374_v56 = vpop.permute.xlu1 %6373 }
0x2b1f   :  { %6541 = vpow2.f32 %v4035_v39  ;;  %v6376_v58 = vunpack.i.h.bf16 %v6374_v56  ;;  %v6375_v61 = vunpack.i.l.bf16 %v6374_v56 }
0x2b20   :  { %6543 = vpow2.f32 %v4033_v47 }
0x2b21   :  { %v6086_v5 = vpack.c.bf16 %v6376_v58, %v6375_v61 }
0x2b22   :  { %v6379_v2 = vpop.permute.xlu1 %6378 }
0x2b23   :  { %v6381_v24 = vunpack.i.h.bf16 %v6379_v2  ;;  %v6380_v9 = vunpack.i.l.bf16 %v6379_v2 }
0x2b25   :  { %v6090_v4 = vpack.c.bf16 %v6381_v24, %v6380_v9 }
0x2b26   :  { %v6384_v12 = vpop.permute.xlu1 %6383 }
0x2b27   :  { %v6386_v15 = vunpack.i.h.bf16 %v6384_v12  ;;  %v6385_v16 = vunpack.i.l.bf16 %v6384_v12 }
0x2b29   :  { %v6542_v41 = vpop.eup %6541  ;;  %v6096_v52 = vpack.c.bf16 %v6386_v15, %v6385_v16 }
0x2b2a   :  { %v4040_v50 = vsel %vm166_vm0, %v6542_v41, 0.0  ;;  %v6544_v53 = vpop.eup %6543  ;;  %v4143_v17 = vpop.permute.xlu1 %4142 }
0x2b2b   :  { %4041 = vadd.xlane.f32.xlu0 %v4040_v50  ;;  %v4037_v54 = vsel %vm166_vm0, %v6544_v53, 0.0 }
0x2b2f   :  { %4038 = vadd.xlane.f32.xlu0 %v4037_v54 }
0x2b45   :  { %6368 = vrot.lane.b32.xlu0 %v7046_v40, %s7862_s0 }
0x2b49   :  { %4140 = vrot.lane.b32.xlu0 %v7628_v1, %s6785_s23 }
0x2bb8   :  { %v4042_v46 = vpop.xlane.xlu0 %4041 }
0x2bbc   :  { %v4039_v3 = vpop.xlane.xlu0 %4038 }
0x2bbd   :  { %6545 = vrcp.f32 %v4039_v3 }
0x2bbe   :  { %6547 = vrcp.f32 %v4042_v46 }
0x2bc0   :  { %v6369_v57 = vpop.permute.xlu0 %6368 }
0x2bc1   :  { %v6371_v62 = vunpack.i.h.bf16 %v6369_v57  ;;  %v6370_v63 = vunpack.i.l.bf16 %v6369_v57 }
0x2bc3   :  { %v6082_v8 = vpack.c.bf16 %v6371_v62, %v6370_v63 }
0x2bc4   :  { %v4141_v14 = vpop.permute.xlu0 %4140 }
0x2bc5   :  { %6083 = vmatprep.subr.bf16.mxu0 %v6082_v8 }
0x2bc6   :  { %6085 = vmatpush3.bf16.msra.mxu0 %v6082_v8 }
0x2bc7   :  { %v6546_v22 = vpop.eup %6545  ;;  %6087 = vmatprep.subr.bf16.mxu0 %v6086_v5 }
0x2bc8   :  { %v6548_v10 = vpop.eup %6547  ;;  %v4045_v11 = vmul.f32 %v6546_v22, %v6544_v53 }
0x2bc9   :  { %v4046_v13 = vmul.f32 %v6548_v10, %v6542_v41 }
0x2bca   :  { %6089 = vmatpush3.bf16.msra.mxu0 %v6086_v5  ;;  %5714 = vmatprep.mubr.msk.f32.mxu0 %vm166_vm0, %v4045_v11 }
0x2bcb   :  { %6092 = vmatprep.subr.msk.bf16.mxu0 %vm7066_vm2, %v6090_v4 }
0x2bcd   :  { %5715 = vmatmul.mubr.msk.f32.vlgmr.msra.gmra.mrb[34].mxu0 %vm166_vm0, %v4046_v13 }
0x2bce   :  { %5725 = vmatprep.mubr.msk.f32.mxu0 %vm381_vm1, %v4141_v14 }
0x2bd3   :  { %6095 = vmatpush3.bf16.xpose.msk.msra.mxu0 %vm7066_vm2, %v6090_v4 }
0x2bd4   :  { %6098 = vmatprep.subr.msk.bf16.mxu0 %vm7066_vm2, %v6096_v52 }
0x2bdb   :  { %6101 = vmatpush3.bf16.xpose.msk.msra.mxu0 %vm7066_vm2, %v6096_v52 }
0x2be2   :  { %5726 = vmatmul.mubr.msk.f32.vlgmr.msra.gmra.mrb[36].mxu0 %vm381_vm1, %v4143_v17 }
0x2ca0   :  { %v7700_v51 = vpop.f32.mrb[34].mxu0 }
0x2ca1   :  { %v7702_v59 = vpop.f32.mrb[35].mxu0 }
0x2cb5   :  { %v5727_v60 = vpop.f32.mrb[36].mxu0 }
0x2cb6   :  { %v4236_v6 = vadd.f32 %v7634_v0, %v5727_v60  ;;  %v4230_v18 = vpop.f32.mrb[37].mxu0 }
0x2cb7   :  { %v4231_v19 = vadd.f32 %v7637_v55, %v4230_v18 }
0x2cb8   :  { %v4242_v20 = vsel %vm166_vm0, %v4236_v6, -inf }
0x2cb9   :  { %4243 = vmax.xlane.f32.xlu1 %v4242_v20  ;;  %v4239_v21 = vsel %vm166_vm0, %v4231_v19, -inf }
0x2cba   :  { %4240 = vmax.xlane.f32.xlu0 %v4239_v21 }
0x2cca   :  { %6393 = vrot.lane.b32.xlu1 %v7050_v42, %s7861_s4 }
0x2cce   :  { %6398 = vrot.lane.b32.xlu1 %v7046_v40, %s6790_s25 }
0x2cd2   :  { %6403 = vrot.lane.b32.xlu1 %v7050_v42, %s6790_s25 }
0x2cd6   :  { %4356 = vrot.lane.b32.xlu1 %v7626_v48, %s6788_s17 }
0x2d46   :  { %v4244_v26 = vpop.xlane.xlu1 %4243 }
0x2d47   :  { %v4246_v27 = vsub.f32 %v4236_v6, %v4244_v26  ;;  %v4241_v37 = vpop.xlane.xlu0 %4240 }
0x2d48   :  { %v4245_v44 = vsub.f32 %v4231_v19, %v4241_v37 }
0x2d49   :  { %v4249_v28 = vmul.f32 1.442695, %v4246_v27 }
0x2d4a   :  { %v4247_v7 = vmul.f32 1.442695, %v4245_v44  ;;  %v6394_v35 = vpop.permute.xlu1 %6393 }
0x2d4b   :  { %6549 = vpow2.f32 %v4249_v28  ;;  %v6396_v33 = vunpack.i.h.bf16 %v6394_v35  ;;  %v6395_v25 = vunpack.i.l.bf16 %v6394_v35 }
0x2d4c   :  { %6551 = vpow2.f32 %v4247_v7 }
0x2d4d   :  { %v6106_v53 = vpack.c.bf16 %v6396_v33, %v6395_v25 }
0x2d4e   :  { %v6399_v41 = vpop.permute.xlu1 %6398 }
0x2d4f   :  { %v6401_v54 = vunpack.i.h.bf16 %v6399_v41  ;;  %v6400_v46 = vunpack.i.l.bf16 %v6399_v41 }
0x2d51   :  { %v6110_v57 = vpack.c.bf16 %v6401_v54, %v6400_v46 }
0x2d52   :  { %v6404_v58 = vpop.permute.xlu1 %6403 }
0x2d53   :  { %v6406_v63 = vunpack.i.h.bf16 %v6404_v58  ;;  %v6405_v2 = vunpack.i.l.bf16 %v6404_v58 }
0x2d55   :  { %v6550_v29 = vpop.eup %6549  ;;  %v6116_v8 = vpack.c.bf16 %v6406_v63, %v6405_v2 }
0x2d56   :  { %v4254_v30 = vsel %vm166_vm0, %v6550_v29, 0.0  ;;  %v6552_v31 = vpop.eup %6551  ;;  %v4357_v5 = vpop.permute.xlu1 %4356 }
0x2d57   :  { %4255 = vadd.xlane.f32.xlu0 %v4254_v30  ;;  %v4251_v32 = vsel %vm166_vm0, %v6552_v31, 0.0  ;;  %v4600_v30 = vld [vmem:[#allocation11 + $0x28] sm:$0xff] }
0x2d5b   :  { %4252 = vadd.xlane.f32.xlu0 %v4251_v32 }
0x2d71   :  { %6388 = vrot.lane.b32.xlu0 %v7046_v40, %s7861_s4 }
0x2d75   :  { %4354 = vrot.lane.b32.xlu0 %v7628_v1, %s6788_s17 }
0x2de4   :  { %v4256_v48 = vpop.xlane.xlu0 %4255 }
0x2de8   :  { %v4253_v23 = vpop.xlane.xlu0 %4252 }
0x2de9   :  { %6553 = vrcp.f32 %v4253_v23 }
0x2dea   :  { %6555 = vrcp.f32 %v4256_v48  ;;  %v4602_v48 = vld [vmem:[#allocation11 + $0x38] sm:$0xff] }
0x2dec   :  { %v6389_v34 = vpop.permute.xlu0 %6388 }
0x2ded   :  { %v6391_v39 = vunpack.i.h.bf16 %v6389_v34  ;;  %v6390_v47 = vunpack.i.l.bf16 %v6389_v34 }
0x2def   :  { %v6102_v50 = vpack.c.bf16 %v6391_v39, %v6390_v47 }
0x2df0   :  { %v4355_v62 = vpop.permute.xlu0 %4354 }
0x2df1   :  { %6103 = vmatprep.subr.bf16.mxu1 %v6102_v50 }
0x2df2   :  { %6105 = vmatpush3.bf16.msra.mxu1 %v6102_v50 }
0x2df3   :  { %v6554_v56 = vpop.eup %6553  ;;  %6107 = vmatprep.subr.bf16.mxu1 %v6106_v53 }
0x2df4   :  { %v6556_v1 = vpop.eup %6555  ;;  %v4259_v3 = vmul.f32 %v6554_v56, %v6552_v31  ;;  %v4601_v31 = vld [vmem:[#allocation11 + $0x30] sm:$0xff] }
0x2df5   :  { %v4260_v61 = vmul.f32 %v6556_v1, %v6550_v29  ;;  %v4599_v29 = vld [vmem:[#allocation11 + $0x20] sm:$0xff]  ;;  %v6134_v35 = vpack.c.bf16 %v4602_v48, %v4601_v31 }
0x2df6   :  { %6109 = vmatpush3.bf16.msra.mxu1 %v6106_v53  ;;  %5736 = vmatprep.mubr.msk.f32.mxu1 %vm166_vm0, %v4259_v3  ;;  %v6130_v32 = vpack.c.bf16 %v4600_v30, %v4599_v29 }
0x2df7   :  { %6112 = vmatprep.subr.msk.bf16.mxu1 %vm7066_vm2, %v6110_v57 }
0x2df9   :  { %5737 = vmatmul.mubr.msk.f32.vlgmr.msra.gmra.mrb[42].mxu1 %vm166_vm0, %v4260_v61 }
0x2dfa   :  { %5747 = vmatprep.mubr.msk.f32.mxu1 %vm381_vm1, %v4355_v62 }
0x2dff   :  { %6115 = vmatpush3.bf16.xpose.msk.msra.mxu1 %vm7066_vm2, %v6110_v57 }
0x2e00   :  { %6118 = vmatprep.subr.msk.bf16.mxu1 %vm7066_vm2, %v6116_v8 }
0x2e07   :  { %6121 = vmatpush3.bf16.xpose.msk.msra.mxu1 %vm7066_vm2, %v6116_v8  ;;  %v4713_v8 = vld [vmem:[#allocation13 + $0x20] sm:$0xff] }
0x2e0e   :  { %5748 = vmatmul.mubr.msk.f32.vlgmr.msra.gmra.mrb[44].mxu1 %vm381_vm1, %v4357_v5  ;;  %v4714_v5 = vld [vmem:[#allocation13 + $0x28] sm:$0xff] }
0x2ecc   :  { %v5738_v24 = vpop.f32.mrb[42].mxu1 }
0x2ecd   :  { %v4345_v9 = vpop.f32.mrb[43].mxu1 }
0x2ee1   :  { %v5749_v22 = vpop.f32.mrb[44].mxu1 }
0x2ee2   :  { %v4450_v10 = vadd.f32 %v7634_v0, %v5749_v22  ;;  %v4444_v11 = vpop.f32.mrb[45].mxu1 }
0x2ee3   :  { %v4445_v4 = vadd.f32 %v7637_v55, %v4444_v11  ;;  %v5095_v11 = vld [vmem:[%s7846_s13 + $0x50] sm:$0xff] }
0x2ee4   :  { %v4456_v12 = vsel %vm166_vm0, %v4450_v10, -inf }
0x2ee5   :  { %4457 = vmax.xlane.f32.xlu1 %v4456_v12  ;;  %v4453_v13 = vsel %vm166_vm0, %v4445_v4, -inf  ;;  %v5096_v12 = vld [vmem:[%s7846_s13 + $0x58] sm:$0xff] }
0x2ee6   :  { %4454 = vmax.xlane.f32.xlu0 %v4453_v13  ;;  %v6150_v13 = vpack.c.bf16 %v5096_v12, %v5095_v11 }
0x2ef6   :  { %6413 = vrot.lane.b32.xlu1 %v7050_v42, %s7857_s21 }
0x2efa   :  { %4570 = vrot.lane.b32.xlu1 %v7702_v59, %s7857_s21 }
0x2efe   :  { %4572 = vrot.lane.b32.xlu1 %v7700_v51, %s7857_s21 }
0x2f02   :  { %4580 = vrot.lane.b32.xlu1 %v5738_v24, %s7861_s4  ;;  %v6138_v24 = vpack.c.bf16 %v4714_v5, %v4713_v8 }
0x2f04   :  { %6139 = vmatprep.subr.bf16.mxu1 %v6138_v24 }
0x2f05   :  { %6141 = vmatpush3.bf16.msra.mxu1 %v6138_v24 }
0x2f72   :  { %v4458_v49 = vpop.xlane.xlu1 %4457 }
0x2f73   :  { %v4460_v0 = vsub.f32 %v4450_v10, %v4458_v49  ;;  %v4455_v55 = vpop.xlane.xlu0 %4454  ;;  %v5094_v10 = vld [vmem:[%s7846_s13 + $0x48] sm:$0xff]  ;;  %v5097_v49 = vld [vmem:[%s7846_s13 + $0x60] sm:$0xff] }
0x2f74   :  { %v4459_v14 = vsub.f32 %v4445_v4, %v4455_v55 }
0x2f75   :  { %v4463_v15 = vmul.f32 1.442695, %v4460_v0  ;;  %v5098_v0 = vld [vmem:[%s7846_s13 + $0x68] sm:$0xff] }
0x2f76   :  { %v4461_v16 = vmul.f32 1.442695, %v4459_v14  ;;  %v6414_v6 = vpop.permute.xlu1 %6413  ;;  %v6154_v55 = vpack.c.bf16 %v5098_v0, %v5097_v49 }
0x2f77   :  { %6557 = vpow2.f32 %v4463_v15  ;;  %v6416_v19 = vunpack.i.h.bf16 %v6414_v6  ;;  %v6415_v20 = vunpack.i.l.bf16 %v6414_v6 }
0x2f78   :  { %6559 = vpow2.f32 %v4461_v16 }
0x2f79   :  { %v6126_v37 = vpack.c.bf16 %v6416_v19, %v6415_v20 }
0x2f7a   :  { %v4571_v33 = vpop.permute.xlu1 %4570 }
0x2f7b   :  { %v4592_v41 = vsel %vm381_vm1, %v7668_v43, %v4571_v33 }
0x2f7e   :  { %v4573_v25 = vpop.permute.xlu1 %4572 }
0x2f7f   :  { %v4593_v53 = vsel %vm381_vm1, %v7666_v45, %v4573_v25 }
0x2f81   :  { %v6558_v52 = vpop.eup %6557 }
0x2f82   :  { %v4468_v17 = vsel %vm166_vm0, %v6558_v52, 0.0  ;;  %v6560_v42 = vpop.eup %6559  ;;  %v4581_v39 = vpop.permute.xlu1 %4580 }
0x2f83   :  { %4469 = vadd.xlane.f32.xlu0 %v4468_v17  ;;  %v4465_v59 = vsel %vm166_vm0, %v6560_v42, 0.0  ;;  %v4595_v56 = vsel %vm465_vm3, %v4593_v53, %v4581_v39  ;;  %v5103_v53 = vld [vmem:[%s7847_s14] ss:$0 sm:$0xff] }
0x2f87   :  { %4466 = vadd.xlane.f32.xlu0 %v4465_v59 }
0x2f9d   :  { %6408 = vrot.lane.b32.xlu0 %v7046_v40, %s7857_s21 }
0x2fa1   :  { %4578 = vrot.lane.b32.xlu0 %v4345_v9, %s7861_s4  ;;  %v4716_v9 = vld [vmem:[#allocation13 + $0x38] sm:$0xff] }
0x3010   :  { %v4470_v51 = vpop.xlane.xlu0 %4469 }
0x3014   :  { %v4467_v60 = vpop.xlane.xlu0 %4466 }
0x3015   :  { %6561 = vrcp.f32 %v4467_v60  ;;  %v5090_v60 = vld [vmem:[%s7844_s11 + $0x1] ss:$0 sm:$0xff] }
0x3016   :  { %6563 = vrcp.f32 %v4470_v51 }
0x3018   :  { %v6409_v18 = vpop.permute.xlu0 %6408 }
0x3019   :  { %v6411_v21 = vunpack.i.h.bf16 %v6409_v18  ;;  %v6410_v26 = vunpack.i.l.bf16 %v6409_v18 }
0x301b   :  { %v6122_v27 = vpack.c.bf16 %v6411_v21, %v6410_v26  ;;  %v5099_v21 = vld [vmem:[%s7846_s13 + $0x70] sm:$0xff]  ;;  %v5100_v26 = vld [vmem:[%s7846_s13 + $0x78] sm:$0xff] }
0x301c   :  { %v4579_v47 = vpop.permute.xlu0 %4578 }
0x301d   :  { %6123 = vmatprep.subr.bf16.mxu0 %v6122_v27  ;;  %v4594_v54 = vsel %vm465_vm3, %v4592_v41, %v4579_v47 }
0x301e   :  { %6125 = vmatpush3.bf16.msra.mxu0 %v6122_v27  ;;  %v6158_v27 = vpack.c.bf16 %v5100_v26, %v5099_v21 }
0x301f   :  { %v6562_v44 = vpop.eup %6561  ;;  %6127 = vmatprep.subr.bf16.mxu0 %v6126_v37 }
0x3020   :  { %v6564_v28 = vpop.eup %6563  ;;  %v4473_v40 = vmul.f32 %v6562_v44, %v6560_v42 }
0x3021   :  { %v4474_v7 = vmul.f32 %v6564_v28, %v6558_v52 }
0x3022   :  { %6129 = vmatpush3.bf16.msra.mxu0 %v6126_v37  ;;  %5758 = vmatprep.mubr.msk.f32.mxu0 %vm166_vm0, %v4473_v40 }
0x3023   :  { %6131 = vmatprep.subr.bf16.mxu0 %v6130_v32 }
0x3025   :  { %5759 = vmatmul.mubr.msk.f32.vlgmr.msra.gmra.mrb[38].mxu0 %vm166_vm0, %v4474_v7 }
0x3026   :  { %6133 = vmatpush3.bf16.msra.mxu0 %v6130_v32 }
0x3027   :  { %6135 = vmatprep.subr.bf16.mxu0 %v6134_v35 }
0x302a   :  { %6137 = vmatpush3.bf16.msra.mxu0 %v6134_v35 }
0x30f8   :  { %v5760_v23 = vpop.f32.mrb[38].mxu0 }
0x30f9   :  { %4588 = vrot.lane.b32.xlu1 %v5760_v23, %s7862_s0  ;;  %v4559_v34 = vpop.f32.mrb[39].mxu0 }
0x30fa   :  { %4586 = vrot.lane.b32.xlu0 %v4559_v34, %s7862_s0 }
0x316b   :  { %v4589_v50 = vpop.permute.xlu1 %4588 }
0x316c   :  { %v4587_v46 = vpop.permute.xlu0 %4586  ;;  %v4597_v3 = vsel %vm1203_vm4, %v4595_v56, %v4589_v50 }
0x316d   :  { %v4596_v1 = vsel %vm1203_vm4, %v4594_v54, %v4587_v46 }
0x316e   :  { %5769 = vmatprep.mubr.msk.f32.mxu0 %vm166_vm0, %v4596_v1 }
0x316f   :  { %5770 = vmatmul.mubr.msk.f32.vlgmr.msra.gmra.mrb[40].mxu0 %vm166_vm0, %v4597_v3 }
0x3242   :  { %v5771_v57 = vpop.f32.mrb[40].mxu0 }
0x3243   :  { %v7765_v43 = vadd.f32 %v5771_v57, %v7599_v38  ;;  %v4675_v58 = vpop.f32.mrb[41].mxu0  ;;  %v4715_v38 = vld [vmem:[#allocation13 + $0x30] sm:$0xff] }
0x3244   :  { %v7768_v45 = vadd.f32 %v4675_v58, %v7602_v36  ;;  %v6142_v22 = vpack.c.bf16 %v4716_v9, %v4715_v38  ;;  %v5093_v36 = vld [vmem:[%s7846_s13 + $0x40] sm:$0xff] }
0x3245   :  { %v4689_v61 = vmul.f32 %v7765_v43, %v7765_v43  ;;  %v6146_v4 = vpack.c.bf16 %v5094_v10, %v5093_v36 }
0x3246   :  { %v4688_v62 = vmul.f32 %v7768_v45, %v7768_v45  ;;  %6143 = vmatprep.subr.bf16.mxu1 %v6142_v22 }
0x3247   :  { %v4693_v63 = vsel %vm166_vm0, %v4689_v61, 0.0  ;;  %6145 = vmatpush3.bf16.msra.mxu1 %v6142_v22  ;;  %6147 = vmatprep.subr.bf16.mxu0 %v6146_v4 }
0x3248   :  { %4694 = vadd.xlane.f32.xlu1 %v4693_v63  ;;  %v4690_v2 = vsel %vm166_vm0, %v4688_v62, 0.0  ;;  %6149 = vmatpush3.bf16.msra.mxu0 %v6146_v4 }
0x3249   :  { %4691 = vadd.xlane.f32.xlu0 %v4690_v2  ;;  %6151 = vmatprep.subr.bf16.mxu0 %v6150_v13 }
0x324c   :  { %6153 = vmatpush3.bf16.msra.mxu0 %v6150_v13 }
0x324d   :  { %6155 = vmatprep.subr.bf16.mxu0 %v6154_v55 }
0x3250   :  { %6157 = vmatpush3.bf16.msra.mxu0 %v6154_v55 }
0x3251   :  { %6159 = vmatprep.subr.bf16.mxu0 %v6158_v27 }
0x3254   :  { %6161 = vmatpush3.bf16.msra.mxu0 %v6158_v27 }
0x32d5   :  { %v4695_v14 = vpop.xlane.xlu1 %4694 }
0x32d6   :  { %v4697_v15 = vmul.f32 0.03125, %v4695_v14  ;;  %v4692_v16 = vpop.xlane.xlu0 %4691 }
0x32d7   :  { %v4696_v52 = vmul.f32 0.03125, %v4692_v16 }
0x32d8   :  { %v4699_v17 = vadd.f32 1e-06, %v4697_v15 }
0x32d9   :  { %v4698_v42 = vadd.f32 1e-06, %v4696_v52 }
0x32da   :  { %6565 = vrsqrt.f32 %v4699_v17 }
0x32db   :  { %6567 = vrsqrt.f32 %v4698_v42 }
0x32e4   :  { %v6566_v59 = vpop.eup %6565 }
0x32e5   :  { %v6568_v51 = vpop.eup %6567  ;;  %v4703_v6 = vmul.f32 %v6566_v59, %v7765_v43 }
0x32e6   :  { %v4702_v18 = vmul.f32 %v6568_v51, %v7768_v45 }
0x32e7   :  { %v4711_v20 = vmul.f32 %v5090_v60, %v4703_v6 }
0x32e8   :  { %v4710_v19 = vmul.f32 %v5090_v60, %v4702_v18 }
0x32ea   :  { %5780 = vmatprep.mubr.msk.f32.mxu1 %vm166_vm0, %v4710_v19 }
0x32eb   :  { %5781 = vmatmul.mubr.msk.f32.vlgmr.msra.gmra.mrb[46].mxu1 %vm166_vm0, %v4711_v20 }
0x33be   :  { %v5782_v37 = vpop.f32.mrb[46].mxu1 }
0x33bf   :  { %v4789_v44 = vpop.f32.mrb[47].mxu1  ;;  %v4799_v40 = vmax.f32 %v5782_v37, 0.0 }
0x33c0   :  { %v4798_v28 = vmax.f32 %v4789_v44, 0.0 }
0x33c2   :  { %5799 = vmatprep.mubr.msk.f32.mxu0 %vm2490_vm5, %v4798_v28 }
0x33c3   :  { %5800 = vmatmul.mubr.msk.f32.vlgmr.msra.gmra.mrb[42].mxu0 %vm2490_vm5, %v4799_v40 }
0x3496   :  { %v5801_v7 = vpop.f32.mrb[42].mxu0 }
0x3497   :  { %v4881_v29 = vpop.f32.mrb[43].mxu0  ;;  %v4891_v30 = vadd.f32 %v5801_v7, %v7765_v43 }
0x3498   :  { %v4890_v31 = vadd.f32 %v4881_v29, %v7768_v45 }
0x3499   :  { %v4894_v48 = vmul.f32 %v4891_v30, %v4891_v30 }
0x349a   :  { %v4893_v32 = vmul.f32 %v4890_v31, %v4890_v31 }
0x349b   :  { %v4898_v23 = vsel %vm166_vm0, %v4894_v48, 0.0 }
0x349c   :  { %v4895_v35 = vsel %vm166_vm0, %v4893_v32, 0.0 }
0x349d   :  { %4896 = vadd.xlane.f32.xlu0 %v4895_v35 }
0x34a1   :  { %4899 = vadd.xlane.f32.xlu0 %v4898_v23 }
0x352a   :  { %v4897_v34 = vpop.xlane.xlu0 %4896 }
0x352b   :  { %v4901_v33 = vmul.f32 0.03125, %v4897_v34 }
0x352d   :  { %v4903_v25 = vadd.f32 1e-06, %v4901_v33 }
0x352e   :  { %v4900_v39 = vpop.xlane.xlu0 %4899 }
0x352f   :  { %6569 = vrsqrt.f32 %v4903_v25  ;;  %v4902_v47 = vmul.f32 0.03125, %v4900_v39 }
0x3531   :  { %v4904_v41 = vadd.f32 1e-06, %v4902_v47 }
0x3533   :  { %6571 = vrsqrt.f32 %v4904_v41 }
0x3539   :  { %v6570_v50 = vpop.eup %6569 }
0x353a   :  { %v4907_v54 = vmul.f32 %v6570_v50, %v4890_v31 }
0x353c   :  { %v4915_v46 = vmul.f32 %v5103_v53, %v4907_v54 }
0x353d   :  { %v6572_v56 = vpop.eup %6571 }
0x353e   :  { %v4908_v1 = vmul.f32 %v6572_v56, %v4891_v30  ;;  %4917 = vst.msk [vmem:[#allocation14] sm:$0xff] %vm166_vm0, %v4915_v46 }
0x3540   :  { %v4916_v3 = vmul.f32 %v5103_v53, %v4908_v1 }
0x3542   :  { %4918 = vst.msk [vmem:[#allocation14 + $0x8] sm:$0xff] %vm166_vm0, %v4916_v3 }
0x3543   :  { %6748 = shalt.err (!%p6745_p4)
}
0x3544   :  { %s6749_s10 = scalar_lea.hbm %s7848_s15, 256 }
0x3545   :  { %p6750_p5 = scmp.ne.s32.totalorder %s7848_s15, %s6749_s10  ;;  %p6753_p6 = scmp.lt.u32.totalorder %s6749_s10, %s7848_s15 }
0x3547   :  { %p6755_p7 = pnand %p6753_p6, %p6750_p5 }
0x3549   :  { %6758 = shalt.err (!%p6755_p7)
}
0x354a   :  { %4930 = dma.vmem_to_hbm [thread:$0]  %s4925_s22, 256, %s7848_s15, [#allocation4], %s7858_s19, %s7858_s19, %s7857_s21  }
0x354b   :  { %6767 = dma.done.wait [#allocation4], 256  }
0x354c   :  { %6768 = vsyncadd [#allocation4], 4294967040 }
0x354d   :  { %4934 = vsyncpa [#allocation3], 1 }
0x354e   :  { %4935 = vsyncpa [#allocation6], 1 }
0x354f   :  { %4936 = vsyncpa [#allocation9], 1 }
0x3550   :  { %4937 = vsyncpa [#allocation12], 1 }
0x3551   :  { %4938 = vsyncpa [#allocation4], 1 }

</bundles_post_ra>
